<compile_context>
chip_gen: v7x
topology: tpu7x:2x2x1
jax: 0.10.0
libtpu: 0.0.40
codegen_flags: <defaults>
</compile_context>

<pallas_src>
import jax
import jax.numpy as jnp
from jax.experimental import pallas as pl
from jax.experimental.pallas import tpu as pltpu

EPS = 1e-5          # torch.nn.BatchNorm2d default
LANE = 128          # TPU lane width


def _round_up(x, m):
  return (x + m - 1) // m * m


def _vmem_limit_bytes():
  """Generation-aware VMEM budget: ~3/4 of capacity, clamped to a safe range."""
  try:
    cap = int(pltpu.get_tpu_info().vmem_capacity_bytes)
    return max(32 * 1024 * 1024, min(cap * 3 // 4, 100 * 1024 * 1024))
  except Exception:                      # pragma: no cover - conservative fallback
    return 32 * 1024 * 1024


VMEM_LIMIT = _vmem_limit_bytes()


# ----------------------------------------------------------------------------
# Per-channel sum / sum-of-squares reduction kernel (BN1 batch statistics).
# ----------------------------------------------------------------------------
def _stats_kernel(x_ref, sums_ref):
  @pl.when(pl.program_id(0) == 0)
  def _():
    sums_ref[...] = jnp.zeros_like(sums_ref)
  x = x_ref[...].astype(jnp.float32)
  x2 = x.reshape(-1, x_ref.shape[-1])
  s = jnp.sum(x2, axis=0, keepdims=True)
  ss = jnp.sum(x2 * x2, axis=0, keepdims=True)
  sums_ref[...] += jnp.concatenate([s, ss], axis=0)


def _channel_sums(x):
  """x: (N, H, W, C) -> (2, C): [sum, sum of squares] over N*H*W."""
  n, h, w, c = x.shape
  return pl.pallas_call(
      _stats_kernel,
      out_shape=jax.ShapeDtypeStruct((2, c), jnp.float32),
      grid_spec=pltpu.PrefetchScalarGridSpec(
          num_scalar_prefetch=0,
          grid=(n,),
          in_specs=[pl.BlockSpec((None, h, w, c), lambda b: (b, 0, 0, 0))],
          out_specs=pl.BlockSpec((2, c), lambda b: (0, 0))),
      compiler_params=pltpu.CompilerParams(
          dimension_semantics=("arbitrary",),
          vmem_limit_bytes=VMEM_LIMIT),
  )(x)


def _bn_affine(sums, count, gamma, beta):
  """Training-mode BN (biased variance) folded to y*scale + bias, all (1, C)."""
  mean = sums[0:1, :] / count
  var = jnp.maximum(sums[1:2, :] / count - mean * mean, 0.0)
  scale = gamma * jax.lax.rsqrt(var + EPS)
  bias = beta - mean * scale
  return scale, bias


# ----------------------------------------------------------------------------
# In-kernel helpers.
# ----------------------------------------------------------------------------
def _zero_pad_hw(t, top, bottom, left, right):
  """Zero-pad a (H, W, C) value spatially via concatenation (Mosaic-safe)."""
  h, w, c = t.shape
  parts = []
  if left:
    parts.append(jnp.zeros((h, left, c), t.dtype))
  parts.append(t)
  if right:
    parts.append(jnp.zeros((h, right, c), t.dtype))
  if len(parts) > 1:
    t = jnp.concatenate(parts, axis=1)
  ww = t.shape[1]
  parts = []
  if top:
    parts.append(jnp.zeros((top, ww, c), t.dtype))
  parts.append(t)
  if bottom:
    parts.append(jnp.zeros((bottom, ww, c), t.dtype))
  if len(parts) > 1:
    t = jnp.concatenate(parts, axis=0)
  return t


def _conv3x3_kfused(xpad, wk_ref, out_rows, stride):
  """3x3 conv as 3 MXU matmuls with K = 3*Cin (kw taps fused into K).

  xpad:   (Hp, W+2, Cin) bf16, spatially zero-padded input,
          Hp >= stride*out_rows + 2.
  wk_ref: (3, 3*Cin, Cout) bf16; tap (kh, kw) lives at rows [kw*Cin:(kw+1)*Cin]
          of wk_ref[kh].
  Returns (out_rows, W, Cout) f32; output row i is taken at source row i*stride.
  """
  _, wp, cin = xpad.shape
  w = wp - 2
  cout = wk_ref.shape[2]
  # Width-shifted copies concatenated on the lane axis -> one matmul per kh tap.
  x3 = jnp.concatenate(
      [xpad[:, 0:w, :], xpad[:, 1:w + 1, :], xpad[:, 2:w + 2, :]], axis=-1)
  acc = jnp.zeros((out_rows * w, cout), jnp.float32)
  for kh in range(3):
    slab = x3[kh:kh + stride * out_rows]                 # contiguous rows
    if stride > 1:
      # Row subsample via a layout-free leading-dim reshape (no strided slice).
      slab = slab.reshape(out_rows, stride, w, 3 * cin)[:, 0]
    acc = acc + jnp.dot(slab.reshape(out_rows * w, 3 * cin), wk_ref[kh],
                        preferred_element_type=jnp.float32)
  return acc.reshape(out_rows, w, cout)


def _partial_stats(v2d):
  """(rows, C) f32 -> (2, C): per-block [sum, sum of squares]."""
  return jnp.concatenate([jnp.sum(v2d, axis=0, keepdims=True),
                          jnp.sum(v2d * v2d, axis=0, keepdims=True)], axis=0)


# ----------------------------------------------------------------------------
# Residual-branch kernel: BN1(affine) -> conv3x3 -> PReLU -> conv3x3 (strided
# rows) + fused BN2 (and optional shortcut-conv + BNsc) partial statistics.
# ----------------------------------------------------------------------------
def _make_res_kernel(stride, with_shortcut):
  def kernel(*refs):
    if with_shortcut:
      (x_ref, xds_ref, scale1_ref, bias1_ref, w1_ref, alpha_ref, w2_ref,
       wsc_ref, z_ref, zstat_ref, sc_ref, scstat_ref) = refs
    else:
      (x_ref, scale1_ref, bias1_ref, w1_ref, alpha_ref, w2_ref,
       z_ref, zstat_ref) = refs

    h, w, _ = x_ref.shape
    dp = w2_ref.shape[2]
    ho = z_ref.shape[0]
    wo = (w - 1) // stride + 1

    # ---- BN1 (batch-stat affine) -> conv1 (stride 1) -> PReLU(depth)
    xh = (x_ref[...] * scale1_ref[...] + bias1_ref[...]).astype(jnp.bfloat16)
    xp = _zero_pad_hw(xh, 1, 1, 1, 1)                    # (h+2, w+2, cp)
    y = _conv3x3_kfused(xp, w1_ref, h, 1)                # (h, w, dp) f32
    y = jnp.where(y > 0, y, alpha_ref[...] * y)

    # ---- conv2: evaluated only at the strided output rows
    ypad = _zero_pad_hw(y.astype(jnp.bfloat16), 1, stride * ho - h + 1, 1, 1)
    z = _conv3x3_kfused(ypad, w2_ref, ho, stride)        # (ho, w, dp) f32
    z_ref[...] = z

    # ---- fused BN2 partial stats over the strided output columns (masked sum)
    if stride > 1:
      col = jax.lax.broadcasted_iota(jnp.int32, (w, dp), 0)
      keep = (col % stride == 0) & (col < wo * stride)
      zm = jnp.where(keep, z, 0.0)
    else:
      zm = z
    zstat_ref[...] = _partial_stats(zm.reshape(ho * w, dp))

    if with_shortcut:
      # 1x1 shortcut conv directly on the (already strided) input.
      xds = xds_ref[...]                                  # (ho, wo, cp) f32
      hs, ws, cps = xds.shape
      sc = jnp.dot(xds.astype(jnp.bfloat16).reshape(hs * ws, cps), wsc_ref[...],
                   preferred_element_type=jnp.float32)
      sc_ref[...] = sc.reshape(hs, ws, dp)
      scstat_ref[...] = _partial_stats(sc)
  return kernel


# ----------------------------------------------------------------------------
# Finalize kernel: BN2(affine) on res branch + shortcut (optionally BN'd) add.
# ----------------------------------------------------------------------------
def _finalize_kernel(z_ref, sc_ref, scale2_ref, bias2_ref, out_ref):
  out_ref[...] = (z_ref[...] * scale2_ref[...] + bias2_ref[...]) + sc_ref[...]


def _finalize_kernel_scbn(z_ref, sc_ref, scale2_ref, bias2_ref,
                          scale_sc_ref, bias_sc_ref, out_ref):
  res = z_ref[...] * scale2_ref[...] + bias2_ref[...]
  sc = sc_ref[...] * scale_sc_ref[...] + bias_sc_ref[...]
  out_ref[...] = res + sc


# ----------------------------------------------------------------------------
# Wrapper
# ----------------------------------------------------------------------------
def _bottleneck_ir_forward(x_nchw, params, stride):
  n, cin, h, w = x_nchw.shape
  depth = params["w1"].shape[0]
  use_conv_shortcut = cin != depth
  cp = _round_up(cin, LANE)
  dp = _round_up(depth, LANE)
  ho = (h - 1) // stride + 1
  wo = (w - 1) // stride + 1

  def pad_vec(v, c):                     # (k,) -> (1, c), zero padded
    v = jnp.asarray(v, jnp.float32).reshape(1, -1)
    return jnp.pad(v, ((0, 0), (0, c - v.shape[1])))

  def prep_w3x3(wt, ci, co, cip, cop):   # torch (O,I,3,3) -> (3, 3*cip, cop) bf16
    wt = jnp.transpose(wt, (2, 3, 1, 0))                  # (kh, kw, I, O)
    wt = jnp.pad(wt, ((0, 0), (0, 0), (0, cip - ci), (0, cop - co)))
    return wt.reshape(3, 3 * cip, cop).astype(jnp.bfloat16)

  # NCHW -> NHWC, channels zero-padded onto the 128-lane axis.
  x = jnp.transpose(x_nchw, (0, 2, 3, 1)).astype(jnp.float32)
  x = jnp.pad(x, ((0, 0), (0, 0), (0, 0), (0, cp - cin)))
  x_ds = x[:, ::stride, ::stride, :]     # MaxPool2d(1,s) / 1x1-conv strided input

  w1k = prep_w3x3(params["w1"], cin, depth, cp, dp)
  w2k = prep_w3x3(params["w2"], depth, depth, dp, dp)
  alpha = pad_vec(params["alpha"], dp)

  cparams = pltpu.CompilerParams(dimension_semantics=("parallel",),
                                 vmem_limit_bytes=VMEM_LIMIT)

  def vec_spec(c):
    return pl.BlockSpec((1, c), lambda b: (0, 0))

  def img_spec(hh, ww, c):
    return pl.BlockSpec((None, hh, ww, c), lambda b: (b, 0, 0, 0))

  def stat_spec(c):
    return pl.BlockSpec((None, 2, c), lambda b: (b, 0, 0))

  # ---- BN1 batch statistics (Pallas reduction) -> affine scale/bias
  sums1 = _channel_sums(x)
  scale1, bias1 = _bn_affine(sums1, float(n * h * w),
                             pad_vec(params["bn1_g"], cp),
                             pad_vec(params["bn1_b"], cp))

  # ---- residual branch (+ shortcut conv) with fused partial BN statistics
  if use_conv_shortcut:
    wsc = jnp.transpose(params["wsc"][:, :, 0, 0], (1, 0))       # (cin, depth)
    wsc = jnp.pad(wsc, ((0, cp - cin), (0, dp - depth))).astype(jnp.bfloat16)
    z_rows, zstat, sc, scstat = pl.pallas_call(
        _make_res_kernel(stride, True),
        out_shape=(jax.ShapeDtypeStruct((n, ho, w, dp), jnp.float32),
                   jax.ShapeDtypeStruct((n, 2, dp), jnp.float32),
                   jax.ShapeDtypeStruct((n, ho, wo, dp), jnp.float32),
                   jax.ShapeDtypeStruct((n, 2, dp), jnp.float32)),
        grid_spec=pltpu.PrefetchScalarGridSpec(
            num_scalar_prefetch=0, grid=(n,),
            in_specs=[img_spec(h, w, cp), img_spec(ho, wo, cp),
                      vec_spec(cp), vec_spec(cp),
                      pl.BlockSpec((3, 3 * cp, dp), lambda b: (0, 0, 0)),
                      vec_spec(dp),
                      pl.BlockSpec((3, 3 * dp, dp), lambda b: (0, 0, 0)),
                      pl.BlockSpec((cp, dp), lambda b: (0, 0))],
            out_specs=(img_spec(ho, w, dp), stat_spec(dp),
                       img_spec(ho, wo, dp), stat_spec(dp))),
        compiler_params=cparams,
    )(x, x_ds, scale1, bias1, w1k, alpha, w2k, wsc)
  else:
    z_rows, zstat = pl.pallas_call(
        _make_res_kernel(stride, False),
        out_shape=(jax.ShapeDtypeStruct((n, ho, w, dp), jnp.float32),
                   jax.ShapeDtypeStruct((n, 2, dp), jnp.float32)),
        grid_spec=pltpu.PrefetchScalarGridSpec(
            num_scalar_prefetch=0, grid=(n,),
            in_specs=[img_spec(h, w, cp), vec_spec(cp), vec_spec(cp),
                      pl.BlockSpec((3, 3 * cp, dp), lambda b: (0, 0, 0)),
                      vec_spec(dp),
                      pl.BlockSpec((3, 3 * dp, dp), lambda b: (0, 0, 0))],
            out_specs=(img_spec(ho, w, dp), stat_spec(dp))),
        compiler_params=cparams,
    )(x, scale1, bias1, w1k, alpha, w2k)
    sc, scstat = None, None

  # Width stride is free addressing on the already row-strided (s x smaller) z.
  z = z_rows[:, :, ::stride, :]

  scale2, bias2 = _bn_affine(jnp.sum(zstat, axis=0), float(n * ho * wo),
                             pad_vec(params["bn2_g"], dp),
                             pad_vec(params["bn2_b"], dp))

  if use_conv_shortcut:
    scale_sc, bias_sc = _bn_affine(jnp.sum(scstat, axis=0), float(n * ho * wo),
                                   pad_vec(params["bnsc_g"], dp),
                                   pad_vec(params["bnsc_b"], dp))
    out_rows = pl.pallas_call(
        _finalize_kernel_scbn,
        out_shape=jax.ShapeDtypeStruct((n, ho, wo, dp), jnp.float32),
        grid_spec=pltpu.PrefetchScalarGridSpec(
            num_scalar_prefetch=0, grid=(n,),
            in_specs=[img_spec(ho, wo, dp), img_spec(ho, wo, dp),
                      vec_spec(dp), vec_spec(dp), vec_spec(dp), vec_spec(dp)],
            out_specs=img_spec(ho, wo, dp)),
        compiler_params=cparams,
    )(z, sc, scale2, bias2, scale_sc, bias_sc)
  else:
    out_rows = pl.pallas_call(
        _finalize_kernel,
        out_shape=jax.ShapeDtypeStruct((n, ho, wo, dp), jnp.float32),
        grid_spec=pltpu.PrefetchScalarGridSpec(
            num_scalar_prefetch=0, grid=(n,),
            in_specs=[img_spec(ho, wo, dp), img_spec(ho, wo, dp),
                      vec_spec(dp), vec_spec(dp)],
            out_specs=img_spec(ho, wo, dp)),
        compiler_params=cparams,
    )(z, x_ds, scale2, bias2)

  # Drop channel padding, back to NCHW to match the PyTorch module.
  return jnp.transpose(out_rows[..., :depth], (0, 3, 1, 2))


bottleneck_ir_forward = jax.jit(_bottleneck_ir_forward, static_argnums=2)


# ----------------------------------------------------------------------------
# Pure-JAX reference (verification only)
# ----------------------------------------------------------------------------
def bottleneck_ir_reference(x, params, stride):
  _, cin, _, _ = x.shape
  depth = params["w1"].shape[0]

  def bn(y, g, b):
    mu = jnp.mean(y, axis=(0, 2, 3), keepdims=True)
    var = jnp.mean((y - mu) ** 2, axis=(0, 2, 3), keepdims=True)
    return ((y - mu) / jnp.sqrt(var + EPS) * g.reshape(1, -1, 1, 1)
            + b.reshape(1, -1, 1, 1))

  def conv(y, wgt, s, pad):
    return jax.lax.conv_general_dilated(
        y, wgt, window_strides=(s, s), padding=[(pad, pad), (pad, pad)],
        dimension_numbers=("NCHW", "OIHW", "NCHW"),
        precision=jax.lax.Precision.HIGHEST)

  r = bn(x, params["bn1_g"], params["bn1_b"])
  r = conv(r, params["w1"], 1, 1)
  a = params["alpha"].reshape(1, -1, 1, 1)
  r = jnp.where(r > 0, r, a * r)
  r = conv(r, params["w2"], stride, 1)
  r = bn(r, params["bn2_g"], params["bn2_b"])

  if cin != depth:
    s = conv(x, params["wsc"], stride, 0)
    s = bn(s, params["bnsc_g"], params["bnsc_b"])
  else:
    s = x[:, :, ::stride, ::stride]                # MaxPool2d(1, stride)
  return r + s


def init_params(key, in_channel, depth):
  ks = jax.random.split(key, 9)
  p = {
      "w1": 0.1 * jax.random.normal(ks[0], (depth, in_channel, 3, 3), jnp.float32),
      "w2": 0.1 * jax.random.normal(ks[1], (depth, depth, 3, 3), jnp.float32),
      "bn1_g": 1.0 + 0.1 * jax.random.normal(ks[2], (in_channel,), jnp.float32),
      "bn1_b": 0.1 * jax.random.normal(ks[3], (in_channel,), jnp.float32),
      "bn2_g": 1.0 + 0.1 * jax.random.normal(ks[4], (depth,), jnp.float32),
      "bn2_b": 0.1 * jax.random.normal(ks[5], (depth,), jnp.float32),
      "alpha": jnp.full((depth,), 0.25, jnp.float32),  # torch PReLU default
  }
  if in_channel != depth:
    p["wsc"] = 0.1 * jax.random.normal(ks[6], (depth, in_channel, 1, 1), jnp.float32)
    p["bnsc_g"] = 1.0 + 0.1 * jax.random.normal(ks[7], (depth,), jnp.float32)
    p["bnsc_b"] = 0.1 * jax.random.normal(ks[8], (depth,), jnp.float32)
  return p


if __name__ == "__main__":
  key = jax.random.PRNGKey(0)
  kx1, kp1, kx2, kp2, kx3, kp3 = jax.random.split(key, 6)

  # Case 1: in_channel != depth  -> Conv1x1(stride) + BN shortcut, stride 2.
  x = jax.random.normal(kx1, (2, 4, 16, 16), jnp.float32)
  params = init_params(kp1, 4, 8)
  out = jax.block_until_ready(bottleneck_ir_forward(x, params, 2))
  ref = bottleneck_ir_reference(x, params, 2)
  assert out.shape == ref.shape == (2, 8, 8, 8), (out.shape, ref.shape)
  assert jnp.allclose(out, ref, atol=2e-2, rtol=2e-2), \
      float(jnp.max(jnp.abs(out - ref)))

  # Case 2: in_channel == depth  -> MaxPool2d(1, stride) shortcut, stride 2.
  x2 = jax.random.normal(kx2, (2, 8, 16, 16), jnp.float32)
  params2 = init_params(kp2, 8, 8)
  out2 = jax.block_until_ready(bottleneck_ir_forward(x2, params2, 2))
  ref2 = bottleneck_ir_reference(x2, params2, 2)
  assert out2.shape == ref2.shape == (2, 8, 8, 8), (out2.shape, ref2.shape)
  assert jnp.allclose(out2, ref2, atol=2e-2, rtol=2e-2), \
      float(jnp.max(jnp.abs(out2 - ref2)))

  # Case 3: identity shortcut, stride 1.
  x3 = jax.random.normal(kx3, (2, 8, 16, 16), jnp.float32)
  params3 = init_params(kp3, 8, 8)
  out3 = jax.block_until_ready(bottleneck_ir_forward(x3, params3, 1))
  ref3 = bottleneck_ir_reference(x3, params3, 1)
  assert out3.shape == ref3.shape == (2, 8, 16, 16), (out3.shape, ref3.shape)
  assert jnp.allclose(out3, ref3, atol=2e-2, rtol=2e-2), \
      float(jnp.max(jnp.abs(out3 - ref3)))

  print("KERNEL_OK")
</pallas_src>

<mosaic_0001>
module attributes {stable_mosaic.version = 11 : i64} {
  func.func @_stats_kernel(%arg0: i32, %arg1: memref<1x16x16x128xf32, #tpu.memory_space<vmem>>, %arg2: memref<2x128xf32, #tpu.memory_space<vmem>>) attributes {dimension_semantics = [#tpu.dimension_semantics<arbitrary>], iteration_bounds = array<i64: 2>, scalar_prefetch = 0 : i64, scratch_operands = 0 : i64, tpu.core_type = #tpu.core_type<tc>, window_params = [{transform_indices = @transform_0, window_bounds = array<i64: 1, 16, 16, 128>}, {pipeline_mode = #tpu.pipeline_mode<synchronous>, transform_indices = @transform_1, window_bounds = array<i64: 2, 128>}]} {
    %c0_i32 = arith.constant 0 : i32
    %0 = arith.cmpi eq, %arg0, %c0_i32 : i32
    %1 = arith.extui %0 : i1 to i32
    %c0_i32_0 = arith.constant 0 : i32
    %2 = arith.cmpi ne, %1, %c0_i32_0 : i32
    scf.if %2 {
      %cst_9 = arith.constant 0.000000e+00 : f32
      %15 = vector.broadcast %cst_9 : f32 to vector<2x128xf32>
      %c0_10 = arith.constant 0 : index
      %c0_11 = arith.constant 0 : index
      %16 = vector.load %arg2[%c0_10, %c0_11] : memref<2x128xf32, #tpu.memory_space<vmem>>, vector<2x128xf32>
      tpu.vector_store %arg2[%c0_10, %c0_11], %15 {strides = array<i32>} : memref<2x128xf32, #tpu.memory_space<vmem>>, vector<2x128xf32>,
    } else {
    }
    %c0 = arith.constant 0 : index
    %c0_1 = arith.constant 0 : index
    %c0_2 = arith.constant 0 : index
    %c0_3 = arith.constant 0 : index
    %3 = vector.load %arg1[%c0, %c0_1, %c0_2, %c0_3] : memref<1x16x16x128xf32, #tpu.memory_space<vmem>>, vector<1x16x16x128xf32>
    %4 = vector.shape_cast %3 : vector<1x16x16x128xf32> to vector<16x16x128xf32>
    %5 = vector.shape_cast %4 : vector<16x16x128xf32> to vector<256x128xf32>
    %cst = arith.constant dense<0.000000e+00> : vector<128xf32>
    %6 = vector.multi_reduction <add>, %5, %cst [0] : vector<256x128xf32> to vector<128xf32>
    %7 = vector.shape_cast %6 : vector<128xf32> to vector<1x128xf32>
    %8 = arith.mulf %5, %5 : vector<256x128xf32>
    %cst_4 = arith.constant dense<0.000000e+00> : vector<128xf32>
    %9 = vector.multi_reduction <add>, %8, %cst_4 [0] : vector<256x128xf32> to vector<128xf32>
    %10 = vector.shape_cast %9 : vector<128xf32> to vector<1x128xf32>
    %c0_5 = arith.constant 0 : index
    %c0_6 = arith.constant 0 : index
    %11 = vector.load %arg2[%c0_5, %c0_6] : memref<2x128xf32, #tpu.memory_space<vmem>>, vector<2x128xf32>
    %12 = tpu.concatenate %7, %10 in 0 : vector<1x128xf32>, vector<1x128xf32> -> vector<2x128xf32>
    %13 = arith.addf %11, %12 : vector<2x128xf32>
    %c0_7 = arith.constant 0 : index
    %c0_8 = arith.constant 0 : index
    %14 = vector.load %arg2[%c0_7, %c0_8] : memref<2x128xf32, #tpu.memory_space<vmem>>, vector<2x128xf32>
    tpu.vector_store %arg2[%c0_7, %c0_8], %13 {strides = array<i32>} : memref<2x128xf32, #tpu.memory_space<vmem>>, vector<2x128xf32>,
    return
  }
  func.func @transform_0(%arg0: i32) -> (i32, i32, i32, i32) {
    %c0_i32 = arith.constant 0 : i32
    %c0_i32_0 = arith.constant 0 : i32
    %c0_i32_1 = arith.constant 0 : i32
    %c0_i32_2 = arith.constant 0 : i32
    return %arg0, %c0_i32, %c0_i32_0, %c0_i32_1 : i32, i32, i32, i32
  }
  func.func @transform_1(%arg0: i32) -> (i32, i32) {
    %c0_i32 = arith.constant 0 : i32
    %c0_i32_0 = arith.constant 0 : i32
    %c0_i32_1 = arith.constant 0 : i32
    return %c0_i32, %c0_i32_0 : i32, i32
  }
}

module attributes {stable_mosaic.version = 11 : i64} {
  func.func @kernel(%arg0: i32, %arg1: memref<1x16x16x128xf32, #tpu.memory_space<vmem>>, %arg2: memref<1x8x8x128xf32, #tpu.memory_space<vmem>>, %arg3: memref<1x128xf32, #tpu.memory_space<vmem>>, %arg4: memref<1x128xf32, #tpu.memory_space<vmem>>, %arg5: memref<3x384x128xbf16, #tpu.memory_space<vmem>>, %arg6: memref<1x128xf32, #tpu.memory_space<vmem>>, %arg7: memref<3x384x128xbf16, #tpu.memory_space<vmem>>, %arg8: memref<128x128xbf16, #tpu.memory_space<vmem>>, %arg9: memref<1x8x16x128xf32, #tpu.memory_space<vmem>>, %arg10: memref<1x2x128xf32, #tpu.memory_space<vmem>>, %arg11: memref<1x8x8x128xf32, #tpu.memory_space<vmem>>, %arg12: memref<1x2x128xf32, #tpu.memory_space<vmem>>) attributes {dimension_semantics = [#tpu.dimension_semantics<parallel>], iteration_bounds = array<i64: 2>, scalar_prefetch = 0 : i64, scratch_operands = 0 : i64, tpu.core_type = #tpu.core_type<tc>, window_params = [{transform_indices = @transform_0, window_bounds = array<i64: 1, 16, 16, 128>}, {transform_indices = @transform_1, window_bounds = array<i64: 1, 8, 8, 128>}, {pipeline_mode = #tpu.pipeline_mode<synchronous>, transform_indices = @transform_2, window_bounds = array<i64: 1, 128>}, {pipeline_mode = #tpu.pipeline_mode<synchronous>, transform_indices = @transform_3, window_bounds = array<i64: 1, 128>}, {pipeline_mode = #tpu.pipeline_mode<synchronous>, transform_indices = @transform_4, window_bounds = array<i64: 3, 384, 128>}, {pipeline_mode = #tpu.pipeline_mode<synchronous>, transform_indices = @transform_5, window_bounds = array<i64: 1, 128>}, {pipeline_mode = #tpu.pipeline_mode<synchronous>, transform_indices = @transform_6, window_bounds = array<i64: 3, 384, 128>}, {pipeline_mode = #tpu.pipeline_mode<synchronous>, transform_indices = @transform_7, window_bounds = array<i64: 128, 128>}, {transform_indices = @transform_8, window_bounds = array<i64: 1, 8, 16, 128>}, {transform_indices = @transform_9, window_bounds = array<i64: 1, 2, 128>}, {transform_indices = @transform_10, window_bounds = array<i64: 1, 8, 8, 128>}, {transform_indices = @transform_11, window_bounds = array<i64: 1, 2, 128>}]} {
    %c0 = arith.constant 0 : index
    %c0_0 = arith.constant 0 : index
    %c0_1 = arith.constant 0 : index
    %c0_2 = arith.constant 0 : index
    %0 = vector.load %arg1[%c0, %c0_0, %c0_1, %c0_2] : memref<1x16x16x128xf32, #tpu.memory_space<vmem>>, vector<1x16x16x128xf32>
    %1 = vector.shape_cast %0 : vector<1x16x16x128xf32> to vector<16x16x128xf32>
    %c0_3 = arith.constant 0 : index
    %c0_4 = arith.constant 0 : index
    %2 = vector.load %arg3[%c0_3, %c0_4] : memref<1x128xf32, #tpu.memory_space<vmem>>, vector<1x128xf32>
    %3 = vector.shape_cast %2 : vector<1x128xf32> to vector<1x1x128xf32>
    %4 = vector.broadcast %3 : vector<1x1x128xf32> to vector<16x16x128xf32>
    %5 = arith.mulf %1, %4 : vector<16x16x128xf32>
    %c0_5 = arith.constant 0 : index
    %c0_6 = arith.constant 0 : index
    %6 = vector.load %arg4[%c0_5, %c0_6] : memref<1x128xf32, #tpu.memory_space<vmem>>, vector<1x128xf32>
    %7 = vector.shape_cast %6 : vector<1x128xf32> to vector<1x1x128xf32>
    %8 = vector.broadcast %7 : vector<1x1x128xf32> to vector<16x16x128xf32>
    %9 = arith.addf %5, %8 : vector<16x16x128xf32>
    %10 = arith.truncf %9 : vector<16x16x128xf32> to vector<16x16x128xbf16>
    %cst = arith.constant 0.000000e+00 : bf16
    %11 = vector.broadcast %cst : bf16 to vector<16x1x128xbf16>
    %cst_7 = arith.constant 0.000000e+00 : bf16
    %12 = vector.broadcast %cst_7 : bf16 to vector<16x1x128xbf16>
    %13 = tpu.concatenate %11, %10, %12 in 1 : vector<16x1x128xbf16>, vector<16x16x128xbf16>, vector<16x1x128xbf16> -> vector<16x18x128xbf16>
    %cst_8 = arith.constant 0.000000e+00 : bf16
    %14 = vector.broadcast %cst_8 : bf16 to vector<1x18x128xbf16>
    %cst_9 = arith.constant 0.000000e+00 : bf16
    %15 = vector.broadcast %cst_9 : bf16 to vector<1x18x128xbf16>
    %16 = tpu.concatenate %14, %13, %15 in 0 : vector<1x18x128xbf16>, vector<16x18x128xbf16>, vector<1x18x128xbf16> -> vector<18x18x128xbf16>
    %17 = vector.extract_strided_slice %16 {offsets = [0, 0, 0], sizes = [18, 16, 128], strides = [1, 1, 1]} : vector<18x18x128xbf16> to vector<18x16x128xbf16>
    %18 = vector.extract_strided_slice %16 {offsets = [0, 1, 0], sizes = [18, 16, 128], strides = [1, 1, 1]} : vector<18x18x128xbf16> to vector<18x16x128xbf16>
    %19 = vector.extract_strided_slice %16 {offsets = [0, 2, 0], sizes = [18, 16, 128], strides = [1, 1, 1]} : vector<18x18x128xbf16> to vector<18x16x128xbf16>
    %20 = tpu.concatenate %17, %18, %19 in 2 : vector<18x16x128xbf16>, vector<18x16x128xbf16>, vector<18x16x128xbf16> -> vector<18x16x384xbf16>
    %cst_10 = arith.constant 0.000000e+00 : f32
    %21 = vector.broadcast %cst_10 : f32 to vector<256x128xf32>
    %22 = vector.extract_strided_slice %20 {offsets = [0, 0, 0], sizes = [16, 16, 384], strides = [1, 1, 1]} : vector<18x16x384xbf16> to vector<16x16x384xbf16>
    %23 = vector.shape_cast %22 : vector<16x16x384xbf16> to vector<256x384xbf16>
    %c0_11 = arith.constant 0 : index
    %c0_12 = arith.constant 0 : index
    %c0_13 = arith.constant 0 : index
    %24 = vector.load %arg5[%c0_11, %c0_12, %c0_13] : memref<3x384x128xbf16, #tpu.memory_space<vmem>>, vector<1x384x128xbf16>
    %25 = vector.shape_cast %24 : vector<1x384x128xbf16> to vector<384x128xbf16>
    %cst_14 = arith.constant dense<0.000000e+00> : vector<256x128xf32>
    %26 = tpu.matmul %23, %25, %cst_14 {dimension_numbers = #tpu.dot_dimension_numbers<[1], [0], [0], [1], [0, 0, 1, 1], [], []>} : vector<256x384xbf16>, vector<384x128xbf16>, vector<256x128xf32> -> vector<256x128xf32>
    %27 = arith.addf %21, %26 : vector<256x128xf32>
    %28 = vector.extract_strided_slice %20 {offsets = [1, 0, 0], sizes = [16, 16, 384], strides = [1, 1, 1]} : vector<18x16x384xbf16> to vector<16x16x384xbf16>
    %29 = vector.shape_cast %28 : vector<16x16x384xbf16> to vector<256x384xbf16>
    %c1 = arith.constant 1 : index
    %c0_15 = arith.constant 0 : index
    %c0_16 = arith.constant 0 : index
    %30 = vector.load %arg5[%c1, %c0_15, %c0_16] : memref<3x384x128xbf16, #tpu.memory_space<vmem>>, vector<1x384x128xbf16>
    %31 = vector.shape_cast %30 : vector<1x384x128xbf16> to vector<384x128xbf16>
    %cst_17 = arith.constant dense<0.000000e+00> : vector<256x128xf32>
    %32 = tpu.matmul %29, %31, %cst_17 {dimension_numbers = #tpu.dot_dimension_numbers<[1], [0], [0], [1], [0, 0, 1, 1], [], []>} : vector<256x384xbf16>, vector<384x128xbf16>, vector<256x128xf32> -> vector<256x128xf32>
    %33 = arith.addf %27, %32 : vector<256x128xf32>
    %34 = vector.extract_strided_slice %20 {offsets = [2, 0, 0], sizes = [16, 16, 384], strides = [1, 1, 1]} : vector<18x16x384xbf16> to vector<16x16x384xbf16>
    %35 = vector.shape_cast %34 : vector<16x16x384xbf16> to vector<256x384xbf16>
    %c2 = arith.constant 2 : index
    %c0_18 = arith.constant 0 : index
    %c0_19 = arith.constant 0 : index
    %36 = vector.load %arg5[%c2, %c0_18, %c0_19] : memref<3x384x128xbf16, #tpu.memory_space<vmem>>, vector<1x384x128xbf16>
    %37 = vector.shape_cast %36 : vector<1x384x128xbf16> to vector<384x128xbf16>
    %cst_20 = arith.constant dense<0.000000e+00> : vector<256x128xf32>
    %38 = tpu.matmul %35, %37, %cst_20 {dimension_numbers = #tpu.dot_dimension_numbers<[1], [0], [0], [1], [0, 0, 1, 1], [], []>} : vector<256x384xbf16>, vector<384x128xbf16>, vector<256x128xf32> -> vector<256x128xf32>
    %39 = arith.addf %33, %38 : vector<256x128xf32>
    %40 = vector.shape_cast %39 : vector<256x128xf32> to vector<16x16x128xf32>
    %cst_21 = arith.constant 0.000000e+00 : f32
    %41 = vector.broadcast %cst_21 : f32 to vector<16x16x128xf32>
    %42 = arith.cmpf ogt, %40, %41 : vector<16x16x128xf32>
    %c0_22 = arith.constant 0 : index
    %c0_23 = arith.constant 0 : index
    %43 = vector.load %arg6[%c0_22, %c0_23] : memref<1x128xf32, #tpu.memory_space<vmem>>, vector<1x128xf32>
    %44 = vector.shape_cast %43 : vector<1x128xf32> to vector<1x1x128xf32>
    %45 = vector.broadcast %44 : vector<1x1x128xf32> to vector<16x16x128xf32>
    %46 = arith.mulf %45, %40 : vector<16x16x128xf32>
    %47 = arith.select %42, %40, %46 : vector<16x16x128xi1>, vector<16x16x128xf32>
    %48 = arith.truncf %47 : vector<16x16x128xf32> to vector<16x16x128xbf16>
    %cst_24 = arith.constant 0.000000e+00 : bf16
    %49 = vector.broadcast %cst_24 : bf16 to vector<16x1x128xbf16>
    %cst_25 = arith.constant 0.000000e+00 : bf16
    %50 = vector.broadcast %cst_25 : bf16 to vector<16x1x128xbf16>
    %51 = tpu.concatenate %49, %48, %50 in 1 : vector<16x1x128xbf16>, vector<16x16x128xbf16>, vector<16x1x128xbf16> -> vector<16x18x128xbf16>
    %cst_26 = arith.constant 0.000000e+00 : bf16
    %52 = vector.broadcast %cst_26 : bf16 to vector<1x18x128xbf16>
    %cst_27 = arith.constant 0.000000e+00 : bf16
    %53 = vector.broadcast %cst_27 : bf16 to vector<1x18x128xbf16>
    %54 = tpu.concatenate %52, %51, %53 in 0 : vector<1x18x128xbf16>, vector<16x18x128xbf16>, vector<1x18x128xbf16> -> vector<18x18x128xbf16>
    %55 = vector.extract_strided_slice %54 {offsets = [0, 0, 0], sizes = [18, 16, 128], strides = [1, 1, 1]} : vector<18x18x128xbf16> to vector<18x16x128xbf16>
    %56 = vector.extract_strided_slice %54 {offsets = [0, 1, 0], sizes = [18, 16, 128], strides = [1, 1, 1]} : vector<18x18x128xbf16> to vector<18x16x128xbf16>
    %57 = vector.extract_strided_slice %54 {offsets = [0, 2, 0], sizes = [18, 16, 128], strides = [1, 1, 1]} : vector<18x18x128xbf16> to vector<18x16x128xbf16>
    %58 = tpu.concatenate %55, %56, %57 in 2 : vector<18x16x128xbf16>, vector<18x16x128xbf16>, vector<18x16x128xbf16> -> vector<18x16x384xbf16>
    %cst_28 = arith.constant 0.000000e+00 : f32
    %59 = vector.broadcast %cst_28 : f32 to vector<128x128xf32>
    %60 = vector.extract_strided_slice %58 {offsets = [0, 0, 0], sizes = [16, 16, 384], strides = [1, 1, 1]} : vector<18x16x384xbf16> to vector<16x16x384xbf16>
    %61 = vector.shape_cast %60 : vector<16x16x384xbf16> to vector<8x2x16x384xbf16>
    %62 = vector.extract_strided_slice %61 {offsets = [0, 0, 0, 0], sizes = [8, 1, 16, 384], strides = [1, 1, 1, 1]} : vector<8x2x16x384xbf16> to vector<8x1x16x384xbf16>
    %63 = vector.shape_cast %62 : vector<8x1x16x384xbf16> to vector<8x16x384xbf16>
    %64 = vector.shape_cast %63 : vector<8x16x384xbf16> to vector<128x384xbf16>
    %c0_29 = arith.constant 0 : index
    %c0_30 = arith.constant 0 : index
    %c0_31 = arith.constant 0 : index
    %65 = vector.load %arg7[%c0_29, %c0_30, %c0_31] : memref<3x384x128xbf16, #tpu.memory_space<vmem>>, vector<1x384x128xbf16>
    %66 = vector.shape_cast %65 : vector<1x384x128xbf16> to vector<384x128xbf16>
    %cst_32 = arith.constant dense<0.000000e+00> : vector<128x128xf32>
    %67 = tpu.matmul %64, %66, %cst_32 {dimension_numbers = #tpu.dot_dimension_numbers<[1], [0], [0], [1], [0, 0, 1, 1], [], []>} : vector<128x384xbf16>, vector<384x128xbf16>, vector<128x128xf32> -> vector<128x128xf32>
    %68 = arith.addf %59, %67 : vector<128x128xf32>
    %69 = vector.extract_strided_slice %58 {offsets = [1, 0, 0], sizes = [16, 16, 384], strides = [1, 1, 1]} : vector<18x16x384xbf16> to vector<16x16x384xbf16>
    %70 = vector.shape_cast %69 : vector<16x16x384xbf16> to vector<8x2x16x384xbf16>
    %71 = vector.extract_strided_slice %70 {offsets = [0, 0, 0, 0], sizes = [8, 1, 16, 384], strides = [1, 1, 1, 1]} : vector<8x2x16x384xbf16> to vector<8x1x16x384xbf16>
    %72 = vector.shape_cast %71 : vector<8x1x16x384xbf16> to vector<8x16x384xbf16>
    %73 = vector.shape_cast %72 : vector<8x16x384xbf16> to vector<128x384xbf16>
    %c1_33 = arith.constant 1 : index
    %c0_34 = arith.constant 0 : index
    %c0_35 = arith.constant 0 : index
    %74 = vector.load %arg7[%c1_33, %c0_34, %c0_35] : memref<3x384x128xbf16, #tpu.memory_space<vmem>>, vector<1x384x128xbf16>
    %75 = vector.shape_cast %74 : vector<1x384x128xbf16> to vector<384x128xbf16>
    %cst_36 = arith.constant dense<0.000000e+00> : vector<128x128xf32>
    %76 = tpu.matmul %73, %75, %cst_36 {dimension_numbers = #tpu.dot_dimension_numbers<[1], [0], [0], [1], [0, 0, 1, 1], [], []>} : vector<128x384xbf16>, vector<384x128xbf16>, vector<128x128xf32> -> vector<128x128xf32>
    %77 = arith.addf %68, %76 : vector<128x128xf32>
    %78 = vector.extract_strided_slice %58 {offsets = [2, 0, 0], sizes = [16, 16, 384], strides = [1, 1, 1]} : vector<18x16x384xbf16> to vector<16x16x384xbf16>
    %79 = vector.shape_cast %78 : vector<16x16x384xbf16> to vector<8x2x16x384xbf16>
    %80 = vector.extract_strided_slice %79 {offsets = [0, 0, 0, 0], sizes = [8, 1, 16, 384], strides = [1, 1, 1, 1]} : vector<8x2x16x384xbf16> to vector<8x1x16x384xbf16>
    %81 = vector.shape_cast %80 : vector<8x1x16x384xbf16> to vector<8x16x384xbf16>
    %82 = vector.shape_cast %81 : vector<8x16x384xbf16> to vector<128x384xbf16>
    %c2_37 = arith.constant 2 : index
    %c0_38 = arith.constant 0 : index
    %c0_39 = arith.constant 0 : index
    %83 = vector.load %arg7[%c2_37, %c0_38, %c0_39] : memref<3x384x128xbf16, #tpu.memory_space<vmem>>, vector<1x384x128xbf16>
    %84 = vector.shape_cast %83 : vector<1x384x128xbf16> to vector<384x128xbf16>
    %cst_40 = arith.constant dense<0.000000e+00> : vector<128x128xf32>
    %85 = tpu.matmul %82, %84, %cst_40 {dimension_numbers = #tpu.dot_dimension_numbers<[1], [0], [0], [1], [0, 0, 1, 1], [], []>} : vector<128x384xbf16>, vector<384x128xbf16>, vector<128x128xf32> -> vector<128x128xf32>
    %86 = arith.addf %77, %85 : vector<128x128xf32>
    %87 = vector.shape_cast %86 : vector<128x128xf32> to vector<8x16x128xf32>
    %c0_41 = arith.constant 0 : index
    %c0_42 = arith.constant 0 : index
    %c0_43 = arith.constant 0 : index
    %c0_44 = arith.constant 0 : index
    %88 = vector.load %arg9[%c0_41, %c0_42, %c0_43, %c0_44] : memref<1x8x16x128xf32, #tpu.memory_space<vmem>>, vector<1x8x16x128xf32>
    %89 = vector.shape_cast %88 : vector<1x8x16x128xf32> to vector<8x16x128xf32>
    %90 = vector.shape_cast %87 : vector<8x16x128xf32> to vector<1x8x16x128xf32>
    tpu.vector_store %arg9[%c0_41, %c0_42, %c0_43, %c0_44], %90 {strides = array<i32>} : memref<1x8x16x128xf32, #tpu.memory_space<vmem>>, vector<1x8x16x128xf32>,
    %91 = tpu.iota {dimensions = array<i32: 0>} : vector<16x128xi32>
    %c2_i32 = arith.constant 2 : i32
    %c0_i32 = arith.constant 0 : i32
    %92 = arith.cmpi eq, %c2_i32, %c0_i32 : i32
    %c1_i32 = arith.constant 1 : i32
    %93 = arith.select %92, %c1_i32, %c2_i32 : i32
    %94 = vector.broadcast %93 : i32 to vector<16x128xi32>
    %95 = arith.remsi %91, %94 : vector<16x128xi32>
    %c0_i32_45 = arith.constant 0 : i32
    %96 = vector.broadcast %c0_i32_45 : i32 to vector<16x128xi32>
    %97 = arith.cmpi ne, %95, %96 : vector<16x128xi32>
    %c0_i32_46 = arith.constant 0 : i32
    %98 = vector.broadcast %c0_i32_46 : i32 to vector<16x128xi32>
    %99 = arith.cmpi slt, %95, %98 : vector<16x128xi32>
    %c0_i32_47 = arith.constant 0 : i32
    %100 = arith.cmpi slt, %93, %c0_i32_47 : i32
    %101 = vector.broadcast %100 : i1 to vector<16x128xi1>
    %102 = vector.broadcast %101 : vector<16x128xi1> to vector<16x128xi1>
    %103 = arith.xori %99, %102 : vector<16x128xi1>
    %104 = arith.andi %103, %97 : vector<16x128xi1>
    %105 = vector.broadcast %93 : i32 to vector<16x128xi32>
    %106 = arith.addi %95, %105 : vector<16x128xi32>
    %107 = arith.select %104, %106, %95 : vector<16x128xi1>, vector<16x128xi32>
    %c0_i32_48 = arith.constant 0 : i32
    %108 = vector.broadcast %c0_i32_48 : i32 to vector<16x128xi32>
    %109 = arith.cmpi eq, %107, %108 : vector<16x128xi32>
    %c16_i32 = arith.constant 16 : i32
    %110 = vector.broadcast %c16_i32 : i32 to vector<16x128xi32>
    %111 = arith.cmpi slt, %91, %110 : vector<16x128xi32>
    %112 = arith.andi %109, %111 : vector<16x128xi1>
    %cst_49 = arith.constant 0.000000e+00 : f32
    %113 = vector.shape_cast %112 : vector<16x128xi1> to vector<1x16x128xi1>
    %114 = vector.broadcast %113 : vector<1x16x128xi1> to vector<8x16x128xi1>
    %115 = vector.broadcast %cst_49 : f32 to vector<8x16x128xf32>
    %116 = arith.select %114, %87, %115 : vector<8x16x128xi1>, vector<8x16x128xf32>
    %117 = vector.shape_cast %116 : vector<8x16x128xf32> to vector<128x128xf32>
    %cst_50 = arith.constant dense<0.000000e+00> : vector<128xf32>
    %118 = vector.multi_reduction <add>, %117, %cst_50 [0] : vector<128x128xf32> to vector<128xf32>
    %119 = vector.shape_cast %118 : vector<128xf32> to vector<1x128xf32>
    %120 = arith.mulf %117, %117 : vector<128x128xf32>
    %cst_51 = arith.constant dense<0.000000e+00> : vector<128xf32>
    %121 = vector.multi_reduction <add>, %120, %cst_51 [0] : vector<128x128xf32> to vector<128xf32>
    %122 = vector.shape_cast %121 : vector<128xf32> to vector<1x128xf32>
    %123 = tpu.concatenate %119, %122 in 0 : vector<1x128xf32>, vector<1x128xf32> -> vector<2x128xf32>
    %c0_52 = arith.constant 0 : index
    %c0_53 = arith.constant 0 : index
    %c0_54 = arith.constant 0 : index
    %124 = vector.load %arg10[%c0_52, %c0_53, %c0_54] : memref<1x2x128xf32, #tpu.memory_space<vmem>>, vector<1x2x128xf32>
    %125 = vector.shape_cast %124 : vector<1x2x128xf32> to vector<2x128xf32>
    %126 = vector.shape_cast %123 : vector<2x128xf32> to vector<1x2x128xf32>
    tpu.vector_store %arg10[%c0_52, %c0_53, %c0_54], %126 {strides = array<i32>} : memref<1x2x128xf32, #tpu.memory_space<vmem>>, vector<1x2x128xf32>,
    %c0_55 = arith.constant 0 : index
    %c0_56 = arith.constant 0 : index
    %c0_57 = arith.constant 0 : index
    %c0_58 = arith.constant 0 : index
    %127 = vector.load %arg2[%c0_55, %c0_56, %c0_57, %c0_58] : memref<1x8x8x128xf32, #tpu.memory_space<vmem>>, vector<1x8x8x128xf32>
    %128 = vector.shape_cast %127 : vector<1x8x8x128xf32> to vector<8x8x128xf32>
    %129 = arith.truncf %128 : vector<8x8x128xf32> to vector<8x8x128xbf16>
    %130 = vector.shape_cast %129 : vector<8x8x128xbf16> to vector<64x128xbf16>
    %c0_59 = arith.constant 0 : index
    %c0_60 = arith.constant 0 : index
    %131 = vector.load %arg8[%c0_59, %c0_60] : memref<128x128xbf16, #tpu.memory_space<vmem>>, vector<128x128xbf16>
    %cst_61 = arith.constant dense<0.000000e+00> : vector<64x128xf32>
    %132 = tpu.matmul %130, %131, %cst_61 {dimension_numbers = #tpu.dot_dimension_numbers<[1], [0], [0], [1], [0, 0, 1, 1], [], []>} : vector<64x128xbf16>, vector<128x128xbf16>, vector<64x128xf32> -> vector<64x128xf32>
    %133 = vector.shape_cast %132 : vector<64x128xf32> to vector<8x8x128xf32>
    %c0_62 = arith.constant 0 : index
    %c0_63 = arith.constant 0 : index
    %c0_64 = arith.constant 0 : index
    %c0_65 = arith.constant 0 : index
    %134 = vector.load %arg11[%c0_62, %c0_63, %c0_64, %c0_65] : memref<1x8x8x128xf32, #tpu.memory_space<vmem>>, vector<1x8x8x128xf32>
    %135 = vector.shape_cast %134 : vector<1x8x8x128xf32> to vector<8x8x128xf32>
    %136 = vector.shape_cast %133 : vector<8x8x128xf32> to vector<1x8x8x128xf32>
    tpu.vector_store %arg11[%c0_62, %c0_63, %c0_64, %c0_65], %136 {strides = array<i32>} : memref<1x8x8x128xf32, #tpu.memory_space<vmem>>, vector<1x8x8x128xf32>,
    %cst_66 = arith.constant dense<0.000000e+00> : vector<128xf32>
    %137 = vector.multi_reduction <add>, %132, %cst_66 [0] : vector<64x128xf32> to vector<128xf32>
    %138 = vector.shape_cast %137 : vector<128xf32> to vector<1x128xf32>
    %139 = arith.mulf %132, %132 : vector<64x128xf32>
    %cst_67 = arith.constant dense<0.000000e+00> : vector<128xf32>
    %140 = vector.multi_reduction <add>, %139, %cst_67 [0] : vector<64x128xf32> to vector<128xf32>
    %141 = vector.shape_cast %140 : vector<128xf32> to vector<1x128xf32>
    %142 = tpu.concatenate %138, %141 in 0 : vector<1x128xf32>, vector<1x128xf32> -> vector<2x128xf32>
    %c0_68 = arith.constant 0 : index
    %c0_69 = arith.constant 0 : index
    %c0_70 = arith.constant 0 : index
    %143 = vector.load %arg12[%c0_68, %c0_69, %c0_70] : memref<1x2x128xf32, #tpu.memory_space<vmem>>, vector<1x2x128xf32>
    %144 = vector.shape_cast %143 : vector<1x2x128xf32> to vector<2x128xf32>
    %145 = vector.shape_cast %142 : vector<2x128xf32> to vector<1x2x128xf32>
    tpu.vector_store %arg12[%c0_68, %c0_69, %c0_70], %145 {strides = array<i32>} : memref<1x2x128xf32, #tpu.memory_space<vmem>>, vector<1x2x128xf32>,
    return
  }
  func.func @transform_0(%arg0: i32) -> (i32, i32, i32, i32) {
    %c0_i32 = arith.constant 0 : i32
    %c0_i32_0 = arith.constant 0 : i32
    %c0_i32_1 = arith.constant 0 : i32
    %c0_i32_2 = arith.constant 0 : i32
    return %arg0, %c0_i32, %c0_i32_0, %c0_i32_1 : i32, i32, i32, i32
  }
  func.func @transform_1(%arg0: i32) -> (i32, i32, i32, i32) {
    %c0_i32 = arith.constant 0 : i32
    %c0_i32_0 = arith.constant 0 : i32
    %c0_i32_1 = arith.constant 0 : i32
    %c0_i32_2 = arith.constant 0 : i32
    return %arg0, %c0_i32, %c0_i32_0, %c0_i32_1 : i32, i32, i32, i32
  }
  func.func @transform_2(%arg0: i32) -> (i32, i32) {
    %c0_i32 = arith.constant 0 : i32
    %c0_i32_0 = arith.constant 0 : i32
    %c0_i32_1 = arith.constant 0 : i32
    return %c0_i32, %c0_i32_0 : i32, i32
  }
  func.func @transform_3(%arg0: i32) -> (i32, i32) {
    %c0_i32 = arith.constant 0 : i32
    %c0_i32_0 = arith.constant 0 : i32
    %c0_i32_1 = arith.constant 0 : i32
    return %c0_i32, %c0_i32_0 : i32, i32
  }
  func.func @transform_4(%arg0: i32) -> (i32, i32, i32) {
    %c0_i32 = arith.constant 0 : i32
    %c0_i32_0 = arith.constant 0 : i32
    %c0_i32_1 = arith.constant 0 : i32
    %c0_i32_2 = arith.constant 0 : i32
    return %c0_i32, %c0_i32_0, %c0_i32_1 : i32, i32, i32
  }
  func.func @transform_5(%arg0: i32) -> (i32, i32) {
    %c0_i32 = arith.constant 0 : i32
    %c0_i32_0 = arith.constant 0 : i32
    %c0_i32_1 = arith.constant 0 : i32
    return %c0_i32, %c0_i32_0 : i32, i32
  }
  func.func @transform_6(%arg0: i32) -> (i32, i32, i32) {
    %c0_i32 = arith.constant 0 : i32
    %c0_i32_0 = arith.constant 0 : i32
    %c0_i32_1 = arith.constant 0 : i32
    %c0_i32_2 = arith.constant 0 : i32
    return %c0_i32, %c0_i32_0, %c0_i32_1 : i32, i32, i32
  }
  func.func @transform_7(%arg0: i32) -> (i32, i32) {
    %c0_i32 = arith.constant 0 : i32
    %c0_i32_0 = arith.constant 0 : i32
    %c0_i32_1 = arith.constant 0 : i32
    return %c0_i32, %c0_i32_0 : i32, i32
  }
  func.func @transform_8(%arg0: i32) -> (i32, i32, i32, i32) {
    %c0_i32 = arith.constant 0 : i32
    %c0_i32_0 = arith.constant 0 : i32
    %c0_i32_1 = arith.constant 0 : i32
    %c0_i32_2 = arith.constant 0 : i32
    return %arg0, %c0_i32, %c0_i32_0, %c0_i32_1 : i32, i32, i32, i32
  }
  func.func @transform_9(%arg0: i32) -> (i32, i32, i32) {
    %c0_i32 = arith.constant 0 : i32
    %c0_i32_0 = arith.constant 0 : i32
    %c0_i32_1 = arith.constant 0 : i32
    return %arg0, %c0_i32, %c0_i32_0 : i32, i32, i32
  }
  func.func @transform_10(%arg0: i32) -> (i32, i32, i32, i32) {
    %c0_i32 = arith.constant 0 : i32
    %c0_i32_0 = arith.constant 0 : i32
    %c0_i32_1 = arith.constant 0 : i32
    %c0_i32_2 = arith.constant 0 : i32
    return %arg0, %c0_i32, %c0_i32_0, %c0_i32_1 : i32, i32, i32, i32
  }
  func.func @transform_11(%arg0: i32) -> (i32, i32, i32) {
    %c0_i32 = arith.constant 0 : i32
    %c0_i32_0 = arith.constant 0 : i32
    %c0_i32_1 = arith.constant 0 : i32
    return %arg0, %c0_i32, %c0_i32_0 : i32, i32, i32
  }
}

module attributes {stable_mosaic.version = 11 : i64} {
  func.func @_finalize_kernel_scbn(%arg0: i32, %arg1: memref<1x8x8x128xf32, #tpu.memory_space<vmem>>, %arg2: memref<1x8x8x128xf32, #tpu.memory_space<vmem>>, %arg3: memref<1x128xf32, #tpu.memory_space<vmem>>, %arg4: memref<1x128xf32, #tpu.memory_space<vmem>>, %arg5: memref<1x128xf32, #tpu.memory_space<vmem>>, %arg6: memref<1x128xf32, #tpu.memory_space<vmem>>, %arg7: memref<1x8x8x128xf32, #tpu.memory_space<vmem>>) attributes {dimension_semantics = [#tpu.dimension_semantics<parallel>], iteration_bounds = array<i64: 2>, scalar_prefetch = 0 : i64, scratch_operands = 0 : i64, tpu.core_type = #tpu.core_type<tc>, window_params = [{transform_indices = @transform_0, window_bounds = array<i64: 1, 8, 8, 128>}, {transform_indices = @transform_1, window_bounds = array<i64: 1, 8, 8, 128>}, {pipeline_mode = #tpu.pipeline_mode<synchronous>, transform_indices = @transform_2, window_bounds = array<i64: 1, 128>}, {pipeline_mode = #tpu.pipeline_mode<synchronous>, transform_indices = @transform_3, window_bounds = array<i64: 1, 128>}, {pipeline_mode = #tpu.pipeline_mode<synchronous>, transform_indices = @transform_4, window_bounds = array<i64: 1, 128>}, {pipeline_mode = #tpu.pipeline_mode<synchronous>, transform_indices = @transform_5, window_bounds = array<i64: 1, 128>}, {transform_indices = @transform_6, window_bounds = array<i64: 1, 8, 8, 128>}]} {
    %c0 = arith.constant 0 : index
    %c0_0 = arith.constant 0 : index
    %c0_1 = arith.constant 0 : index
    %c0_2 = arith.constant 0 : index
    %0 = vector.load %arg1[%c0, %c0_0, %c0_1, %c0_2] : memref<1x8x8x128xf32, #tpu.memory_space<vmem>>, vector<1x8x8x128xf32>
    %1 = vector.shape_cast %0 : vector<1x8x8x128xf32> to vector<8x8x128xf32>
    %c0_3 = arith.constant 0 : index
    %c0_4 = arith.constant 0 : index
    %2 = vector.load %arg3[%c0_3, %c0_4] : memref<1x128xf32, #tpu.memory_space<vmem>>, vector<1x128xf32>
    %3 = vector.shape_cast %2 : vector<1x128xf32> to vector<1x1x128xf32>
    %4 = vector.broadcast %3 : vector<1x1x128xf32> to vector<8x8x128xf32>
    %5 = arith.mulf %1, %4 : vector<8x8x128xf32>
    %c0_5 = arith.constant 0 : index
    %c0_6 = arith.constant 0 : index
    %6 = vector.load %arg4[%c0_5, %c0_6] : memref<1x128xf32, #tpu.memory_space<vmem>>, vector<1x128xf32>
    %7 = vector.shape_cast %6 : vector<1x128xf32> to vector<1x1x128xf32>
    %8 = vector.broadcast %7 : vector<1x1x128xf32> to vector<8x8x128xf32>
    %9 = arith.addf %5, %8 : vector<8x8x128xf32>
    %c0_7 = arith.constant 0 : index
    %c0_8 = arith.constant 0 : index
    %c0_9 = arith.constant 0 : index
    %c0_10 = arith.constant 0 : index
    %10 = vector.load %arg2[%c0_7, %c0_8, %c0_9, %c0_10] : memref<1x8x8x128xf32, #tpu.memory_space<vmem>>, vector<1x8x8x128xf32>
    %11 = vector.shape_cast %10 : vector<1x8x8x128xf32> to vector<8x8x128xf32>
    %c0_11 = arith.constant 0 : index
    %c0_12 = arith.constant 0 : index
    %12 = vector.load %arg5[%c0_11, %c0_12] : memref<1x128xf32, #tpu.memory_space<vmem>>, vector<1x128xf32>
    %13 = vector.shape_cast %12 : vector<1x128xf32> to vector<1x1x128xf32>
    %14 = vector.broadcast %13 : vector<1x1x128xf32> to vector<8x8x128xf32>
    %15 = arith.mulf %11, %14 : vector<8x8x128xf32>
    %c0_13 = arith.constant 0 : index
    %c0_14 = arith.constant 0 : index
    %16 = vector.load %arg6[%c0_13, %c0_14] : memref<1x128xf32, #tpu.memory_space<vmem>>, vector<1x128xf32>
    %17 = vector.shape_cast %16 : vector<1x128xf32> to vector<1x1x128xf32>
    %18 = vector.broadcast %17 : vector<1x1x128xf32> to vector<8x8x128xf32>
    %19 = arith.addf %15, %18 : vector<8x8x128xf32>
    %20 = arith.addf %9, %19 : vector<8x8x128xf32>
    %c0_15 = arith.constant 0 : index
    %c0_16 = arith.constant 0 : index
    %c0_17 = arith.constant 0 : index
    %c0_18 = arith.constant 0 : index
    %21 = vector.load %arg7[%c0_15, %c0_16, %c0_17, %c0_18] : memref<1x8x8x128xf32, #tpu.memory_space<vmem>>, vector<1x8x8x128xf32>
    %22 = vector.shape_cast %21 : vector<1x8x8x128xf32> to vector<8x8x128xf32>
    %23 = vector.shape_cast %20 : vector<8x8x128xf32> to vector<1x8x8x128xf32>
    tpu.vector_store %arg7[%c0_15, %c0_16, %c0_17, %c0_18], %23 {strides = array<i32>} : memref<1x8x8x128xf32, #tpu.memory_space<vmem>>, vector<1x8x8x128xf32>,
    return
  }
  func.func @transform_0(%arg0: i32) -> (i32, i32, i32, i32) {
    %c0_i32 = arith.constant 0 : i32
    %c0_i32_0 = arith.constant 0 : i32
    %c0_i32_1 = arith.constant 0 : i32
    %c0_i32_2 = arith.constant 0 : i32
    return %arg0, %c0_i32, %c0_i32_0, %c0_i32_1 : i32, i32, i32, i32
  }
  func.func @transform_1(%arg0: i32) -> (i32, i32, i32, i32) {
    %c0_i32 = arith.constant 0 : i32
    %c0_i32_0 = arith.constant 0 : i32
    %c0_i32_1 = arith.constant 0 : i32
    %c0_i32_2 = arith.constant 0 : i32
    return %arg0, %c0_i32, %c0_i32_0, %c0_i32_1 : i32, i32, i32, i32
  }
  func.func @transform_2(%arg0: i32) -> (i32, i32) {
    %c0_i32 = arith.constant 0 : i32
    %c0_i32_0 = arith.constant 0 : i32
    %c0_i32_1 = arith.constant 0 : i32
    return %c0_i32, %c0_i32_0 : i32, i32
  }
  func.func @transform_3(%arg0: i32) -> (i32, i32) {
    %c0_i32 = arith.constant 0 : i32
    %c0_i32_0 = arith.constant 0 : i32
    %c0_i32_1 = arith.constant 0 : i32
    return %c0_i32, %c0_i32_0 : i32, i32
  }
  func.func @transform_4(%arg0: i32) -> (i32, i32) {
    %c0_i32 = arith.constant 0 : i32
    %c0_i32_0 = arith.constant 0 : i32
    %c0_i32_1 = arith.constant 0 : i32
    return %c0_i32, %c0_i32_0 : i32, i32
  }
  func.func @transform_5(%arg0: i32) -> (i32, i32) {
    %c0_i32 = arith.constant 0 : i32
    %c0_i32_0 = arith.constant 0 : i32
    %c0_i32_1 = arith.constant 0 : i32
    return %c0_i32, %c0_i32_0 : i32, i32
  }
  func.func @transform_6(%arg0: i32) -> (i32, i32, i32, i32) {
    %c0_i32 = arith.constant 0 : i32
    %c0_i32_0 = arith.constant 0 : i32
    %c0_i32_1 = arith.constant 0 : i32
    %c0_i32_2 = arith.constant 0 : i32
    return %arg0, %c0_i32, %c0_i32_0, %c0_i32_1 : i32, i32, i32, i32
  }
}

</mosaic_0001>

<bundles_post_ra>
// kernel: _bottleneck_ir_forward.3
= control target key start
LH: loop header
LB: loop body
LE: loop exit
PB: predicated region body
PF: predicated region fallthrough
CT: control target
= control target key end

     0   :  { %s316_s6 = smov 0   ;;  %s373_s0 = inlined_call_operand.vmem [shape: f32[2,16,16,128], index: 0, kind: input, shape index: {}]   ;;  %s374_s1 = inlined_call_operand.vmem [shape: f32[2,128], index: 1, kind: output, shape index: {}]  }
   0x1 LB: > { %s278_s7 = sadd.s32 4294967295, %s303_s6   ;;  %p281_p0 = scmp.ge.s32.totalorder %s303_s6, 1  ;;  %s303_s6 = sphi %s316_s6, %s11_s6  }
   0x2   : > { %p82_p1 = scmp.lt.s32.totalorder %s303_s6, 3 }
   0x4   : > { %p83_p2 = pnand %p281_p0, %p82_p1 }
   0x5   : > { %p97_p3 = scmp.lt.s32.totalorder (!%p83_p2), %s278_s7, 1  ;;  %p284_p4 = scmp.ne.s32.totalorder (!%p83_p2), %s278_s7, 0 }
   0x6   : > { %86 = sbr.rel (%p83_p2) target bundleno = 102 (0x66), region = 24 }
   0xd   : > { %s98_s8 = scalar_select %p97_p3, %s278_s7, 1 }
   0xe   : > { %105 = sbr.rel (%p284_p4) target bundleno = 21 (0x15), region = 28  ;;  %v305_v0 = vmov (!%p284_p4), 0.0  }
   0xf   : > { %s287_s9 = sshll.u32 %s98_s8, 8  ;;  %106 = vst [vmem:[%s374_s1] sm:$0x3] (!%p284_p4), %v305_v0 }
  0x10   : > { %s327_s12 = scalar_lea.vmem %s373_s0, %s287_s9 }
  0x15 PF: > { %v107_v1 = vld [vmem:[%s327_s12] sm:$0xff]  ;;  %v108_v2 = vld [vmem:[%s327_s12 + $0x8] sm:$0xff]  ;;  %v109_v3 = vld [vmem:[%s327_s12 + $0x10] sm:$0xff]  ;;  %vm246_vm0 = vcmask 1040384  }
  0x16   : > { %v110_v4 = vld [vmem:[%s327_s12 + $0x18] sm:$0xff]  ;;  %v139_v5 = vadd.f32 %v108_v2, %v107_v1  ;;  %v176_v6 = vmul.f32 %v107_v1, %v107_v1  ;;  %v177_v7 = vmul.f32 %v108_v2, %v108_v2  ;;  %v178_v8 = vmul.f32 %v109_v3, %v109_v3  ;;  %v111_v9 = vld [vmem:[%s327_s12 + $0x20] sm:$0xff]  ;;  %v112_v13 = vld [vmem:[%s327_s12 + $0x28] sm:$0xff] }
  0x17   : > { %v179_v11 = vmul.f32 %v110_v4, %v110_v4  ;;  %v180_v15 = vmul.f32 %v111_v9, %v111_v9  ;;  %v113_v17 = vld [vmem:[%s327_s12 + $0x30] sm:$0xff]  ;;  %v181_v19 = vmul.f32 %v112_v13, %v112_v13  ;;  %v114_v21 = vld [vmem:[%s327_s12 + $0x38] sm:$0xff]  ;;  %v115_v25 = vld [vmem:[%s327_s12 + $0x40] sm:$0xff] }
  0x18   : > { %v140_v10 = vadd.f32 %v139_v5, %v109_v3  ;;  %v208_v12 = vadd.f32 %v177_v7, %v176_v6  ;;  %v182_v23 = vmul.f32 %v113_v17, %v113_v17  ;;  %v183_v27 = vmul.f32 %v114_v21, %v114_v21  ;;  %v116_v29 = vld [vmem:[%s327_s12 + $0x48] sm:$0xff]  ;;  %v117_v33 = vld [vmem:[%s327_s12 + $0x50] sm:$0xff]  ;;  %v118_v37 = vld [vmem:[%s327_s12 + $0x58] sm:$0xff] }
  0x19   : > { %v184_v31 = vmul.f32 %v115_v25, %v115_v25  ;;  %v185_v35 = vmul.f32 %v116_v29, %v116_v29  ;;  %v186_v39 = vmul.f32 %v117_v33, %v117_v33  ;;  %v119_v41 = vld [vmem:[%s327_s12 + $0x60] sm:$0xff]  ;;  %v187_v43 = vmul.f32 %v118_v37, %v118_v37  ;;  %v120_v45 = vld [vmem:[%s327_s12 + $0x68] sm:$0xff]  ;;  %v121_v49 = vld [vmem:[%s327_s12 + $0x70] sm:$0xff] }
  0x1a   : > { %v141_v14 = vadd.f32 %v140_v10, %v110_v4  ;;  %v209_v16 = vadd.f32 %v208_v12, %v178_v8  ;;  %v188_v47 = vmul.f32 %v119_v41, %v119_v41  ;;  %v189_v51 = vmul.f32 %v120_v45, %v120_v45  ;;  %v122_v53 = vld [vmem:[%s327_s12 + $0x78] sm:$0xff]  ;;  %v123_v57 = vld [vmem:[%s327_s12 + $0x80] sm:$0xff]  ;;  %v124_v61 = vld [vmem:[%s327_s12 + $0x88] sm:$0xff] }
  0x1b   : > { %v190_v55 = vmul.f32 %v121_v49, %v121_v49  ;;  %v191_v59 = vmul.f32 %v122_v53, %v122_v53  ;;  %v192_v63 = vmul.f32 %v123_v57, %v123_v57  ;;  %v125_v1 = vld [vmem:[%s327_s12 + $0x90] sm:$0xff]  ;;  %v193_v3 = vmul.f32 %v124_v61, %v124_v61  ;;  %v126_v5 = vld [vmem:[%s327_s12 + $0x98] sm:$0xff] }
  0x1c   : > { %v142_v18 = vadd.f32 %v141_v14, %v111_v9  ;;  %v210_v20 = vadd.f32 %v209_v16, %v179_v11  ;;  %v194_v7 = vmul.f32 %v125_v1, %v125_v1  ;;  %v127_v9 = vld [vmem:[%s327_s12 + $0xa0] sm:$0xff]  ;;  %v195_v11 = vmul.f32 %v126_v5, %v126_v5 }
  0x1e   : > { %v143_v22 = vadd.f32 %v142_v18, %v112_v13  ;;  %v211_v24 = vadd.f32 %v210_v20, %v180_v15  ;;  %v128_v13 = vld [vmem:[%s327_s12 + $0xa8] sm:$0xff]  ;;  %v196_v15 = vmul.f32 %v127_v9, %v127_v9 }
  0x20   : > { %v144_v26 = vadd.f32 %v143_v22, %v113_v17  ;;  %v212_v28 = vadd.f32 %v211_v24, %v181_v19  ;;  %v129_v17 = vld [vmem:[%s327_s12 + $0xb0] sm:$0xff]  ;;  %v197_v19 = vmul.f32 %v128_v13, %v128_v13 }
  0x22   : > { %v145_v30 = vadd.f32 %v144_v26, %v114_v21  ;;  %v213_v32 = vadd.f32 %v212_v28, %v182_v23  ;;  %v130_v21 = vld [vmem:[%s327_s12 + $0xb8] sm:$0xff]  ;;  %v198_v23 = vmul.f32 %v129_v17, %v129_v17 }
  0x24   : > { %v146_v34 = vadd.f32 %v145_v30, %v115_v25  ;;  %v214_v36 = vadd.f32 %v213_v32, %v183_v27  ;;  %v131_v25 = vld [vmem:[%s327_s12 + $0xc0] sm:$0xff]  ;;  %v199_v27 = vmul.f32 %v130_v21, %v130_v21 }
  0x26   : > { %v147_v38 = vadd.f32 %v146_v34, %v116_v29  ;;  %v215_v40 = vadd.f32 %v214_v36, %v184_v31  ;;  %v132_v29 = vld [vmem:[%s327_s12 + $0xc8] sm:$0xff]  ;;  %v200_v31 = vmul.f32 %v131_v25, %v131_v25 }
  0x28   : > { %v148_v42 = vadd.f32 %v147_v38, %v117_v33  ;;  %v216_v44 = vadd.f32 %v215_v40, %v185_v35  ;;  %v133_v33 = vld [vmem:[%s327_s12 + $0xd0] sm:$0xff]  ;;  %v201_v35 = vmul.f32 %v132_v29, %v132_v29 }
  0x2a   : > { %v149_v46 = vadd.f32 %v148_v42, %v118_v37  ;;  %v217_v48 = vadd.f32 %v216_v44, %v186_v39  ;;  %v134_v37 = vld [vmem:[%s327_s12 + $0xd8] sm:$0xff]  ;;  %v202_v39 = vmul.f32 %v133_v33, %v133_v33 }
  0x2c   : > { %v150_v50 = vadd.f32 %v149_v46, %v119_v41  ;;  %v218_v52 = vadd.f32 %v217_v48, %v187_v43  ;;  %v135_v41 = vld [vmem:[%s327_s12 + $0xe0] sm:$0xff]  ;;  %v203_v43 = vmul.f32 %v134_v37, %v134_v37 }
  0x2e   : > { %v151_v54 = vadd.f32 %v150_v50, %v120_v45  ;;  %v219_v56 = vadd.f32 %v218_v52, %v188_v47  ;;  %v136_v45 = vld [vmem:[%s327_s12 + $0xe8] sm:$0xff]  ;;  %v204_v47 = vmul.f32 %v135_v41, %v135_v41 }
  0x30   : > { %v152_v58 = vadd.f32 %v151_v54, %v121_v49  ;;  %v220_v60 = vadd.f32 %v219_v56, %v189_v51  ;;  %v137_v49 = vld [vmem:[%s327_s12 + $0xf0] sm:$0xff]  ;;  %v205_v51 = vmul.f32 %v136_v45, %v136_v45 }
  0x32   : > { %v153_v62 = vadd.f32 %v152_v58, %v122_v53  ;;  %v221_v0 = vadd.f32 %v220_v60, %v190_v55  ;;  %v138_v53 = vld [vmem:[%s327_s12 + $0xf8] sm:$0xff]  ;;  %v206_v55 = vmul.f32 %v137_v49, %v137_v49 }
  0x33   : > { %v207_v58 = vmul.f32 %v138_v53, %v138_v53 }
  0x34   : > { %v154_v2 = vadd.f32 %v153_v62, %v123_v57  ;;  %v222_v4 = vadd.f32 %v221_v0, %v191_v59 }
  0x36   : > { %v155_v6 = vadd.f32 %v154_v2, %v124_v61  ;;  %v223_v8 = vadd.f32 %v222_v4, %v192_v63 }
  0x38   : > { %v156_v10 = vadd.f32 %v155_v6, %v125_v1  ;;  %v224_v12 = vadd.f32 %v223_v8, %v193_v3 }
  0x3a   : > { %v157_v14 = vadd.f32 %v156_v10, %v126_v5  ;;  %v225_v16 = vadd.f32 %v224_v12, %v194_v7 }
  0x3c   : > { %v158_v18 = vadd.f32 %v157_v14, %v127_v9  ;;  %v226_v20 = vadd.f32 %v225_v16, %v195_v11  ;;  %v245_v11 = vld [vmem:[%s374_s1] sm:$0x3] }
  0x3e   : > { %v159_v22 = vadd.f32 %v158_v18, %v128_v13  ;;  %v227_v24 = vadd.f32 %v226_v20, %v196_v15 }
  0x40   : > { %v160_v26 = vadd.f32 %v159_v22, %v129_v17  ;;  %v228_v28 = vadd.f32 %v227_v24, %v197_v19 }
  0x42   : > { %v161_v30 = vadd.f32 %v160_v26, %v130_v21  ;;  %v229_v32 = vadd.f32 %v228_v28, %v198_v23 }
  0x44   : > { %v162_v34 = vadd.f32 %v161_v30, %v131_v25  ;;  %v230_v36 = vadd.f32 %v229_v32, %v199_v27 }
  0x46   : > { %v163_v38 = vadd.f32 %v162_v34, %v132_v29  ;;  %v231_v40 = vadd.f32 %v230_v36, %v200_v31 }
  0x48   : > { %v164_v42 = vadd.f32 %v163_v38, %v133_v33  ;;  %v232_v44 = vadd.f32 %v231_v40, %v201_v35 }
  0x4a   : > { %v165_v46 = vadd.f32 %v164_v42, %v134_v37  ;;  %v233_v48 = vadd.f32 %v232_v44, %v202_v39 }
  0x4c   : > { %v166_v50 = vadd.f32 %v165_v46, %v135_v41  ;;  %v234_v52 = vadd.f32 %v233_v48, %v203_v43 }
  0x4e   : > { %v167_v54 = vadd.f32 %v166_v50, %v136_v45  ;;  %v235_v56 = vadd.f32 %v234_v52, %v204_v47 }
  0x50   : > { %v168_v57 = vadd.f32 %v167_v54, %v137_v49  ;;  %v236_v59 = vadd.f32 %v235_v56, %v205_v51 }
  0x52   : > { %v169_v60 = vadd.f32 %v168_v57, %v138_v53  ;;  %v237_v61 = vadd.f32 %v236_v59, %v206_v55 }
  0x54   : > { %v170_v62 = vrot.slane %v169_v60, 4  ;;  %v238_v63 = vadd.f32 %v237_v61, %v207_v58 }
  0x56   : > { %v171_v0 = vadd.f32 %v170_v62, %v169_v60  ;;  %v239_v1 = vrot.slane %v238_v63, 4 }
  0x58   : > { %v172_v2 = vrot.slane %v171_v0, 2  ;;  %v240_v3 = vadd.f32 %v239_v1, %v238_v63 }
  0x5a   : > { %v173_v4 = vadd.f32 %v172_v2, %v171_v0  ;;  %v241_v5 = vrot.slane %v240_v3, 2 }
  0x5c   : > { %v174_v6 = vrot.slane %v173_v4, 1  ;;  %v242_v7 = vadd.f32 %v241_v5, %v240_v3 }
  0x5e   : > { %v175_v8 = vadd.f32 %v174_v6, %v173_v4  ;;  %v243_v9 = vrot.slane %v242_v7, 1 }
  0x60   : > { %v244_v10 = vadd.f32 %v243_v9, %v242_v7 }
  0x62   : > { %v247_v12 = vsel %vm246_vm0, %v175_v8, %v244_v10 }
  0x63   : > { %v248_v13 = vadd.f32 %v247_v12, %v245_v11 }
  0x65   : > { %249 = vst [vmem:[%s374_s1] sm:$0x3] %v248_v13 }
  0x66 PF: > { %s11_s6 = sadd.s32 1, %s303_s6  }
  0x67   : > { %p8_p5 = scmp.ge.s32.totalorder %s11_s6, 4  }
  0x69   :  { %10 = sbr.rel (!%p8_p5) target bundleno = 1 (0x1), region = 54 }

// kernel: _bottleneck_ir_forward.5
= control target key start
LH: loop header
LB: loop body
LE: loop exit
PB: predicated region body
PF: predicated region fallthrough
CT: control target
= control target key end

     0   :  { %s502_s21 = smov 0   ;;  %s564_s0 = inlined_call_operand.vmem [shape: f32[2,8,8,128], index: 0, kind: input, shape index: {}]   ;;  %s565_s1 = inlined_call_operand.vmem [shape: f32[2,8,8,128], index: 1, kind: input, shape index: {}]   ;;  %s566_s2 = inlined_call_operand.vmem [shape: f32[1,128], index: 2, kind: input, shape index: {}]   ;;  %s567_s3 = inlined_call_operand.vmem [shape: f32[1,128], index: 3, kind: input, shape index: {}]   ;;  %s568_s4 = inlined_call_operand.vmem [shape: f32[1,128], index: 4, kind: input, shape index: {}]   ;;  %s569_s5 = inlined_call_operand.vmem [shape: f32[1,128], index: 5, kind: input, shape index: {}]   ;;  %s570_s6 = inlined_call_operand.vmem [shape: f32[2,8,8,128], index: 6, kind: output, shape index: {}]  }
   0x1 LB: > { %s431_s22 = sadd.s32 4294967295, %s465_s21   ;;  %p435_p0 = scmp.ge.s32.totalorder %s465_s21, 1  ;;  %s465_s21 = sphi %s502_s21, %s16_s21  }
   0x2   : > { %p222_p1 = scmp.lt.s32.totalorder %s465_s21, 3 }
   0x4   : > { %p223_p2 = pnand %p435_p0, %p222_p1 }
   0x5   : > { %p257_p3 = scmp.lt.s32.totalorder (!%p223_p2), %s431_s22, 1  ;;  %v442_v0 = vld [vmem:[%s566_s2] ss:$0 sm:$0xff] (!%p223_p2) }
   0x6   : > { %226 = sbr.rel (%p223_p2) target bundleno = 33 (0x21), region = 44  ;;  %v444_v1 = vld [vmem:[%s568_s4] ss:$0 sm:$0xff] (!%p223_p2) }
   0x7   : > { %v443_v2 = vld [vmem:[%s567_s3] ss:$0 sm:$0xff] (!%p223_p2) }
   0x8   : > { %v445_v3 = vld [vmem:[%s569_s5] ss:$0 sm:$0xff] (!%p223_p2) }
   0xd   : > { %s572_s22 = smov (!%p257_p3, %s431_s22), 1 }
   0xe   : > { %s448_s23 = sshll.u32 %s572_s22, 6 }
   0xf   : > { %s519_s30 = scalar_lea.vmem %s564_s0, %s448_s23  ;;  %s524_s9 = scalar_lea.vmem %s565_s1, %s448_s23 }
  0x10   : > { %v272_v4 = vld [vmem:[%s519_s30] sm:$0xff]  ;;  %v273_v6 = vld [vmem:[%s519_s30 + $0x8] sm:$0xff]  ;;  %v274_v11 = vld [vmem:[%s519_s30 + $0x10] sm:$0xff]  ;;  %s546_s16 = scalar_lea.vmem %s570_s6, %s448_s23 }
  0x11   : > { %v310_v5 = vld [vmem:[%s524_s9] sm:$0xff]  ;;  %v287_v7 = vmul.f32 %v442_v0, %v272_v4  ;;  %v288_v9 = vmul.f32 %v442_v0, %v273_v6  ;;  %v311_v10 = vld [vmem:[%s524_s9 + $0x8] sm:$0xff]  ;;  %v312_v12 = vld [vmem:[%s524_s9 + $0x10] sm:$0xff]  ;;  %v289_v14 = vmul.f32 %v442_v0, %v274_v11 }
  0x12   : > { %v325_v8 = vmul.f32 %v444_v1, %v310_v5  ;;  %v326_v13 = vmul.f32 %v444_v1, %v311_v10  ;;  %v327_v15 = vmul.f32 %v444_v1, %v312_v12  ;;  %v275_v16 = vld [vmem:[%s519_s30 + $0x18] sm:$0xff]  ;;  %v276_v18 = vld [vmem:[%s519_s30 + $0x20] sm:$0xff]  ;;  %v277_v24 = vld [vmem:[%s519_s30 + $0x28] sm:$0xff] }
  0x13   : > { %v313_v17 = vld [vmem:[%s524_s9 + $0x18] sm:$0xff]  ;;  %v302_v19 = vadd.f32 %v443_v2, %v287_v7  ;;  %v303_v21 = vadd.f32 %v443_v2, %v288_v9  ;;  %v290_v22 = vmul.f32 %v442_v0, %v275_v16  ;;  %v314_v23 = vld [vmem:[%s524_s9 + $0x20] sm:$0xff]  ;;  %v304_v26 = vadd.f32 %v443_v2, %v289_v14  ;;  %v315_v29 = vld [vmem:[%s524_s9 + $0x28] sm:$0xff] }
  0x14   : > { %v340_v20 = vadd.f32 %v445_v3, %v325_v8  ;;  %v341_v25 = vadd.f32 %v445_v3, %v326_v13  ;;  %v342_v27 = vadd.f32 %v445_v3, %v327_v15  ;;  %v328_v28 = vmul.f32 %v444_v1, %v313_v17  ;;  %v278_v30 = vld [vmem:[%s519_s30 + $0x30] sm:$0xff]  ;;  %v279_v36 = vld [vmem:[%s519_s30 + $0x38] sm:$0xff] }
  0x15   : > { %v305_v32 = vadd.f32 %v443_v2, %v290_v22  ;;  %v291_v33 = vmul.f32 %v442_v0, %v276_v18  ;;  %v329_v34 = vmul.f32 %v444_v1, %v314_v23  ;;  %v316_v35 = vld [vmem:[%s524_s9 + $0x30] sm:$0xff]  ;;  %v292_v40 = vmul.f32 %v442_v0, %v277_v24  ;;  %v317_v41 = vld [vmem:[%s524_s9 + $0x38] sm:$0xff] }
  0x16   : > { %v348_v31 = vadd.f32 %v340_v20, %v302_v19  ;;  %v349_v37 = vadd.f32 %v341_v25, %v303_v21  ;;  %v350_v38 = vadd.f32 %v342_v27, %v304_v26  ;;  %v343_v39 = vadd.f32 %v445_v3, %v328_v28 }
  0x17   : > { %v306_v42 = vadd.f32 %v443_v2, %v291_v33  ;;  %v344_v43 = vadd.f32 %v445_v3, %v329_v34  ;;  %v330_v44 = vmul.f32 %v444_v1, %v315_v29  ;;  %v293_v45 = vmul.f32 %v442_v0, %v278_v30 }
  0x18   : > { %356 = vst [vmem:[%s546_s16] sm:$0xff] %v348_v31  ;;  %357 = vst [vmem:[%s546_s16 + $0x8] sm:$0xff] %v349_v37  ;;  %v351_v46 = vadd.f32 %v343_v39, %v305_v32  ;;  %v307_v47 = vadd.f32 %v443_v2, %v292_v40  ;;  %v331_v48 = vmul.f32 %v444_v1, %v316_v35 }
  0x19   : > { %358 = vst [vmem:[%s546_s16 + $0x10] sm:$0xff] %v350_v38  ;;  %v294_v49 = vmul.f32 %v442_v0, %v279_v36  ;;  %v352_v50 = vadd.f32 %v344_v43, %v306_v42  ;;  %v345_v51 = vadd.f32 %v445_v3, %v330_v44  ;;  %v308_v52 = vadd.f32 %v443_v2, %v293_v45 }
  0x1a   : > { %v332_v53 = vmul.f32 %v444_v1, %v317_v41  ;;  %359 = vst [vmem:[%s546_s16 + $0x18] sm:$0xff] %v351_v46  ;;  %v346_v54 = vadd.f32 %v445_v3, %v331_v48 }
  0x1b   : > { %v309_v55 = vadd.f32 %v443_v2, %v294_v49  ;;  %360 = vst [vmem:[%s546_s16 + $0x20] sm:$0xff] %v352_v50  ;;  %v353_v56 = vadd.f32 %v345_v51, %v307_v47 }
  0x1c   : > { %v347_v57 = vadd.f32 %v445_v3, %v332_v53  ;;  %v354_v58 = vadd.f32 %v346_v54, %v308_v52 }
  0x1d   : > { %361 = vst [vmem:[%s546_s16 + $0x28] sm:$0xff] %v353_v56 }
  0x1e   : > { %v355_v59 = vadd.f32 %v347_v57, %v309_v55  ;;  %362 = vst [vmem:[%s546_s16 + $0x30] sm:$0xff] %v354_v58 }
  0x20   : > { %363 = vst [vmem:[%s546_s16 + $0x38] sm:$0xff] %v355_v59 }
  0x21 PF: > { %s16_s21 = sadd.s32 1, %s465_s21  }
  0x22   : > { %p13_p4 = scmp.ge.s32.totalorder %s16_s21, 4  }
  0x24   :  { %15 = sbr.rel (!%p13_p4) target bundleno = 1 (0x1), region = 77 }

// kernel: _bottleneck_ir_forward.4
= control target key start
LH: loop header
LB: loop body
LE: loop exit
PB: predicated region body
PF: predicated region fallthrough
CT: control target
= control target key end

     0   :  { %s6708_s17 = smov 0   ;;  %s8550_s0 = inlined_call_operand.vmem [shape: f32[2,16,16,128], index: 0, kind: input, shape index: {}]   ;;  %s8551_s1 = inlined_call_operand.vmem [shape: f32[2,8,8,128], index: 1, kind: input, shape index: {}]   ;;  %s8552_s2 = inlined_call_operand.vmem [shape: f32[1,128], index: 2, kind: input, shape index: {}]   ;;  %s8553_s3 = inlined_call_operand.vmem [shape: f32[1,128], index: 3, kind: input, shape index: {}]   ;;  %s8554_s4 = inlined_call_operand.vmem [shape: bf16[3,384,128], index: 4, kind: input, shape index: {}]   ;;  %s8555_s5 = inlined_call_operand.vmem [shape: f32[1,128], index: 5, kind: input, shape index: {}]   ;;  %s8556_s6 = inlined_call_operand.vmem [shape: bf16[3,384,128], index: 6, kind: input, shape index: {}]   ;;  %s8557_s7 = inlined_call_operand.vmem [shape: bf16[128,128], index: 7, kind: input, shape index: {}]   ;;  %s8558_s8 = inlined_call_operand.vmem [shape: f32[2,8,16,128], index: 8, kind: output, shape index: {0}]   ;;  %s8559_s9 = inlined_call_operand.vmem [shape: f32[2,2,128], index: 9, kind: output, shape index: {1}]   ;;  %s8560_s10 = inlined_call_operand.vmem [shape: f32[2,8,8,128], index: 10, kind: output, shape index: {2}]   ;;  %s8561_s11 = inlined_call_operand.vmem [shape: f32[2,2,128], index: 11, kind: output, shape index: {3}]  }
   0x1 LB: > { %s4921_s18 = sadd.s32 4294967295, %s6645_s17   ;;  %p4925_p0 = scmp.ge.s32.totalorder %s6645_s17, 1  ;;  %s6645_s17 = sphi %s6708_s17, %s22_s17  }
   0x2   : > { %p354_p1 = scmp.lt.s32.totalorder %s6645_s17, 3 }
   0x4   : > { %p355_p2 = pnand %p4925_p0, %p354_p1 }
   0x6   : > { %358 = sbr.rel (%p355_p2) target bundleno = 1058 (0x422), region = 52 }
   0xd   : > { %v6486_v0 = vld [vmem:[%s8554_s4 + $0x100] sm:$0xff]   ;;  %v6488_v2 = vld [vmem:[%s8554_s4 + $0x108] sm:$0xff]   ;;  %p412_p3 = scmp.lt.s32.totalorder %s4921_s18, 1  ;;  %v6490_v4 = vld [vmem:[%s8554_s4 + $0x110] sm:$0xff]   ;;  %vm711_vm0 = vcmask 1040384   ;;  %v8578_v48 = vmov 0 }
   0xe   : > { %v6487_v1 = vld [vmem:[%s8554_s4 + $0xc0] sm:$0xff]   ;;  %6221 = vmatprep.subr.bf16.mxu1 %v6486_v0  ;;  %5297 = vmatprep.subr.bf16.mxu0 %v6486_v0  ;;  %v6489_v3 = vld [vmem:[%s8554_s4 + $0xc8] sm:$0xff]   ;;  %v6491_v5 = vld [vmem:[%s8554_s4 + $0xd0] sm:$0xff]   ;;  %vm712_vm1 = vsmask.f32 256  ;;  %vm997_vm4 = vcmask 1046528  }
   0xf   : > { %6229 = vmatpush3.bf16.msra.mxu1 %v6487_v1  ;;  %5298 = vmatpush3.bf16.msra.mxu0 %v6487_v1  ;;  %s8600_s18 = smov (!%p412_p3, %s4921_s18), 1  ;;  %v6492_v6 = vld [vmem:[%s8554_s4 + $0x118] sm:$0xff]   ;;  %v6494_v8 = vld [vmem:[%s8554_s4 + $0x120] sm:$0xff]   ;;  %v6496_v10 = vld [vmem:[%s8554_s4 + $0x128] sm:$0xff]   ;;  %vm746_vm2 = vsmask.f32 7424 }
  0x10   : > { %6222 = vmatprep.subr.bf16.mxu1 %v6488_v2  ;;  %5299 = vmatprep.subr.bf16.mxu0 %v6488_v2  ;;  %s5289_s14 = sshll.u32 %s8600_s18, 8  ;;  %v6493_v7 = vld [vmem:[%s8554_s4 + $0xd8] sm:$0xff]   ;;  %v6495_v9 = vld [vmem:[%s8554_s4 + $0xe0] sm:$0xff]   ;;  %v6497_v17 = vld [vmem:[%s8554_s4 + $0xe8] sm:$0xff]   ;;  %s5290_s24 = sshll.u32 %s8600_s18, 6 }
  0x11   : > { %s6749_s23 = scalar_lea.vmem %s8550_s0, %s5289_s14  ;;  %v6762_v13 = vld [vmem:[%s8552_s2] ss:$0 sm:$0xff]  ;;  %v6498_v18 = vld [vmem:[%s8554_s4 + $0x130] sm:$0xff]   ;;  %v6500_v37 = vld [vmem:[%s8554_s4 + $0x138] sm:$0xff]   ;;  %s421_s29 = scalar_lea.vmem %s8551_s1, %s5290_s24 }
  0x12   : > { %v463_v11 = vld [vmem:[%s6749_s23 + $0xb0] sm:$0xff]  ;;  %v464_v12 = vld [vmem:[%s6749_s23 + $0xb8] sm:$0xff]  ;;  %v6769_v16 = vld [vmem:[%s8553_s3] ss:$0 sm:$0xff]  ;;  %s435_s26 = scalar_lea.vmem %s8560_s10, %s5290_s24  ;;  %s4932_s24 = sshll.u32 %s8600_s18, 1 }
  0x13   : > { %6230 = vmatpush3.bf16.msra.mxu1 %v6489_v3  ;;  %5300 = vmatpush3.bf16.msra.mxu0 %v6489_v3  ;;  %v502_v14 = vmul.f32 %v6762_v13, %v463_v11  ;;  %v503_v15 = vmul.f32 %v6762_v13, %v464_v12  ;;  %v465_v21 = vld [vmem:[%s6749_s23 + $0xc0] sm:$0xff]  ;;  %v466_v22 = vld [vmem:[%s6749_s23 + $0xc8] sm:$0xff]  ;;  %v6499_v24 = vld [vmem:[%s8554_s4 + $0xf0] sm:$0xff]   ;;  %s5291_s30 = sshll.u32 %s8600_s18, 7  ;;  %s430_s19 = scalar_lea.vmem %s8559_s9, %s4932_s24 }
  0x14   : > { %6223 = vmatprep.subr.bf16.mxu1 %v6490_v4  ;;  %5301 = vmatprep.subr.bf16.mxu0 %v6490_v4  ;;  %v504_v23 = vmul.f32 %v6762_v13, %v465_v21  ;;  %v505_v26 = vmul.f32 %v6762_v13, %v466_v22  ;;  %v467_v27 = vld [vmem:[%s6749_s23 + $0xd0] sm:$0xff]  ;;  %v468_v28 = vld [vmem:[%s6749_s23 + $0xd8] sm:$0xff]  ;;  %v441_v35 = vld [vmem:[%s6749_s23] sm:$0xff]  ;;  %s8468_s14 = scalar_lea.vmem %s8558_s8, %s5291_s30 }
  0x15   : > { %v541_v19 = vadd.f32 %v6769_v16, %v502_v14  ;;  %v542_v20 = vadd.f32 %v6769_v16, %v503_v15  ;;  %v506_v30 = vmul.f32 %v6762_v13, %v467_v27  ;;  %v507_v31 = vmul.f32 %v6762_v13, %v468_v28  ;;  %v442_v36 = vld [vmem:[%s6749_s23 + $0x8] sm:$0xff]  ;;  %v469_v41 = vld [vmem:[%s6749_s23 + $0xe0] sm:$0xff]  ;;  %v443_v47 = vld [vmem:[%s6749_s23 + $0x10] sm:$0xff] }
  0x16   : > { %v543_v29 = vadd.f32 %v6769_v16, %v504_v23  ;;  %v544_v34 = vadd.f32 %v6769_v16, %v505_v26  ;;  %v480_v40 = vmul.f32 %v6762_v13, %v441_v35  ;;  %v481_v44 = vmul.f32 %v6762_v13, %v442_v36  ;;  %v470_v45 = vld [vmem:[%s6749_s23 + $0xe8] sm:$0xff]  ;;  %vm6807_vm3 = vmand %vm711_vm0, %vm712_vm1  ;;  %v6501_v53 = vld [vmem:[%s8554_s4 + $0xf8] sm:$0xff]  }
  0x17   : > { %6231 = vmatpush3.bf16.msra.mxu1 %v6491_v5  ;;  %5302 = vmatpush3.bf16.msra.mxu0 %v6491_v5  ;;  %v562_v25 = vpack.c.bf16 %v542_v20, %v541_v19  ;;  %v545_v38 = vadd.f32 %v6769_v16, %v506_v30  ;;  %v546_v39 = vadd.f32 %v6769_v16, %v507_v31  ;;  %v8579_v48 = vsel %vm6807_vm3, 4294967295, %v8578_v48  ;;  %v6502_v59 = vld [vmem:[%s8554_s4 + $0x140] sm:$0xff]   ;;  %v6503_v31 = vld [vmem:[%s8554_s4 + $0x148] sm:$0xff]  }
  0x18   : > { %6224 = vmatprep.subr.bf16.mxu1 %v6492_v6  ;;  %5303 = vmatprep.subr.bf16.mxu0 %v6492_v6  ;;  %v563_v43 = vpack.c.bf16 %v544_v34, %v543_v29  ;;  %v508_v46 = vmul.f32 %v6762_v13, %v469_v41  ;;  %8580 = vst [vmem:[#allocation2_spill] sm:$0xff] %v8579_v48 }
  0x19   : > { %v645_v32 = vshrl.u32 %v562_v25, 16  ;;  %v648_v33 = vshll.u32 %v562_v25, 16  ;;  %v564_v49 = vpack.c.bf16 %v546_v39, %v545_v38  ;;  %v519_v50 = vadd.f32 %v6769_v16, %v480_v40  ;;  %v444_v25 = vld [vmem:[%s6749_s23 + $0x18] sm:$0xff]  ;;  %v6504_v40 = vld [vmem:[%s8554_s4 + $0x150] sm:$0xff]  }
  0x1a   : > { %v509_v51 = vmul.f32 %v6762_v13, %v470_v45  ;;  %v6814_v52 = vmul.f32 %v6762_v13, %v443_v47  ;;  %v652_v56 = vshrl.u32 %v563_v43, 16  ;;  %v655_v57 = vshll.u32 %v563_v43, 16 }
  0x1b   : > { %6232 = vmatpush3.bf16.msra.mxu1 %v6493_v7  ;;  %5304 = vmatpush3.bf16.msra.mxu0 %v6493_v7  ;;  %v647_v42 = vrot.slane %v645_v32, 7  ;;  %v659_v60 = vshrl.u32 %v564_v49, 16  ;;  %v662_v61 = vshll.u32 %v564_v49, 16  ;;  %v520_v62 = vadd.f32 %v6769_v16, %v481_v44  ;;  %v471_v49 = vld [vmem:[%s6749_s23 + $0xf0] sm:$0xff] }
  0x1c   : > { %6225 = vmatprep.subr.bf16.mxu1 %v6494_v8  ;;  %5305 = vmatprep.subr.bf16.mxu0 %v6494_v8  ;;  %v654_v0 = vrot.slane %v652_v56, 7  ;;  %v547_v1 = vadd.f32 %v6769_v16, %v508_v46  ;;  %v548_v2 = vadd.f32 %v6769_v16, %v509_v51  ;;  %v483_v43 = vmul.f32 %v6762_v13, %v444_v25  ;;  %v6506_v25 = vld [vmem:[%s8554_s4 + $0x160] sm:$0xff]  }
  0x1d   : > { %v650_v54 = vor.u32 %v648_v33, %v647_v42  ;;  %v6821_v55 = vsel %vm6807_vm3, %v647_v42, 0  ;;  %v661_v6 = vrot.slane %v659_v60, 7  ;;  %v521_v47 = vadd.f32 %v6769_v16, %v6814_v52  ;;  %v446_v60 = vld [vmem:[%s6749_s23 + $0x28] sm:$0xff] }
  0x1e   : > { %v895_v58 = vshll.u32 %v6821_v55, 16  ;;  %v657_v7 = vor.u32 %v655_v57, %v654_v0  ;;  %v6838_v8 = vsel %vm6807_vm3, %v654_v0, 0  ;;  %v522_v52 = vadd.f32 %v6769_v16, %v483_v43 }
  0x1f   : > { %6233 = vmatpush3.bf16.msra.mxu1 %v6495_v9  ;;  %5306 = vmatpush3.bf16.msra.mxu0 %v6495_v9  ;;  %v6830_v63 = vsel %vm6807_vm3, 0, %v650_v54  ;;  %v551_v9 = vpack.c.bf16 %v520_v62, %v519_v50  ;;  %v907_v12 = vshll.u32 %v6838_v8, 16  ;;  %v664_v14 = vor.u32 %v662_v61, %v661_v6  ;;  %v472_v50 = vld [vmem:[%s6749_s23 + $0xf8] sm:$0xff] }
  0x20   : > { %6226 = vmatprep.subr.bf16.mxu1 %v6496_v10  ;;  %5307 = vmatprep.subr.bf16.mxu0 %v6496_v10  ;;  %v888_v3 = vshrl.u32 %v6830_v63, 16  ;;  %v890_v4 = vshll.u32 %v6830_v63, 16  ;;  %v897_v5 = vrot.slane %v895_v58, 1  ;;  %v565_v10 = vpack.c.bf16 %v548_v2, %v547_v1 }
  0x21   : > { %v6843_v15 = vsel %vm6807_vm3, %v661_v6, 0  ;;  %v568_v19 = vshrl.u32 %v551_v9, 16  ;;  %v571_v20 = vshll.u32 %v551_v9, 16  ;;  %v6855_v26 = vsel %vm6807_vm3, 0, %v664_v14  ;;  %v6505_v6 = vld [vmem:[%s8554_s4 + $0x158] sm:$0xff]  }
  0x22   : > { %v892_v11 = vrot.slane %v890_v4, 1  ;;  %v666_v29 = vshrl.u32 %v565_v10, 16  ;;  %v912_v33 = vshrl.u32 %v6855_v26, 16  ;;  %v914_v34 = vshll.u32 %v6855_v26, 16 }
  0x23   : > { %6234 = vmatpush3.bf16.msra.mxu1 %v6497_v17  ;;  %5308 = vmatpush3.bf16.msra.mxu0 %v6497_v17  ;;  %v6847_v17 = vsel %vm6807_vm3, 0, %v657_v7  ;;  %v570_v28 = vrot.slane %v568_v19, 7  ;;  %v669_v38 = vshll.u32 %v565_v10, 16  ;;  %v510_v4 = vmul.f32 %v6762_v13, %v471_v49 }
  0x24   : > { %6227 = vmatprep.subr.bf16.mxu1 %v6498_v18  ;;  %5309 = vmatprep.subr.bf16.mxu0 %v6498_v18  ;;  %v919_v18 = vshll.u32 %v6843_v15, 16  ;;  %v893_v21 = vor.u32 %v892_v11, %v888_v3  ;;  %v900_v22 = vshrl.u32 %v6847_v17, 16  ;;  %v902_v23 = vshll.u32 %v6847_v17, 16 }
  0x25   : > { %v573_v35 = vor.u32 %v571_v20, %v570_v28  ;;  %v6868_v36 = vsel %vm6807_vm3, %v570_v28, 0  ;;  %v916_v41 = vrot.slane %v914_v34, 1  ;;  %v552_v3 = vpack.c.bf16 %v522_v52, %v521_v47  ;;  %v447_v20 = vld [vmem:[%s6749_s23 + $0x30] sm:$0xff] }
  0x26   : > { %v921_v27 = vrot.slane %v919_v18, 1  ;;  %v6858_v30 = vsel %vm746_vm2, %v893_v21, %v897_v5  ;;  %v904_v32 = vrot.slane %v902_v23, 1  ;;  %v763_v42 = vshll.u32 %v6868_v36, 16 }
  0x27   : > { %6235 = vmatpush3.bf16.msra.mxu1 %v6499_v24  ;;  %5310 = vmatpush3.bf16.msra.mxu0 %v6499_v24  ;;  %v909_v24 = vrot.slane %v907_v12, 1  ;;  %v6878_v44 = vsel %vm6807_vm3, 0, %v573_v35  ;;  %v511_v5 = vmul.f32 %v6762_v13, %v472_v50  ;;  %v485_v11 = vmul.f32 %v6762_v13, %v446_v60 }
  0x28   : > { %6228 = vmatprep.subr.bf16.mxu1 %v6500_v37  ;;  %5311 = vmatprep.subr.bf16.mxu0 %v6500_v37  ;;  %v668_v37 = vrot.slane %v666_v29, 7  ;;  %v905_v39 = vor.u32 %v904_v32, %v900_v22  ;;  %v756_v54 = vshrl.u32 %v6878_v44, 16  ;;  %v758_v56 = vshll.u32 %v6878_v44, 16  ;;  %v448_v32 = vld [vmem:[%s6749_s23 + $0x38] sm:$0xff] }
  0x29   : > { %1426 = vmatprep.mubr.bf16.mxu1 %v6858_v30  ;;  %v765_v57 = vrot.slane %v763_v42, 1  ;;  %v575_v12 = vshrl.u32 %v552_v3, 16  ;;  %v578_v14 = vshll.u32 %v552_v3, 16  ;;  %v549_v18 = vadd.f32 %v6769_v16, %v510_v4  ;;  %v6508_v4 = vld [vmem:[%s8554_s4 + $0x170] sm:$0xff]  }
  0x2a   : > { %v671_v45 = vor.u32 %v669_v38, %v668_v37  ;;  %v6882_v46 = vsel %vm6807_vm3, %v668_v37, 0  ;;  %v6889_v51 = vsel %vm746_vm2, %v905_v39, %v909_v24  ;;  %v760_v62 = vrot.slane %v758_v56, 1  ;;  %v6521_v56 = vld [vmem:[%s8554_s4 + $0x180] sm:$0xff]  }
  0x2b   : > { %6236 = vmatpush3.bf16.msra.mxu1 %v6501_v53  ;;  %5312 = vmatpush3.bf16.msra.mxu0 %v6501_v53  ;;  %v917_v53 = vor.u32 %v916_v41, %v912_v33  ;;  %v931_v1 = vshll.u32 %v6882_v46, 16  ;;  %v550_v19 = vadd.f32 %v6769_v16, %v511_v5  ;;  %v524_v24 = vadd.f32 %v6769_v16, %v485_v11  ;;  %v6507_v41 = vld [vmem:[%s8554_s4 + $0x168] sm:$0xff]  }
  0x2c   : > { %5957 = vmatprep.subr.bf16.mxu1 %v6502_v59  ;;  %v6896_v58 = vsel %vm6807_vm3, 0, %v671_v45  ;;  %v761_v7 = vor.u32 %v760_v62, %v756_v54  ;;  %v577_v28 = vrot.slane %v575_v12, 7  ;;  %v486_v34 = vmul.f32 %v6762_v13, %v447_v20  ;;  %v6520_v54 = vld [vmem:[%s8554_s4 + $0x1c0] sm:$0xff]   ;;  %v451_v20 = vld [vmem:[%s6749_s23 + $0x50] sm:$0xff] }
  0x2d   : > { %v6902_v61 = vsel %vm746_vm2, %v917_v53, %v921_v27  ;;  %v926_v0 = vshll.u32 %v6896_v58, 16  ;;  %v924_v2 = vshrl.u32 %v6896_v58, 16  ;;  %v933_v22 = vrot.slane %v931_v1, 1  ;;  %5569 = vmatprep.subr.bf16.mxu0 %v6520_v54 }
  0x2e   : > { %1427 = vmatmul.mubr.bf16.vlgmr.msra.gmra.mrb[0].mxu1 %v6830_v63  ;;  %v6919_v21 = vsel %vm746_vm2, %v761_v7, %v765_v57  ;;  %v566_v29 = vpack.c.bf16 %v550_v19, %v549_v18  ;;  %v580_v35 = vor.u32 %v578_v14, %v577_v28  ;;  %v6934_v37 = vsel %vm6807_vm3, %v577_v28, 0  ;;  %v450_v19 = vld [vmem:[%s6749_s23 + $0x48] sm:$0xff] }
  0x2f   : > { %5958 = vmatpush3.bf16.msra.mxu1 %v6502_v59  ;;  %1434 = vmatprep.mubr.bf16.mxu1 %v6889_v51  ;;  %v445_v59 = vld [vmem:[%s6749_s23 + $0x20] sm:$0xff]  ;;  %v928_v9 = vrot.slane %v926_v0, 1  ;;  %v1001_v45 = vrot.slane %v6868_v36, 1  ;;  %v487_v53 = vmul.f32 %v6762_v13, %v448_v32 }
  0x30   : > { %5959 = vmatprep.subr.bf16.mxu1 %v6503_v31  ;;  %v484_v10 = vmul.f32 %v6762_v13, %v445_v59  ;;  %1338 = vmatprep.mubr.bf16.mxu0 %v6919_v21  ;;  %v673_v38 = vshrl.u32 %v566_v29, 16  ;;  %v676_v39 = vshll.u32 %v566_v29, 16  ;;  %v6946_v49 = vsel %vm6807_vm3, 0, %v580_v35 }
  0x31   : > { %v929_v27 = vor.u32 %v928_v9, %v924_v2  ;;  %1339 = vmatmul.mubr.bf16.vlgmr.msra.gmra.mrb[0].mxu0 %v6878_v44  ;;  %v768_v57 = vshrl.u32 %v6946_v49, 16  ;;  %v770_v52 = vshll.u32 %v6946_v49, 16  ;;  %v1004_v59 = vrot.slane %v6934_v37, 1  ;;  %v449_v9 = vld [vmem:[%s6749_s23 + $0x40] sm:$0xff] }
  0x32   : > { %v523_v23 = vadd.f32 %v6769_v16, %v484_v10  ;;  %v675_v50 = vrot.slane %v673_v38, 7  ;;  %v525_v2 = vadd.f32 %v6769_v16, %v486_v34  ;;  %5570 = vmatpush3.bf16.msra.mxu0 %v6521_v56  ;;  %v6522_v10 = vld [vmem:[%s8554_s4 + $0x1c8] sm:$0xff]   ;;  %v1003_v14 = vrot.slane %v6946_v49, 1  ;;  %v452_v34 = vld [vmem:[%s6749_s23 + $0x58] sm:$0xff] }
  0x33   : > { %5960 = vmatpush3.bf16.msra.mxu1 %v6503_v31  ;;  %v1000_v31 = vrot.slane %v6878_v44, 1  ;;  %v6942_v47 = vsel %vm746_vm2, %v929_v27, %v933_v22  ;;  %v772_v3 = vrot.slane %v770_v52, 1  ;;  %v526_v18 = vadd.f32 %v6769_v16, %v487_v53  ;;  %5571 = vmatprep.subr.bf16.mxu0 %v6522_v10  ;;  %v6523_v27 = vld [vmem:[%s8554_s4 + $0x188] sm:$0xff]  }
  0x34   : > { %5961 = vmatprep.subr.bf16.mxu1 %v6504_v40  ;;  %v553_v33 = vpack.c.bf16 %v524_v24, %v523_v23  ;;  %v678_v0 = vor.u32 %v676_v39, %v675_v50  ;;  %v6960_v1 = vsel %vm6807_vm3, %v675_v50, 0  ;;  %v488_v56 = vmul.f32 %v6762_v13, %v449_v9  ;;  %v6528_v9 = vld [vmem:[%s8554_s4 + $0x1d8] sm:$0xff]  }
  0x35   : > { %v943_v5 = vshll.u32 %v6960_v1, 16  ;;  %v773_v22 = vor.u32 %v772_v3, %v768_v57  ;;  %v554_v32 = vpack.c.bf16 %v526_v18, %v525_v2  ;;  %v6526_v57 = vld [vmem:[%s8554_s4 + $0x1d0] sm:$0xff]   ;;  %v7080_v36 = vsel %vm997_vm4, %v1003_v14, %v1004_v59 }
  0x36   : > { %1435 = vmatmul.mubr.bf16.gmra.mrb[4].mxu1 %v6847_v17  ;;  %v582_v42 = vshrl.u32 %v553_v33, 16  ;;  %v585_v43 = vshll.u32 %v553_v33, 16  ;;  %v6979_v11 = vsel %vm6807_vm3, 0, %v678_v0  ;;  %5572 = vmatpush3.bf16.msra.mxu0 %v6523_v27  ;;  %v490_v0 = vmul.f32 %v6762_v13, %v451_v20  ;;  %v6527_v2 = vld [vmem:[%s8554_s4 + $0x190] sm:$0xff]   ;;  %v6510_v20 = vld [vmem:[%s8554_s4 + $0x40] sm:$0xff]  }
  0x37   : > { %5962 = vmatpush3.bf16.msra.mxu1 %v6504_v40  ;;  %1442 = vmatprep.mubr.bf16.mxu1 %v6902_v61  ;;  %v775_v40 = vshll.u32 %v6934_v37, 16  ;;  %v936_v23 = vshrl.u32 %v6979_v11, 16  ;;  %v938_v24 = vshll.u32 %v6979_v11, 16  ;;  %v589_v50 = vshrl.u32 %v554_v32, 16  ;;  %v6534_v37 = vld [vmem:[%s8554_s4 + $0x1e8] sm:$0xff]  }
  0x38   : > { %5963 = vmatprep.subr.bf16.mxu1 %v6505_v6  ;;  %v584_v60 = vrot.slane %v582_v42, 7  ;;  %v6509_v42 = vld [vmem:[%s8554_s4 + $0x178] sm:$0xff]   ;;  %v592_v53 = vshll.u32 %v554_v32, 16  ;;  %5573 = vmatprep.subr.bf16.mxu0 %v6526_v57  ;;  %v455_v57 = vld [vmem:[%s6749_s23 + $0x70] sm:$0xff] }
  0x39   : > { %v777_v62 = vrot.slane %v775_v40, 1  ;;  %v940_v38 = vrot.slane %v938_v24, 1  ;;  %v591_v3 = vrot.slane %v589_v50, 7 }
  0x3a   : > { %v6970_v7 = vsel %vm6807_vm3, %v584_v60, 0  ;;  %5574 = vmatpush3.bf16.msra.mxu0 %v6527_v2 }
  0x3b   : > { %5964 = vmatpush3.bf16.msra.mxu1 %v6505_v6  ;;  %v587_v6 = vor.u32 %v585_v43, %v584_v60  ;;  %v787_v12 = vshll.u32 %v6970_v7, 16  ;;  %v1007_v33 = vrot.slane %v6970_v7, 1  ;;  %v6998_v35 = vsel %vm746_vm2, %v773_v22, %v777_v62  ;;  %v453_v43 = vld [vmem:[%s6749_s23 + $0x60] sm:$0xff]  ;;  %5575 = vmatprep.subr.bf16.mxu0 %v6528_v9 }
  0x3c   : > { %5965 = vmatprep.subr.bf16.mxu1 %v6506_v25  ;;  %1346 = vmatprep.mubr.bf16.mxu0 %v6998_v35  ;;  %v941_v52 = vor.u32 %v940_v38, %v936_v23  ;;  %v489_v62 = vmul.f32 %v6762_v13, %v450_v19  ;;  %v529_v19 = vadd.f32 %v6769_v16, %v490_v0  ;;  %v7036_v23 = vsel %vm6807_vm3, %v591_v3, 0 }
  0x3d   : > { %v6993_v28 = vsel %vm6807_vm3, 0, %v587_v6  ;;  %v789_v29 = vrot.slane %v787_v12, 1  ;;  %1347 = vmatmul.mubr.bf16.gmra.mrb[4].mxu0 %v6946_v49  ;;  %v491_v6 = vmul.f32 %v6762_v13, %v452_v34  ;;  %v594_v22 = vor.u32 %v592_v53, %v591_v3  ;;  %v6529_v34 = vld [vmem:[%s8554_s4 + $0x198] sm:$0xff]  }
  0x3e   : > { %1443 = vmatmul.mubr.bf16.gmra.mrb[8].mxu1 %v6855_v26  ;;  %v780_v39 = vshrl.u32 %v6993_v28, 16  ;;  %v782_v40 = vshll.u32 %v6993_v28, 16  ;;  %v1006_v54 = vrot.slane %v6993_v28, 1  ;;  %v528_v18 = vadd.f32 %v6769_v16, %v489_v62  ;;  %v456_v3 = vld [vmem:[%s6749_s23 + $0x78] sm:$0xff]  ;;  %5576 = vmatpush3.bf16.msra.mxu0 %v6529_v34 }
  0x3f   : > { %5966 = vmatpush3.bf16.msra.mxu1 %v6506_v25  ;;  %1450 = vmatprep.mubr.bf16.mxu1 %v6942_v47  ;;  %v945_v25 = vrot.slane %v943_v5, 1  ;;  %v527_v5 = vadd.f32 %v6769_v16, %v488_v56  ;;  %v530_v24 = vadd.f32 %v6769_v16, %v491_v6  ;;  %v7050_v38 = vsel %vm6807_vm3, 0, %v594_v22 }
  0x40   : > { %5967 = vmatprep.subr.bf16.mxu1 %v6507_v41  ;;  %v784_v60 = vrot.slane %v782_v40, 1  ;;  %v794_v50 = vshll.u32 %v7050_v38, 16  ;;  %v495_v34 = vmul.f32 %v6762_v13, %v456_v3 }
  0x41   : > { %v7026_v10 = vsel %vm746_vm2, %v941_v52, %v945_v25  ;;  %v492_v25 = vmul.f32 %v6762_v13, %v453_v43  ;;  %v555_v32 = vpack.c.bf16 %v528_v18, %v527_v5  ;;  %v792_v43 = vshrl.u32 %v7050_v38, 16  ;;  %v6532_v52 = vld [vmem:[%s8554_s4 + $0x1e0] sm:$0xff]  }
  0x42   : > { %v785_v12 = vor.u32 %v784_v60, %v780_v39  ;;  %v556_v39 = vpack.c.bf16 %v530_v24, %v529_v19  ;;  %v7069_v5 = vsel %vm997_vm4, %v1000_v31, %v1001_v45  ;;  %v796_v6 = vrot.slane %v794_v50, 1  ;;  %5577 = vmatprep.subr.bf16.mxu0 %v6532_v52  ;;  %v6512_v52 = vld [vmem:[%s8554_s4 + $0x48] sm:$0xff]  }
  0x43   : > { %5968 = vmatpush3.bf16.msra.mxu1 %v6507_v41  ;;  %v454_v41 = vld [vmem:[%s6749_s23 + $0x68] sm:$0xff]  ;;  %v531_v56 = vadd.f32 %v6769_v16, %v492_v25  ;;  %v596_v60 = vshrl.u32 %v555_v32, 16  ;;  %v599_v62 = vshll.u32 %v555_v32, 16  ;;  %v1009_v45 = vrot.slane %v7050_v38, 1 }
  0x44   : > { %5969 = vmatprep.subr.bf16.mxu1 %v6508_v4  ;;  %v7041_v27 = vsel %vm746_vm2, %v785_v12, %v789_v29  ;;  %v1010_v29 = vrot.slane %v7036_v23, 1  ;;  %v493_v40 = vmul.f32 %v6762_v13, %v454_v41  ;;  %v603_v0 = vshrl.u32 %v556_v39, 16  ;;  %v457_v41 = vld [vmem:[%s6749_s23 + $0x80] sm:$0xff]  ;;  %v458_v25 = vld [vmem:[%s6749_s23 + $0x88] sm:$0xff] }
  0x45   : > { %1354 = vmatprep.mubr.bf16.mxu0 %v7041_v27  ;;  %v606_v2 = vshll.u32 %v556_v39, 16  ;;  %v598_v12 = vrot.slane %v596_v60, 7  ;;  %v797_v31 = vor.u32 %v796_v6, %v792_v43  ;;  %v496_v39 = vmul.f32 %v6762_v13, %v457_v41 }
  0x46   : > { %1451 = vmatmul.mubr.bf16.gmra.mrb[12].mxu1 %v6896_v58  ;;  %1355 = vmatmul.mubr.bf16.gmra.mrb[8].mxu0 %v6993_v28  ;;  %v532_v9 = vadd.f32 %v6769_v16, %v493_v40  ;;  %v605_v18 = vrot.slane %v603_v0, 7  ;;  %v6535_v40 = vld [vmem:[%s8554_s4 + $0x1a8] sm:$0xff]  }
  0x47   : > { %1458 = vmatprep.mubr.bf16.mxu1 %v7026_v10  ;;  %5970 = vmatpush3.bf16.msra.mxu1 %v6508_v4  ;;  %v799_v4 = vshll.u32 %v7036_v23, 16  ;;  %v601_v22 = vor.u32 %v599_v62, %v598_v12  ;;  %v7091_v59 = vsel %vm6807_vm3, %v598_v12, 0  ;;  %v7136_v12 = vsel %vm997_vm4, %v1006_v54, %v1007_v33  ;;  %v6539_v33 = vld [vmem:[%s8554_s4 + $0x1b0] sm:$0xff]  }
  0x48   : > { %5971 = vmatprep.subr.bf16.mxu1 %v6509_v42  ;;  %v557_v19 = vpack.c.bf16 %v532_v9, %v531_v56  ;;  %v608_v14 = vor.u32 %v606_v2, %v605_v18  ;;  %v7095_v24 = vsel %vm6807_vm3, %v605_v18, 0  ;;  %v811_v32 = vshll.u32 %v7091_v59, 16 }
  0x49   : > { %v801_v53 = vrot.slane %v799_v4, 1  ;;  %v7110_v43 = vsel %vm6807_vm3, 0, %v601_v22  ;;  %v497_v2 = vmul.f32 %v6762_v13, %v458_v25  ;;  %v6513_v22 = vld [vmem:[%s8554_s4 + $0x8] sm:$0xff]   ;;  %v534_v25 = vadd.f32 %v6769_v16, %v495_v34 }
  0x4a   : > { %v7114_v50 = vsel %vm6807_vm3, 0, %v608_v14  ;;  %v610_v56 = vshrl.u32 %v557_v19, 16  ;;  %v804_v60 = vshrl.u32 %v7110_v43, 16  ;;  %v806_v62 = vshll.u32 %v7110_v43, 16 }
  0x4b   : > { %5972 = vmatpush3.bf16.msra.mxu1 %v6509_v42  ;;  %v6533_v42 = vld [vmem:[%s8554_s4 + $0x1a0] sm:$0xff]   ;;  %v7099_v4 = vsel %vm746_vm2, %v797_v31, %v801_v53  ;;  %v823_v53 = vshll.u32 %v7095_v24, 16  ;;  %v813_v3 = vrot.slane %v811_v32, 1  ;;  %v816_v41 = vshrl.u32 %v7114_v50, 16 }
  0x4c   : > { %5433 = vmatprep.subr.bf16.mxu1 %v6510_v20  ;;  %v494_v20 = vmul.f32 %v6762_v13, %v455_v57  ;;  %1362 = vmatprep.mubr.bf16.mxu0 %v7099_v4  ;;  %v6511_v57 = vld [vmem:[%s8554_s4] sm:$0xff]   ;;  %v818_v6 = vshll.u32 %v7114_v50, 16  ;;  %v808_v18 = vrot.slane %v806_v62, 1  ;;  %v612_v31 = vrot.slane %v610_v56, 7 }
  0x4d   : > { %5578 = vmatpush3.bf16.msra.mxu0 %v6533_v42  ;;  %v825_v9 = vrot.slane %v823_v53, 1  ;;  %v459_v42 = vld [vmem:[%s6749_s23 + $0x90] sm:$0xff]  ;;  %v535_v7 = vadd.f32 %v6769_v16, %v496_v39  ;;  %v536_v34 = vadd.f32 %v6769_v16, %v497_v2  ;;  %v6540_v39 = vld [vmem:[%s8554_s4 + $0x1f8] sm:$0xff]   ;;  %v1013_v56 = vrot.slane %v7091_v59, 1 }
  0x4e   : > { %1459 = vmatmul.mubr.bf16.gmra.mrb[16].mxu1 %v6979_v11  ;;  %v533_v0 = vadd.f32 %v6769_v16, %v494_v20  ;;  %5579 = vmatprep.subr.bf16.mxu0 %v6534_v37  ;;  %v613_v20 = vshll.u32 %v557_v19, 16  ;;  %v6538_v37 = vld [vmem:[%s8554_s4 + $0x1f0] sm:$0xff]   ;;  %v820_v14 = vrot.slane %v818_v6, 1  ;;  %v809_v54 = vor.u32 %v808_v18, %v804_v60 }
  0x4f   : > { %5973 = vmatprep.mubr.bf16.mxu1 %v7069_v5  ;;  %1363 = vmatmul.mubr.bf16.gmra.mrb[12].mxu0 %v7050_v38  ;;  %v6514_v19 = vld [vmem:[%s8554_s4 + $0x50] sm:$0xff]   ;;  %v7155_v53 = vsel %vm6807_vm3, %v612_v31, 0  ;;  %v559_v18 = vpack.c.bf16 %v536_v34, %v535_v7  ;;  %v7194_v7 = vsel %vm997_vm4, %v1009_v45, %v1010_v29  ;;  %v462_v34 = vld [vmem:[%s6749_s23 + $0xa8] sm:$0xff]  ;;  %v1016_v29 = vrot.slane %v7095_v24, 1 }
  0x50   : > { %v615_v32 = vor.u32 %v613_v20, %v612_v31  ;;  %v821_v60 = vor.u32 %v820_v14, %v816_v41  ;;  %v558_v62 = vpack.c.bf16 %v534_v25, %v533_v0  ;;  %v7165_v6 = vsel %vm746_vm2, %v809_v54, %v813_v3  ;;  %v460_v31 = vld [vmem:[%s6749_s23 + $0x98] sm:$0xff]  ;;  %v6515_v59 = vld [vmem:[%s8554_s4 + $0x10] sm:$0xff]   ;;  %8581 = vst [vmem:[#allocation3_spill] sm:$0xff] %v7194_v7 }
  0x51   : > { %5580 = vmatpush3.bf16.msra.mxu0 %v6535_v40  ;;  %v1012_v40 = vrot.slane %v7110_v43, 1  ;;  %1370 = vmatprep.mubr.bf16.mxu0 %v7165_v6  ;;  %v835_v0 = vshll.u32 %v7155_v53, 16  ;;  %v6541_v3 = vld [vmem:[%s8554_s4 + $0x1b8] sm:$0xff]   ;;  %v624_v25 = vshrl.u32 %v559_v18, 16  ;;  %v499_v54 = vmul.f32 %v6762_v13, %v460_v31 }
  0x52   : > { %5581 = vmatprep.subr.bf16.mxu0 %v6538_v37  ;;  %v7169_v2 = vsel %vm6807_vm3, 0, %v615_v32  ;;  %v617_v41 = vshrl.u32 %v558_v62, 16  ;;  %v7182_v20 = vsel %vm746_vm2, %v821_v60, %v825_v9  ;;  %v461_v32 = vld [vmem:[%s6749_s23 + $0xa0] sm:$0xff] }
  0x53   : > { %v828_v37 = vshrl.u32 %v7169_v2, 16  ;;  %v830_v14 = vshll.u32 %v7169_v2, 16  ;;  %v7201_v60 = vsel %vm997_vm4, %v1012_v40, %v1013_v56  ;;  %v626_v23 = vrot.slane %v624_v25, 7 }
  0x54   : > { %v619_v9 = vrot.slane %v617_v41, 7  ;;  %8582 = vst [vmem:[#allocation4_spill] sm:$0xff] %v7201_v60  ;;  %v837_v31 = vrot.slane %v835_v0, 1  ;;  %v500_v40 = vmul.f32 %v6762_v13, %v461_v32  ;;  %v1015_v56 = vrot.slane %v7114_v50, 1 }
  0x55   : > { %5582 = vmatpush3.bf16.msra.mxu0 %v6539_v33  ;;  %v627_v33 = vshll.u32 %v559_v18, 16  ;;  %v1018_v24 = vrot.slane %v7169_v2, 1 }
  0x56   : > { %5974 = vmatmul.mubr.bf16.vlgmr.msra.gmra.mrb[20].mxu1 %v7080_v36  ;;  %5583 = vmatprep.subr.bf16.mxu0 %v6540_v39  ;;  %v832_v39 = vrot.slane %v830_v14, 1  ;;  %v7235_v32 = vsel %vm997_vm4, %v1015_v56, %v1016_v29  ;;  %v738_v29 = vsel %vm6807_vm3, %v626_v23, 0 }
  0x57   : > { %5434 = vmatpush3.bf16.msra.mxu1 %v6511_v57  ;;  %5977 = vmatprep.mubr.bf16.mxu1 %v7136_v12  ;;  %v498_v57 = vmul.f32 %v6762_v13, %v459_v42  ;;  %v6516_v42 = vld [vmem:[%s8554_s4 + $0x58] sm:$0xff]   ;;  %v629_v0 = vor.u32 %v627_v33, %v626_v23  ;;  %8583 = vst [vmem:[#allocation5_spill] sm:$0xff] %v7235_v32  ;;  %v6525_v23 = vld [vmem:[%s8554_s4 + $0x28] sm:$0xff]  }
  0x58   : > { %5435 = vmatprep.subr.bf16.mxu1 %v6512_v52  ;;  %v620_v52 = vshll.u32 %v558_v62, 16  ;;  %1371 = vmatmul.mubr.bf16.gmra.mrb[16].mxu0 %v7110_v43  ;;  %v833_v18 = vor.u32 %v832_v39, %v828_v37 }
  0x59   : > { %v537_v62 = vadd.f32 %v6769_v16, %v498_v57  ;;  %1378 = vmatprep.mubr.bf16.mxu0 %v7182_v20  ;;  %5584 = vmatpush3.bf16.msra.mxu0 %v6541_v3  ;;  %v1019_v57 = vrot.slane %v7155_v53, 1 }
  0x5a   : > { %v622_v45 = vor.u32 %v620_v52, %v619_v9  ;;  %v7228_v25 = vsel %vm746_vm2, %v833_v18, %v837_v31  ;;  %v7246_v18 = vsel %vm6807_vm3, 0, %v629_v0 }
  0x5b   : > { %5436 = vmatpush3.bf16.msra.mxu1 %v6513_v22  ;;  %v538_v22 = vadd.f32 %v6769_v16, %v499_v54  ;;  %v6517_v16 = vld [vmem:[%s8554_s4 + $0x18] sm:$0xff]  }
  0x5c   : > { %5437 = vmatprep.subr.bf16.mxu1 %v6514_v19  ;;  %v501_v19 = vmul.f32 %v6762_v13, %v462_v34  ;;  %v7219_v52 = vsel %vm6807_vm3, 0, %v622_v45  ;;  %v737_v13 = vsel %vm6807_vm3, %v619_v9, 0  ;;  %v6638_v9 = vld [vmem:[%s8553_s3] ss:$0 sm:$0xff]  ;;  %v7238_v34 = vsel %vm997_vm4, %v1018_v24, %v1019_v57 }
  0x5d   : > { %v560_v41 = vpack.c.bf16 %v538_v22, %v537_v62  ;;  %v842_v37 = vshll.u32 %v7219_v52, 16  ;;  %v847_v14 = vshll.u32 %v737_v13, 16  ;;  %v840_v54 = vshrl.u32 %v7219_v52, 16  ;;  %8584 = vst [vmem:[#allocation6_spill] sm:$0xff] %v7238_v34  ;;  %v6519_v45 = vld [vmem:[%s8554_s4 + $0x20] sm:$0xff]  }
  0x5e   : > { %5978 = vmatmul.mubr.bf16.gmra.mrb[24].mxu1 %v7194_v7  ;;  %v540_v33 = vadd.f32 %v6638_v9, %v501_v19  ;;  %v1022_v22 = vrot.slane %v737_v13, 1  ;;  %v854_v24 = vshll.u32 %v7246_v18, 16  ;;  %v859_v13 = vshll.u32 %v738_v29, 16 }
  0x5f   : > { %5981 = vmatprep.mubr.bf16.mxu1 %v7201_v60  ;;  %5438 = vmatpush3.bf16.msra.mxu1 %v6515_v59  ;;  %v6518_v59 = vld [vmem:[%s8554_s4 + $0x60] sm:$0xff]   ;;  %v631_v3 = vshrl.u32 %v560_v41, 16  ;;  %v634_v53 = vshll.u32 %v560_v41, 16  ;;  %v844_v62 = vrot.slane %v842_v37, 1  ;;  %v849_v56 = vrot.slane %v847_v14, 1 }
  0x60   : > { %5439 = vmatprep.subr.bf16.mxu1 %v6516_v42  ;;  %v539_v42 = vadd.f32 %v6638_v9, %v500_v40  ;;  %1379 = vmatmul.mubr.bf16.gmra.mrb[20].mxu0 %v7114_v50  ;;  %v6524_v40 = vld [vmem:[%s8554_s4 + $0x68] sm:$0xff]   ;;  %v1021_v0 = vrot.slane %v7219_v52, 1  ;;  %v1033_v14 = vrot.slane %v6830_v63, 1  ;;  %v8562_v9 = vmov 0  }
  0x61   : > { %v633_v39 = vrot.slane %v631_v3, 7  ;;  %1386 = vmatprep.mubr.bf16.mxu0 %v7228_v25  ;;  %v845_v57 = vor.u32 %v844_v62, %v840_v54  ;;  %v1025_v3 = vrot.slane %v738_v29, 1  ;;  %v6530_v54 = vld [vmem:[%s8554_s4 + $0x70] sm:$0xff]   ;;  %v1034_v62 = vrot.slane %v6821_v55, 1 }
  0x62   : > { %v561_v31 = vpack.c.bf16 %v540_v33, %v539_v42  ;;  %v7269_v42 = vrot.slane %v8562_v9, 1  ;;  %v6531_v29 = vld [vmem:[%s8554_s4 + $0x30] sm:$0xff]   ;;  %v861_v9 = vrot.slane %v859_v13, 1 }
  0x63   : > { %5440 = vmatpush3.bf16.msra.mxu1 %v6517_v16  ;;  %v636_v19 = vor.u32 %v634_v53, %v633_v39  ;;  %v739_v53 = vsel %vm6807_vm3, %v633_v39, 0  ;;  %v852_v39 = vshrl.u32 %v7246_v18, 16 }
  0x64   : > { %5441 = vmatprep.subr.bf16.mxu1 %v6518_v59  ;;  %v638_v16 = vshrl.u32 %v561_v31, 16  ;;  %v641_v41 = vshll.u32 %v561_v31, 16  ;;  %v1024_v59 = vrot.slane %v7246_v18, 1  ;;  %v1028_v31 = vrot.slane %v739_v53, 1 }
  0x65   : > { %v7273_v33 = vsel %vm6807_vm3, 0, %v636_v19  ;;  %v6536_v19 = vld [vmem:[%s8554_s4 + $0x78] sm:$0xff]  }
  0x66   : > { %5982 = vmatmul.mubr.bf16.gmra.mrb[28].mxu1 %v7235_v32  ;;  %v640_v37 = vrot.slane %v638_v16, 7  ;;  %v7290_v55 = vsel %vm997_vm4, %v1024_v59, %v1025_v3  ;;  %v866_v32 = vshll.u32 %v7273_v33, 16  ;;  %v1040_v59 = vrot.slane %v6843_v15, 1  ;;  %v6537_v3 = vld [vmem:[%s8554_s4 + $0x38] sm:$0xff]  }
  0x67   : > { %5985 = vmatprep.mubr.bf16.mxu1 %v7238_v34  ;;  %5442 = vmatpush3.bf16.msra.mxu1 %v6519_v45  ;;  %v856_v45 = vrot.slane %v854_v24, 1  ;;  %v7287_v34 = vsel %vm997_vm4, %v1021_v0, %v1022_v22  ;;  %8586 = vst [vmem:[#allocation8_spill] sm:$0xff] %v7290_v55  ;;  %v1036_v22 = vrot.slane %v6847_v17, 1  ;;  %v1037_v0 = vrot.slane %v6838_v8, 1  ;;  %v6542_v8 = vld [vmem:[%s8554_s4 + $0x80] sm:$0xff]  }
  0x68   : > { %5443 = vmatprep.subr.bf16.mxu1 %v6524_v40  ;;  %v7281_v40 = vsel %vm746_vm2, %v845_v57, %v849_v56  ;;  %v643_v16 = vor.u32 %v641_v41, %v640_v37  ;;  %8585 = vst [vmem:[#allocation7_spill] sm:$0xff] %v7287_v34  ;;  %v740_v24 = vsel %vm6807_vm3, %v640_v37, 0  ;;  %1387 = vmatmul.mubr.bf16.gmra.mrb[24].mxu0 %v7169_v2  ;;  %v1027_v56 = vrot.slane %v7273_v33, 1 }
  0x69   : > { %v871_v41 = vshll.u32 %v739_v53, 16  ;;  %1394 = vmatprep.mubr.bf16.mxu0 %v7281_v40  ;;  %v857_v13 = vor.u32 %v856_v45, %v852_v39  ;;  %v1031_v37 = vrot.slane %v740_v24, 1  ;;  %v1042_v53 = vrot.slane %v6896_v58, 1 }
  0x6a   : > { %v7299_v57 = vsel %vm6807_vm3, 0, %v643_v16  ;;  %v864_v16 = vshrl.u32 %v7273_v33, 16  ;;  %v868_v39 = vrot.slane %v866_v32, 1  ;;  %v883_v60 = vshll.u32 %v740_v24, 16 }
  0x6b   : > { %5444 = vmatpush3.bf16.msra.mxu1 %v6525_v23  ;;  %v1039_v23 = vrot.slane %v6855_v26, 1  ;;  %v1030_v15 = vrot.slane %v7299_v57, 1  ;;  %v873_v45 = vrot.slane %v871_v41, 1  ;;  %v876_v48 = vshrl.u32 %v7299_v57, 16  ;;  %v6543_v41 = vld [vmem:[%s8554_s4 + $0x88] sm:$0xff]  }
  0x6c   : > { %5445 = vmatprep.subr.bf16.mxu1 %v6530_v54  ;;  %v1043_v54 = vrot.slane %v6882_v46, 1  ;;  %v7321_v7 = vsel %vm746_vm2, %v857_v13, %v861_v9  ;;  %v7324_v46 = vsel %vm997_vm4, %v1027_v56, %v1028_v31  ;;  %v869_v32 = vor.u32 %v868_v39, %v864_v16  ;;  %v6544_v13 = vld [vmem:[%s8554_s4 + $0x90] sm:$0xff]  }
  0x6d   : > { %v7337_v31 = vsel %vm997_vm4, %v1033_v14, %v1034_v62  ;;  %v7341_v24 = vsel %vm997_vm4, %v1036_v22, %v1037_v0  ;;  %v1045_v62 = vrot.slane %v6979_v11, 1  ;;  %v6545_v0 = vld [vmem:[%s8554_s4 + $0x98] sm:$0xff]  }
  0x6e   : > { %5986 = vmatmul.mubr.bf16.gmra.mrb[32].mxu1 %v7287_v34  ;;  %v878_v34 = vshll.u32 %v7299_v57, 16  ;;  %v7334_v9 = vsel %vm746_vm2, %v869_v32, %v873_v45  ;;  %v7354_v14 = vsel %vm997_vm4, %v1042_v53, %v1043_v54  ;;  %v6553_v32 = vld [vmem:[%s8554_s4 + $0x218] sm:$0xff]  }
  0x6f   : > { %5989 = vmatprep.mubr.bf16.mxu1 %v7290_v55  ;;  %5446 = vmatpush3.bf16.msra.mxu1 %v6531_v29  ;;  %v7328_v55 = vsel %vm997_vm4, %v1030_v15, %v1031_v37 }
  0x70   : > { %5447 = vmatprep.subr.bf16.mxu1 %v6536_v19  ;;  %1395 = vmatmul.mubr.bf16.gmra.mrb[28].mxu0 %v7219_v52  ;;  %v880_v29 = vrot.slane %v878_v34, 1  ;;  %v885_v19 = vrot.slane %v883_v60, 1  ;;  %v7350_v34 = vsel %vm997_vm4, %v1039_v23, %v1040_v59  ;;  %v6546_v23 = vld [vmem:[%s8554_s4 + $0xa0] sm:$0xff]   ;;  %v6552_v59 = vld [vmem:[%s8554_s4 + $0x210] sm:$0xff]  }
  0x71   : > { %1402 = vmatprep.mubr.bf16.mxu0 %v7321_v7 }
  0x72   : > { %v881_v56 = vor.u32 %v880_v29, %v876_v48  ;;  %v1046_v48 = vrot.slane %v6960_v1, 1  ;;  %v8587_v1 = vmov 0  }
  0x73   : > { %5448 = vmatpush3.bf16.msra.mxu1 %v6537_v3 }
  0x74   : > { %6005 = vmatprep.subr.bf16.mxu1 %v6542_v8  ;;  %v7347_v60 = vsel %vm746_vm2, %v881_v56, %v885_v19  ;;  %v7362_v22 = vsel %vm997_vm4, %v1045_v62, %v1046_v48  ;;  %v8588_v19 = vld [vmem:[#allocation3_spill] sm:$0xff]  ;;  %v6554_v56 = vld [vmem:[%s8554_s4 + $0x220] sm:$0xff]  }
  0x76   : > { %5990 = vmatmul.mubr.bf16.gmra.mrb[36].mxu1 %v7324_v46 }
  0x77   : > { %5993 = vmatprep.mubr.bf16.mxu1 %v7328_v55 }
  0x78   : > { %1403 = vmatmul.mubr.bf16.gmra.mrb[32].mxu0 %v7246_v18 }
  0x79   : > { %1410 = vmatprep.mubr.bf16.mxu0 %v7334_v9 }
  0x7e   : > { %5994 = vmatmul.mubr.bf16.gmra.mrb[40].mxu1 %v7337_v31 }
  0x7f   : > { %5997 = vmatprep.mubr.bf16.mxu1 %v7341_v24 }
  0x80   : > { %1411 = vmatmul.mubr.bf16.gmra.mrb[36].mxu0 %v7273_v33 }
  0x81   : > { %1418 = vmatprep.mubr.bf16.mxu0 %v7347_v60 }
  0x86   : > { %5998 = vmatmul.mubr.bf16.gmra.mrb[44].mxu1 %v7350_v34 }
  0x87   : > { %6001 = vmatprep.mubr.bf16.mxu1 %v7354_v14 }
  0x88   : > { %1419 = vmatmul.mubr.bf16.gmra.mrb[40].mxu0 %v7299_v57 }
  0x89   : > { %2319 = vmatprep.mubr.bf16.mxu0 %v6998_v35 }
  0x8e   : > { %6002 = vmatmul.mubr.bf16.gmra.mrb[48].mxu1 %v7362_v22 }
  0x8f   : > { %1804 = vmatprep.mubr.bf16.mxu1 %v7269_v42 }
  0x90   : > { %2320 = vmatmul.mubr.bf16.vlgmr.msra.gmra.mrb[44].mxu0 %v6946_v49 }
  0x91   : > { %2327 = vmatprep.mubr.bf16.mxu0 %v7041_v27 }
  0x96   : > { %1805 = vmatmul.mubr.bf16.vlgmr.msra.gmra.mrb[52].mxu1 %v8587_v1 }
  0x97   : > { %6006 = vmatpush3.bf16.msra.mxu1 %v6542_v8  ;;  %1812 = vmatprep.mubr.bf16.mxu1 %v6919_v21  ;;  %v6547_v21 = vld [vmem:[%s8554_s4 + $0xa8] sm:$0xff]  }
  0x98   : > { %6007 = vmatprep.subr.bf16.mxu1 %v6543_v41  ;;  %2328 = vmatmul.mubr.bf16.gmra.mrb[48].mxu0 %v6993_v28 }
  0x99   : > { %2335 = vmatprep.mubr.bf16.mxu0 %v7099_v4 }
  0x9b   : > { %6008 = vmatpush3.bf16.msra.mxu1 %v6543_v41 }
  0x9c   : > { %6009 = vmatprep.subr.bf16.mxu1 %v6544_v13 }
  0x9e   : > { %1813 = vmatmul.mubr.bf16.gmra.mrb[56].mxu1 %v6878_v44  ;;  %v6548_v44 = vld [vmem:[%s8554_s4 + $0xb0] sm:$0xff]  }
  0x9f   : > { %1820 = vmatprep.mubr.bf16.mxu1 %v6998_v35  ;;  %6010 = vmatpush3.bf16.msra.mxu1 %v6544_v13  ;;  %v6549_v35 = vld [vmem:[%s8554_s4 + $0xb8] sm:$0xff]  }
  0xa0   : > { %6011 = vmatprep.subr.bf16.mxu1 %v6545_v0  ;;  %2336 = vmatmul.mubr.bf16.gmra.mrb[52].mxu0 %v7050_v38 }
  0xa1   : > { %2343 = vmatprep.mubr.bf16.mxu0 %v7165_v6 }
  0xa3   : > { %6012 = vmatpush3.bf16.msra.mxu1 %v6545_v0 }
  0xa4   : > { %6013 = vmatprep.subr.bf16.mxu1 %v6546_v23 }
  0xa6   : > { %1821 = vmatmul.mubr.bf16.gmra.mrb[60].mxu1 %v6946_v49  ;;  %v7408_v49 = vld [vmem:[%s8554_s4 + $0x200] sm:$0xff]  }
  0xa7   : > { %1828 = vmatprep.mubr.bf16.mxu1 %v7041_v27  ;;  %6014 = vmatpush3.bf16.msra.mxu1 %v6546_v23 }
  0xa8   : > { %6015 = vmatprep.subr.bf16.mxu1 %v6547_v21  ;;  %2344 = vmatmul.mubr.bf16.gmra.mrb[56].mxu0 %v7110_v43 }
  0xa9   : > { %2351 = vmatprep.mubr.bf16.mxu0 %v7182_v20 }
  0xab   : > { %6016 = vmatpush3.bf16.msra.mxu1 %v6547_v21 }
  0xac   : > { %6017 = vmatprep.subr.bf16.mxu1 %v6548_v44 }
  0xae   : > { %1829 = vmatmul.mubr.bf16.gmra.mrb[64].mxu1 %v6993_v28 }
  0xaf   : > { %1836 = vmatprep.mubr.bf16.mxu1 %v7099_v4  ;;  %6018 = vmatpush3.bf16.msra.mxu1 %v6548_v44 }
  0xb0   : > { %6019 = vmatprep.subr.bf16.mxu1 %v6549_v35  ;;  %2352 = vmatmul.mubr.bf16.gmra.mrb[60].mxu0 %v7114_v50 }
  0xb1   : > { %2359 = vmatprep.mubr.bf16.mxu0 %v7228_v25 }
  0xb3   : > { %6020 = vmatpush3.bf16.msra.mxu1 %v6549_v35 }
  0xb4   : > { %6053 = vmatprep.subr.bf16.mxu1 %v7408_v49 }
  0xb6   : > { %1837 = vmatmul.mubr.bf16.gmra.mrb[68].mxu1 %v7050_v38 }
  0xb7   : > { %1844 = vmatprep.mubr.bf16.mxu1 %v7165_v6 }
  0xb8   : > { %2360 = vmatmul.mubr.bf16.gmra.mrb[64].mxu0 %v7169_v2 }
  0xb9   : > { %2367 = vmatprep.mubr.bf16.mxu0 %v7281_v40 }
  0xbe   : > { %1845 = vmatmul.mubr.bf16.gmra.mrb[72].mxu1 %v7110_v43 }
  0xbf   : > { %1852 = vmatprep.mubr.bf16.mxu1 %v7182_v20 }
  0xc0   : > { %2368 = vmatmul.mubr.bf16.gmra.mrb[68].mxu0 %v7219_v52 }
  0xc1   : > { %2375 = vmatprep.mubr.bf16.mxu0 %v7321_v7 }
  0xc6   : > { %1853 = vmatmul.mubr.bf16.gmra.mrb[76].mxu1 %v7114_v50 }
  0xc7   : > { %1860 = vmatprep.mubr.bf16.mxu1 %v7228_v25 }
  0xc8   : > { %2376 = vmatmul.mubr.bf16.gmra.mrb[72].mxu0 %v7246_v18 }
  0xc9   : > { %2383 = vmatprep.mubr.bf16.mxu0 %v7334_v9 }
  0xce   : > { %1861 = vmatmul.mubr.bf16.gmra.mrb[80].mxu1 %v7169_v2 }
  0xcf   : > { %1868 = vmatprep.mubr.bf16.mxu1 %v7281_v40  ;;  %v6551_v40 = vld [vmem:[%s8554_s4 + $0x208] sm:$0xff]  }
  0xd0   : > { %2384 = vmatmul.mubr.bf16.gmra.mrb[76].mxu0 %v7273_v33 }
  0xd1   : > { %2391 = vmatprep.mubr.bf16.mxu0 %v7347_v60 }
  0xd6   : > { %1869 = vmatmul.mubr.bf16.gmra.mrb[84].mxu1 %v7219_v52 }
  0xd7   : > { %1876 = vmatprep.mubr.bf16.mxu1 %v7321_v7 }
  0xd8   : > { %2392 = vmatmul.mubr.bf16.gmra.mrb[80].mxu0 %v7299_v57 }
  0xd9   : > { %2399 = vmatprep.mubr.bf16.mxu0 %v6858_v30 }
  0xde   : > { %1877 = vmatmul.mubr.bf16.gmra.mrb[88].mxu1 %v7246_v18 }
  0xdf   : > { %1884 = vmatprep.mubr.bf16.mxu1 %v7334_v9 }
  0xe0   : > { %2400 = vmatmul.mubr.bf16.gmra.mrb[84].mxu0 %v6830_v63 }
  0xe1   : > { %2407 = vmatprep.mubr.bf16.mxu0 %v6889_v51 }
  0xe6   : > { %1885 = vmatmul.mubr.bf16.gmra.mrb[92].mxu1 %v7273_v33 }
  0xe7   : > { %1892 = vmatprep.mubr.bf16.mxu1 %v7347_v60 }
  0xe8   : > { %2408 = vmatmul.mubr.bf16.gmra.mrb[88].mxu0 %v6847_v17 }
  0xe9   : > { %2415 = vmatprep.mubr.bf16.mxu0 %v6902_v61 }
  0xee   : > { %1893 = vmatmul.mubr.bf16.gmra.mrb[96].mxu1 %v7299_v57 }
  0xef   : > { %1900 = vmatprep.mubr.bf16.mxu1 %v6858_v30 }
  0xf0   : > { %2416 = vmatmul.mubr.bf16.gmra.mrb[92].mxu0 %v6855_v26 }
  0xf1   : > { %2423 = vmatprep.mubr.bf16.mxu0 %v6942_v47 }
  0xf6   : > { %1901 = vmatmul.mubr.bf16.gmra.mrb[100].mxu1 %v6830_v63 }
  0xf7   : > { %1908 = vmatprep.mubr.bf16.mxu1 %v6889_v51 }
  0xf8   : > { %2424 = vmatmul.mubr.bf16.gmra.mrb[96].mxu0 %v6896_v58 }
  0xf9   : > { %2431 = vmatprep.mubr.bf16.mxu0 %v7026_v10 }
  0xfe   : > { %1909 = vmatmul.mubr.bf16.gmra.mrb[104].mxu1 %v6847_v17 }
  0xff   : > { %1916 = vmatprep.mubr.bf16.mxu1 %v6902_v61 }
 0x100   : > { %2432 = vmatmul.mubr.bf16.gmra.mrb[100].mxu0 %v6979_v11 }
 0x101   : > { %v5379_v28 = vpop.f32.mrb[0].mxu1  ;;  %2439 = vmatprep.mubr.bf16.mxu0 %v7269_v42 }
 0x102   : > { %v5380_v27 = vpop.f32.mrb[1].mxu1 }
 0x103   : > { %v7451_v38 = vadd.f32 %v5380_v27, %v5379_v28  ;;  %v5382_v30 = vpop.f32.mrb[2].mxu1  ;;  %v8589_v27 = vld [vmem:[#allocation4_spill] sm:$0xff] }
 0x104   : > { %v5383_v4 = vpop.f32.mrb[3].mxu1  ;;  %v5313_v50 = vpop.f32.mrb[0].mxu0 }
 0x105   : > { %v7454_v43 = vadd.f32 %v5383_v4, %v5382_v30  ;;  %v5314_v11 = vpop.f32.mrb[1].mxu0  ;;  %v8590_v30 = vld [vmem:[#allocation5_spill] sm:$0xff] }
 0x106   : > { %1917 = vmatmul.mubr.bf16.gmra.mrb[108].mxu1 %v6855_v26  ;;  %v7465_v2 = vadd.f32 %v5314_v11, %v5313_v50  ;;  %v5316_v20 = vpop.f32.mrb[2].mxu0 }
 0x107   : > { %1924 = vmatprep.mubr.bf16.mxu1 %v6942_v47  ;;  %v5317_v26 = vpop.f32.mrb[3].mxu0 }
 0x108   : > { %2440 = vmatmul.mubr.bf16.gmra.mrb[104].mxu0 %v8587_v1  ;;  %v7468_v47 = vadd.f32 %v5317_v26, %v5316_v20  ;;  %v6557_v20 = vld [vmem:[%s8554_s4 + $0x238] sm:$0xff]   ;;  %v8591_v26 = vld [vmem:[#allocation6_spill] sm:$0xff] }
 0x109   : > { %v5385_v63 = vpop.f32.mrb[4].mxu1 }
 0x10a   : > { %v5386_v17 = vpop.f32.mrb[5].mxu1 }
 0x10b   : > { %v7459_v51 = vadd.f32 %v5386_v17, %v5385_v63  ;;  %v5388_v61 = vpop.f32.mrb[6].mxu1  ;;  %v6556_v63 = vld [vmem:[%s8554_s4 + $0x230] sm:$0xff]  }
 0x10c   : > { %v5389_v10 = vpop.f32.mrb[7].mxu1 }
 0x10d   : > { %v7462_v6 = vadd.f32 %v5389_v10, %v5388_v61 }
 0x10e   : > { %1925 = vmatmul.mubr.bf16.gmra.mrb[112].mxu1 %v6896_v58 }
 0x10f   : > { %6021 = vmatprep.mubr.bf16.mxu1 %v7269_v42 }
 0x110   : > { %v5319_v58 = vpop.f32.mrb[4].mxu0 }
 0x111   : > { %v5391_v7 = vpop.f32.mrb[8].mxu1  ;;  %v5320_v3 = vpop.f32.mrb[5].mxu0 }
 0x112   : > { %v5392_v52 = vpop.f32.mrb[9].mxu1  ;;  %v7483_v16 = vadd.f32 %v5320_v3, %v5319_v58  ;;  %v5322_v53 = vpop.f32.mrb[6].mxu0  ;;  %v8593_v3 = vld [vmem:[#allocation8_spill] sm:$0xff] }
 0x113   : > { %v7470_v25 = vadd.f32 %v5392_v52, %v5391_v7  ;;  %v5394_v18 = vpop.f32.mrb[10].mxu1  ;;  %v5323_v8 = vpop.f32.mrb[7].mxu0  ;;  %v8592_v7 = vld [vmem:[#allocation7_spill] sm:$0xff] }
 0x114   : > { %v5395_v33 = vpop.f32.mrb[11].mxu1  ;;  %v7487_v39 = vadd.f32 %v5323_v8, %v5322_v53 }
 0x115   : > { %v7475_v57 = vadd.f32 %v5395_v33, %v5394_v18 }
 0x116   : > { %6022 = vmatmul.mubr.bf16.vlgmr.msra.gmra.mrb[20].mxu1 %v7069_v5 }
 0x117   : > { %6054 = vmatpush3.bf16.msra.mxu1 %v7408_v49  ;;  %6025 = vmatprep.mubr.bf16.mxu1 %v7080_v36  ;;  %v6555_v49 = vld [vmem:[%s8554_s4 + $0x228] sm:$0xff]  }
 0x118   : > { %6055 = vmatprep.subr.bf16.mxu1 %v6551_v40 }
 0x119   : > { %v5397_v37 = vpop.f32.mrb[12].mxu1  ;;  %v5325_v9 = vpop.f32.mrb[8].mxu0 }
 0x11a   : > { %v5398_v54 = vpop.f32.mrb[13].mxu1  ;;  %v5326_v60 = vpop.f32.mrb[9].mxu0 }
 0x11b   : > { %v7485_v15 = vadd.f32 %v5398_v54, %v5397_v37  ;;  %v5400_v5 = vpop.f32.mrb[14].mxu1  ;;  %6056 = vmatpush3.bf16.msra.mxu1 %v6551_v40  ;;  %v7499_v48 = vadd.f32 %v5326_v60, %v5325_v9  ;;  %v5328_v41 = vpop.f32.mrb[10].mxu0 }
 0x11c   : > { %v5401_v45 = vpop.f32.mrb[15].mxu1  ;;  %6057 = vmatprep.subr.bf16.mxu1 %v6552_v59  ;;  %v5329_v0 = vpop.f32.mrb[11].mxu0 }
 0x11d   : > { %v7492_v29 = vadd.f32 %v5401_v45, %v5400_v5  ;;  %v7503_v44 = vadd.f32 %v5329_v0, %v5328_v41 }
 0x11e   : > { %6026 = vmatmul.mubr.bf16.gmra.mrb[24].mxu1 %v7136_v12 }
 0x11f   : > { %6029 = vmatprep.mubr.bf16.mxu1 %v8588_v19  ;;  %6058 = vmatpush3.bf16.msra.mxu1 %v6552_v59 }
 0x120   : > { %6059 = vmatprep.subr.bf16.mxu1 %v6553_v32 }
 0x121   : > { %v5403_v62 = vpop.f32.mrb[16].mxu1 }
 0x122   : > { %v5404_v13 = vpop.f32.mrb[17].mxu1  ;;  %v5331_v4 = vpop.f32.mrb[12].mxu0 }
 0x123   : > { %v7501_v23 = vadd.f32 %v5404_v13, %v5403_v62  ;;  %v5406_v21 = vpop.f32.mrb[18].mxu1  ;;  %6060 = vmatpush3.bf16.msra.mxu1 %v6553_v32  ;;  %v5332_v17 = vpop.f32.mrb[13].mxu0  ;;  %v6558_v13 = vld [vmem:[%s8556_s6 + $0x100] sm:$0xff]  }
 0x124   : > { %v5407_v35 = vpop.f32.mrb[19].mxu1  ;;  %6061 = vmatprep.subr.bf16.mxu1 %v6554_v56  ;;  %v7515_v61 = vadd.f32 %v5332_v17, %v5331_v4  ;;  %v5334_v10 = vpop.f32.mrb[14].mxu0  ;;  %5705 = vmatprep.subr.bf16.mxu0 %v6558_v13 }
 0x125   : > { %v7508_v28 = vadd.f32 %v5407_v35, %v5406_v21  ;;  %v5335_v50 = vpop.f32.mrb[15].mxu0  ;;  %v6559_v21 = vld [vmem:[%s8556_s6 + $0xc0] sm:$0xff]  }
 0x126   : > { %6030 = vmatmul.mubr.bf16.gmra.mrb[28].mxu1 %v8589_v27  ;;  %v7517_v11 = vadd.f32 %v5335_v50, %v5334_v10  ;;  %5706 = vmatpush3.bf16.msra.mxu0 %v6559_v21  ;;  %v6562_v21 = vld [vmem:[%s8556_s6 + $0x110] sm:$0xff]  }
 0x127   : > { %6033 = vmatprep.mubr.bf16.mxu1 %v8590_v30  ;;  %6062 = vmatpush3.bf16.msra.mxu1 %v6554_v56 }
 0x128   : > { %6063 = vmatprep.subr.bf16.mxu1 %v6555_v49 }
 0x12b   : > { %6064 = vmatpush3.bf16.msra.mxu1 %v6555_v49  ;;  %v5337_v52 = vpop.f32.mrb[16].mxu0 }
 0x12c   : > { %6065 = vmatprep.subr.bf16.mxu1 %v6556_v63  ;;  %v5338_v18 = vpop.f32.mrb[17].mxu0 }
 0x12d   : > { %v7524_v33 = vadd.f32 %v5338_v18, %v5337_v52  ;;  %v5340_v40 = vpop.f32.mrb[18].mxu0 }
 0x12e   : > { %6034 = vmatmul.mubr.bf16.gmra.mrb[32].mxu1 %v8591_v26  ;;  %v5341_v58 = vpop.f32.mrb[19].mxu0 }
 0x12f   : > { %6037 = vmatprep.mubr.bf16.mxu1 %v8592_v7  ;;  %6066 = vmatpush3.bf16.msra.mxu1 %v6556_v63  ;;  %v7526_v59 = vadd.f32 %v5341_v58, %v5340_v40  ;;  %v6560_v58 = vld [vmem:[%s8556_s6 + $0x108] sm:$0xff]  }
 0x130   : > { %6067 = vmatprep.subr.bf16.mxu1 %v6557_v20  ;;  %5707 = vmatprep.subr.bf16.mxu0 %v6560_v58 }
 0x133   : > { %6068 = vmatpush3.bf16.msra.mxu1 %v6557_v20  ;;  %v5343_v37 = vpop.f32.mrb[20].mxu0 }
 0x134   : > { %v5344_v53 = vpop.f32.mrb[21].mxu0 }
 0x135   : > { %v7530_v54 = vadd.f32 %v5344_v53, %v5343_v37  ;;  %v5346_v8 = vpop.f32.mrb[22].mxu0 }
 0x136   : > { %6038 = vmatmul.mubr.bf16.gmra.mrb[36].mxu1 %v8593_v3  ;;  %v5347_v5 = vpop.f32.mrb[23].mxu0 }
 0x137   : > { %6041 = vmatprep.mubr.bf16.mxu1 %v7324_v46  ;;  %v7532_v45 = vadd.f32 %v5347_v5, %v5346_v8 }
 0x13b   : > { %v5349_v32 = vpop.f32.mrb[24].mxu0 }
 0x13c   : > { %v5350_v9 = vpop.f32.mrb[25].mxu0 }
 0x13d   : > { %v7536_v56 = vadd.f32 %v5350_v9, %v5349_v32  ;;  %v5352_v60 = vpop.f32.mrb[26].mxu0 }
 0x13e   : > { %6042 = vmatmul.mubr.bf16.gmra.mrb[40].mxu1 %v7328_v55  ;;  %v5353_v62 = vpop.f32.mrb[27].mxu0 }
 0x13f   : > { %6045 = vmatprep.mubr.bf16.mxu1 %v7337_v31  ;;  %v7538_v41 = vadd.f32 %v5353_v62, %v5352_v60 }
 0x143   : > { %v5355_v0 = vpop.f32.mrb[28].mxu0 }
 0x144   : > { %v5356_v35 = vpop.f32.mrb[29].mxu0 }
 0x145   : > { %v7548_v49 = vadd.f32 %v5356_v35, %v5355_v0  ;;  %v5358_v4 = vpop.f32.mrb[30].mxu0 }
 0x146   : > { %6046 = vmatmul.mubr.bf16.gmra.mrb[44].mxu1 %v7341_v24  ;;  %v5359_v63 = vpop.f32.mrb[31].mxu0 }
 0x147   : > { %6049 = vmatprep.mubr.bf16.mxu1 %v7350_v34  ;;  %v7550_v17 = vadd.f32 %v5359_v63, %v5358_v4 }
 0x14b   : > { %v5361_v10 = vpop.f32.mrb[32].mxu0 }
 0x14c   : > { %v5362_v50 = vpop.f32.mrb[33].mxu0 }
 0x14d   : > { %v7554_v20 = vadd.f32 %v5362_v50, %v5361_v10  ;;  %v5364_v52 = vpop.f32.mrb[34].mxu0 }
 0x14e   : > { %6050 = vmatmul.mubr.bf16.gmra.mrb[48].mxu1 %v7354_v14  ;;  %v5365_v18 = vpop.f32.mrb[35].mxu0 }
 0x14f   : > { %6069 = vmatprep.mubr.bf16.mxu1 %v7080_v36  ;;  %v7556_v40 = vadd.f32 %v5365_v18, %v5364_v52  ;;  %v6561_v36 = vld [vmem:[%s8556_s6 + $0xc8] sm:$0xff]   ;;  %v6571_v52 = vld [vmem:[%s8556_s6] sm:$0xff]  }
 0x150   : > { %5708 = vmatpush3.bf16.msra.mxu0 %v6561_v36  ;;  %v6572_v36 = vld [vmem:[%s8556_s6 + $0x48] sm:$0xff]  }
 0x151   : > { %5709 = vmatprep.subr.bf16.mxu0 %v6562_v21  ;;  %v6567_v21 = vld [vmem:[%s8556_s6 + $0xe0] sm:$0xff]  }
 0x153   : > { %v5367_v37 = vpop.f32.mrb[36].mxu0 }
 0x154   : > { %v5368_v53 = vpop.f32.mrb[37].mxu0 }
 0x155   : > { %v7566_v8 = vadd.f32 %v5368_v53, %v5367_v37  ;;  %v5370_v5 = vpop.f32.mrb[38].mxu0  ;;  %v6566_v37 = vld [vmem:[%s8556_s6 + $0x120] sm:$0xff]  }
 0x156   : > { %6070 = vmatmul.mubr.bf16.vlgmr.msra.gmra.mrb[20].mxu1 %v7136_v12  ;;  %v5371_v32 = vpop.f32.mrb[39].mxu0 }
 0x157   : > { %6073 = vmatprep.mubr.bf16.mxu1 %v8588_v19  ;;  %v7568_v9 = vadd.f32 %v5371_v32, %v5370_v5 }
 0x15b   : > { %v5373_v12 = vpop.f32.mrb[40].mxu0 }
 0x15c   : > { %v5374_v19 = vpop.f32.mrb[41].mxu0 }
 0x15d   : > { %v7572_v60 = vadd.f32 %v5374_v19, %v5373_v12  ;;  %v5376_v62 = vpop.f32.mrb[42].mxu0  ;;  %v6573_v19 = vld [vmem:[%s8556_s6 + $0x8] sm:$0xff]  }
 0x15e   : > { %6074 = vmatmul.mubr.bf16.gmra.mrb[24].mxu1 %v8589_v27  ;;  %v5377_v13 = vpop.f32.mrb[43].mxu0  ;;  %v6563_v27 = vld [vmem:[%s8556_s6 + $0xd0] sm:$0xff]  }
 0x15f   : > { %6077 = vmatprep.mubr.bf16.mxu1 %v8590_v30  ;;  %v7574_v0 = vadd.f32 %v5377_v13, %v5376_v62  ;;  %v6564_v30 = vld [vmem:[%s8556_s6 + $0x118] sm:$0xff]   ;;  %5710 = vmatpush3.bf16.msra.mxu0 %v6563_v27  ;;  %v6568_v27 = vld [vmem:[%s8556_s6 + $0x128] sm:$0xff]  }
 0x160   : > { %5711 = vmatprep.subr.bf16.mxu0 %v6564_v30 }
 0x163   : > { %v5585_v35 = vpop.f32.mrb[44].mxu0 }
 0x164   : > { %v5586_v4 = vpop.f32.mrb[45].mxu0 }
 0x165   : > { %v5587_v10 = vadd.f32 %v5586_v4, %v5585_v35  ;;  %v5588_v50 = vpop.f32.mrb[46].mxu0  ;;  %v6574_v35 = vld [vmem:[%s8556_s6 + $0x50] sm:$0xff]  }
 0x166   : > { %6078 = vmatmul.mubr.bf16.gmra.mrb[28].mxu1 %v8591_v26  ;;  %v6565_v26 = vld [vmem:[%s8556_s6 + $0xd8] sm:$0xff]   ;;  %v5589_v58 = vpop.f32.mrb[47].mxu0 }
 0x167   : > { %6081 = vmatprep.mubr.bf16.mxu1 %v8592_v7  ;;  %v6570_v7 = vld [vmem:[%s8556_s6 + $0x40] sm:$0xff]   ;;  %v5590_v32 = vadd.f32 %v5589_v58, %v5588_v50  ;;  %5712 = vmatpush3.bf16.msra.mxu0 %v6565_v26  ;;  %v6576_v50 = vld [vmem:[%s8556_s6 + $0x10] sm:$0xff]  }
 0x168   : > { %5785 = vmatprep.subr.bf16.mxu1 %v6570_v7  ;;  %5713 = vmatprep.subr.bf16.mxu0 %v6566_v37  ;;  %v6575_v58 = vld [vmem:[%s8556_s6 + $0x130] sm:$0xff]  }
 0x169   : > { %v5449_v63 = vpop.f32.mrb[52].mxu1  ;;  %5786 = vmatpush3.bf16.msra.mxu1 %v6571_v52  ;;  %v6569_v52 = vld [vmem:[%s8556_s6 + $0xe8] sm:$0xff]  }
 0x16a   : > { %v5450_v18 = vpop.f32.mrb[53].mxu1  ;;  %5787 = vmatprep.subr.bf16.mxu1 %v6572_v36 }
 0x16b   : > { %v5451_v53 = vadd.f32 %v5450_v18, %v5449_v63  ;;  %v5452_v5 = vpop.f32.mrb[54].mxu1  ;;  %v5591_v30 = vpop.f32.mrb[48].mxu0  ;;  %5714 = vmatpush3.bf16.msra.mxu0 %v6567_v21 }
 0x16c   : > { %v5453_v12 = vpop.f32.mrb[55].mxu1  ;;  %v5592_v63 = vpop.f32.mrb[49].mxu0  ;;  %5715 = vmatprep.subr.bf16.mxu0 %v6568_v27 }
 0x16d   : > { %v6240_v62 = vadd.f32 %v5451_v53, %v7465_v2  ;;  %v5454_v13 = vadd.f32 %v5453_v12, %v5452_v5  ;;  %5788 = vmatpush3.bf16.msra.mxu1 %v6573_v19  ;;  %v5594_v7 = vpop.f32.mrb[50].mxu0  ;;  %v6579_v12 = vld [vmem:[%s8556_s6 + $0x18] sm:$0xff]  }
 0x16e   : > { %6082 = vmatmul.mubr.bf16.gmra.mrb[32].mxu1 %v8593_v3  ;;  %v5593_v3 = vadd.f32 %v5592_v63, %v5591_v30  ;;  %5789 = vmatprep.subr.bf16.mxu1 %v6574_v35  ;;  %v5595_v18 = vpop.f32.mrb[51].mxu0 }
 0x16f   : > { %v6246_v2 = vadd.f32 %v5454_v13, %v7468_v47  ;;  %6085 = vmatprep.mubr.bf16.mxu1 %v7324_v46  ;;  %v7618_v4 = vadd.f32 %v6240_v62, %v5587_v10  ;;  %v6578_v46 = vld [vmem:[%s8556_s6 + $0x58] sm:$0xff]   ;;  %v5596_v53 = vadd.f32 %v5595_v18, %v5594_v7  ;;  %5716 = vmatpush3.bf16.msra.mxu0 %v6569_v52  ;;  %v6577_v62 = vld [vmem:[%s8556_s6 + $0xf0] sm:$0xff]  }
 0x170   : > { %5717 = vmatprep.subr.bf16.mxu0 %v6575_v58 }
 0x171   : > { %v5455_v26 = vpop.f32.mrb[56].mxu1  ;;  %v7629_v47 = vadd.f32 %v6246_v2, %v5590_v32  ;;  %5790 = vmatpush3.bf16.msra.mxu1 %v6576_v50 }
 0x172   : > { %v5456_v10 = vpop.f32.mrb[57].mxu1  ;;  %5791 = vmatprep.subr.bf16.mxu1 %v6578_v46 }
 0x173   : > { %v5457_v37 = vadd.f32 %v5456_v10, %v5455_v26  ;;  %v5458_v36 = vpop.f32.mrb[58].mxu1  ;;  %v5597_v21 = vpop.f32.mrb[52].mxu0  ;;  %5718 = vmatpush3.bf16.msra.mxu0 %v6577_v62 }
 0x174   : > { %v5459_v5 = vpop.f32.mrb[59].mxu1  ;;  %v5598_v27 = vpop.f32.mrb[53].mxu0 }
 0x175   : > { %v6237_v19 = vadd.f32 %v5457_v37, %v7483_v16  ;;  %v5460_v32 = vadd.f32 %v5459_v5, %v5458_v36  ;;  %5792 = vmatpush3.bf16.msra.mxu1 %v6579_v12  ;;  %v5599_v2 = vadd.f32 %v5598_v27, %v5597_v21  ;;  %v5600_v30 = vpop.f32.mrb[54].mxu0 }
 0x176   : > { %6086 = vmatmul.mubr.bf16.gmra.mrb[36].mxu1 %v7328_v55  ;;  %v5601_v26 = vpop.f32.mrb[55].mxu0 }
 0x177   : > { %v6243_v13 = vadd.f32 %v5460_v32, %v7487_v39  ;;  %6089 = vmatprep.mubr.bf16.mxu1 %v7337_v31  ;;  %v7644_v35 = vadd.f32 %v6237_v19, %v5593_v3  ;;  %v5602_v52 = vadd.f32 %v5601_v26, %v5600_v30 }
 0x179   : > { %v5461_v16 = vpop.f32.mrb[60].mxu1  ;;  %v7646_v63 = vadd.f32 %v6243_v13, %v5596_v53 }
 0x17a   : > { %v5462_v50 = vpop.f32.mrb[61].mxu1 }
 0x17b   : > { %v5463_v7 = vadd.f32 %v5462_v50, %v5461_v16  ;;  %v5464_v55 = vpop.f32.mrb[62].mxu1  ;;  %v5603_v3 = vpop.f32.mrb[56].mxu0 }
 0x17c   : > { %v5465_v46 = vpop.f32.mrb[63].mxu1  ;;  %v5604_v58 = vpop.f32.mrb[57].mxu0 }
 0x17d   : > { %v6252_v39 = vadd.f32 %v5463_v7, %v7499_v48  ;;  %v5466_v10 = vadd.f32 %v5465_v46, %v5464_v55  ;;  %v5605_v36 = vadd.f32 %v5604_v58, %v5603_v3  ;;  %v5606_v53 = vpop.f32.mrb[58].mxu0 }
 0x17e   : > { %6090 = vmatmul.mubr.bf16.gmra.mrb[40].mxu1 %v7341_v24  ;;  %v5607_v19 = vpop.f32.mrb[59].mxu0 }
 0x17f   : > { %v6258_v31 = vadd.f32 %v5466_v10, %v7503_v44  ;;  %6093 = vmatprep.mubr.bf16.mxu1 %v7350_v34  ;;  %v7652_v18 = vadd.f32 %v6252_v39, %v5599_v2  ;;  %v5608_v62 = vadd.f32 %v5607_v19, %v5606_v53 }
 0x181   : > { %v5467_v37 = vpop.f32.mrb[64].mxu1  ;;  %v7654_v5 = vadd.f32 %v6258_v31, %v5602_v52 }
 0x182   : > { %v5468_v12 = vpop.f32.mrb[65].mxu1 }
 0x183   : > { %v5469_v32 = vadd.f32 %v5468_v12, %v5467_v37  ;;  %v5470_v48 = vpop.f32.mrb[66].mxu1  ;;  %v5609_v21 = vpop.f32.mrb[60].mxu0 }
 0x184   : > { %v5471_v13 = vpop.f32.mrb[67].mxu1  ;;  %v5610_v16 = vpop.f32.mrb[61].mxu0 }
 0x185   : > { %v6249_v24 = vadd.f32 %v5469_v32, %v7515_v61  ;;  %v5472_v44 = vadd.f32 %v5471_v13, %v5470_v48  ;;  %v5611_v30 = vadd.f32 %v5610_v16, %v5609_v21  ;;  %v5612_v50 = vpop.f32.mrb[62].mxu0 }
 0x186   : > { %6094 = vmatmul.mubr.bf16.gmra.mrb[44].mxu1 %v7354_v14  ;;  %v5613_v55 = vpop.f32.mrb[63].mxu0 }
 0x187   : > { %v6255_v34 = vadd.f32 %v5472_v44, %v7517_v11  ;;  %6097 = vmatprep.mubr.bf16.mxu1 %v7362_v22  ;;  %v7660_v27 = vadd.f32 %v6249_v24, %v5605_v36  ;;  %v5614_v46 = vadd.f32 %v5613_v55, %v5612_v50 }
 0x189   : > { %v5473_v2 = vpop.f32.mrb[68].mxu1  ;;  %v7662_v26 = vadd.f32 %v6255_v34, %v5608_v62 }
 0x18a   : > { %v5474_v7 = vpop.f32.mrb[69].mxu1 }
 0x18b   : > { %v5475_v52 = vadd.f32 %v5474_v7, %v5473_v2  ;;  %v5476_v61 = vpop.f32.mrb[70].mxu1  ;;  %v5615_v10 = vpop.f32.mrb[64].mxu0 }
 0x18c   : > { %v5477_v39 = vpop.f32.mrb[71].mxu1  ;;  %v5616_v3 = vpop.f32.mrb[65].mxu0 }
 0x18d   : > { %v6264_v14 = vadd.f32 %v5475_v52, %v7524_v33  ;;  %v5478_v11 = vadd.f32 %v5477_v39, %v5476_v61  ;;  %v5617_v37 = vadd.f32 %v5616_v3, %v5615_v10  ;;  %v5618_v36 = vpop.f32.mrb[66].mxu0 }
 0x18e   : > { %6098 = vmatmul.mubr.bf16.gmra.mrb[48].mxu1 %v7269_v42  ;;  %v5619_v19 = vpop.f32.mrb[67].mxu0 }
 0x18f   : > { %v6270_v22 = vadd.f32 %v5478_v11, %v7526_v59  ;;  %3851 = vmatprep.mubr.bf16.mxu1 %v7269_v42  ;;  %v7668_v31 = vadd.f32 %v6264_v14, %v5611_v30  ;;  %v5620_v48 = vadd.f32 %v5619_v19, %v5618_v36 }
 0x191   : > { %v5479_v58 = vpop.f32.mrb[72].mxu1  ;;  %v7670_v53 = vadd.f32 %v6270_v22, %v5614_v46 }
 0x192   : > { %v5480_v12 = vpop.f32.mrb[73].mxu1 }
 0x193   : > { %v5481_v32 = vadd.f32 %v5480_v12, %v5479_v58  ;;  %v5482_v33 = vpop.f32.mrb[74].mxu1  ;;  %v5621_v44 = vpop.f32.mrb[68].mxu0 }
 0x194   : > { %v5483_v62 = vpop.f32.mrb[75].mxu1  ;;  %v5622_v21 = vpop.f32.mrb[69].mxu0 }
 0x195   : > { %v6261_v13 = vadd.f32 %v5481_v32, %v7530_v54  ;;  %v5484_v59 = vadd.f32 %v5483_v62, %v5482_v33  ;;  %v5623_v2 = vadd.f32 %v5622_v21, %v5621_v44  ;;  %v5624_v30 = vpop.f32.mrb[70].mxu0  ;;  %v6580_v21 = vld [vmem:[%s8556_s6 + $0x60] sm:$0xff]  }
 0x196   : > { %v5625_v55 = vpop.f32.mrb[71].mxu0  ;;  %5793 = vmatprep.subr.bf16.mxu1 %v6580_v21 }
 0x197   : > { %v6267_v24 = vadd.f32 %v5484_v59, %v7532_v45  ;;  %v7674_v34 = vadd.f32 %v6261_v13, %v5617_v37  ;;  %v5626_v46 = vadd.f32 %v5625_v55, %v5624_v30 }
 0x199   : > { %v5485_v16 = vpop.f32.mrb[76].mxu1  ;;  %v7676_v50 = vadd.f32 %v6267_v24, %v5620_v48 }
 0x19a   : > { %v5486_v7 = vpop.f32.mrb[77].mxu1 }
 0x19b   : > { %v5487_v52 = vadd.f32 %v5486_v7, %v5485_v16  ;;  %v5488_v61 = vpop.f32.mrb[78].mxu1  ;;  %v5627_v11 = vpop.f32.mrb[72].mxu0  ;;  %v6581_v7 = vld [vmem:[%s8556_s6 + $0x20] sm:$0xff]  }
 0x19c   : > { %v5489_v39 = vpop.f32.mrb[79].mxu1  ;;  %v5628_v10 = vpop.f32.mrb[73].mxu0  ;;  %5794 = vmatpush3.bf16.msra.mxu1 %v6581_v7 }
 0x19d   : > { %v6276_v54 = vadd.f32 %v5487_v52, %v7536_v56  ;;  %v5490_v14 = vadd.f32 %v5489_v39, %v5488_v61  ;;  %v5629_v58 = vadd.f32 %v5628_v10, %v5627_v11  ;;  %v5630_v37 = vpop.f32.mrb[74].mxu0  ;;  %v6583_v11 = vld [vmem:[%s8556_s6 + $0x28] sm:$0xff]  }
 0x19e   : > { %v5631_v19 = vpop.f32.mrb[75].mxu0 }
 0x19f   : > { %v6282_v45 = vadd.f32 %v5490_v14, %v7538_v41  ;;  %v7680_v22 = vadd.f32 %v6276_v54, %v5623_v2  ;;  %v5632_v48 = vadd.f32 %v5631_v19, %v5630_v37  ;;  %v6582_v54 = vld [vmem:[%s8556_s6 + $0x68] sm:$0xff]  }
 0x1a0   : > { %5795 = vmatprep.subr.bf16.mxu1 %v6582_v54 }
 0x1a1   : > { %v5491_v3 = vpop.f32.mrb[80].mxu1  ;;  %v7682_v36 = vadd.f32 %v6282_v45, %v5626_v46  ;;  %5796 = vmatpush3.bf16.msra.mxu1 %v6583_v11 }
 0x1a2   : > { %v5492_v12 = vpop.f32.mrb[81].mxu1 }
 0x1a3   : > { %v5493_v32 = vadd.f32 %v5492_v12, %v5491_v3  ;;  %v5494_v33 = vpop.f32.mrb[82].mxu1  ;;  %v5633_v59 = vpop.f32.mrb[76].mxu0  ;;  %v6584_v12 = vld [vmem:[%s8556_s6 + $0x70] sm:$0xff]  }
 0x1a4   : > { %v5495_v62 = vpop.f32.mrb[83].mxu1  ;;  %v5634_v44 = vpop.f32.mrb[77].mxu0  ;;  %5797 = vmatprep.subr.bf16.mxu1 %v6584_v12 }
 0x1a5   : > { %v6273_v56 = vadd.f32 %v5493_v32, %v7548_v49  ;;  %v5496_v13 = vadd.f32 %v5495_v62, %v5494_v33  ;;  %v5635_v2 = vadd.f32 %v5634_v44, %v5633_v59  ;;  %v5636_v30 = vpop.f32.mrb[78].mxu0 }
 0x1a6   : > { %v5637_v52 = vpop.f32.mrb[79].mxu0 }
 0x1a7   : > { %v6279_v41 = vadd.f32 %v5496_v13, %v7550_v17  ;;  %v7686_v24 = vadd.f32 %v6273_v56, %v5629_v58  ;;  %v5638_v46 = vadd.f32 %v5637_v52, %v5636_v30 }
 0x1a9   : > { %v5497_v16 = vpop.f32.mrb[84].mxu1  ;;  %v7694_v55 = vadd.f32 %v6279_v41, %v5632_v48 }
 0x1aa   : > { %v5498_v49 = vpop.f32.mrb[85].mxu1 }
 0x1ab   : > { %v5499_v17 = vadd.f32 %v5498_v49, %v5497_v16  ;;  %v5500_v61 = vpop.f32.mrb[86].mxu1  ;;  %v5639_v3 = vpop.f32.mrb[80].mxu0  ;;  %v6588_v16 = vld [vmem:[%s8556_s6 + $0x78] sm:$0xff]  }
 0x1ac   : > { %v5501_v39 = vpop.f32.mrb[87].mxu1  ;;  %v5640_v37 = vpop.f32.mrb[81].mxu0 }
 0x1ad   : > { %v6288_v14 = vadd.f32 %v5499_v17, %v7554_v20  ;;  %v5502_v45 = vadd.f32 %v5501_v39, %v5500_v61  ;;  %v5641_v32 = vadd.f32 %v5640_v37, %v5639_v3  ;;  %v5642_v20 = vpop.f32.mrb[82].mxu0  ;;  %v6585_v37 = vld [vmem:[%s8556_s6 + $0x138] sm:$0xff]  }
 0x1ae   : > { %v5643_v62 = vpop.f32.mrb[83].mxu0  ;;  %5719 = vmatprep.subr.bf16.mxu0 %v6585_v37 }
 0x1af   : > { %v6294_v10 = vadd.f32 %v5502_v45, %v7556_v40  ;;  %v7704_v58 = vadd.f32 %v6288_v14, %v5635_v2  ;;  %v6586_v40 = vld [vmem:[%s8556_s6 + $0x30] sm:$0xff]   ;;  %v5644_v41 = vadd.f32 %v5643_v62, %v5642_v20  ;;  %v6589_v2 = vld [vmem:[%s8556_s6 + $0x38] sm:$0xff]  }
 0x1b0   : > { %5798 = vmatpush3.bf16.msra.mxu1 %v6586_v40 }
 0x1b1   : > { %v5503_v19 = vpop.f32.mrb[88].mxu1  ;;  %v7709_v33 = vadd.f32 %v6294_v10, %v5638_v46  ;;  %5799 = vmatprep.subr.bf16.mxu1 %v6588_v16 }
 0x1b2   : > { %v5504_v48 = vpop.f32.mrb[89].mxu1 }
 0x1b3   : > { %v5505_v56 = vadd.f32 %v5504_v48, %v5503_v19  ;;  %v5506_v13 = vpop.f32.mrb[90].mxu1  ;;  %v5645_v7 = vpop.f32.mrb[84].mxu0 }
 0x1b4   : > { %v5507_v59 = vpop.f32.mrb[91].mxu1  ;;  %v5646_v52 = vpop.f32.mrb[85].mxu0  ;;  %5800 = vmatpush3.bf16.msra.mxu1 %v6589_v2 }
 0x1b5   : > { %v6285_v44 = vadd.f32 %v5505_v56, %v7566_v8  ;;  %v5508_v21 = vadd.f32 %v5507_v59, %v5506_v13  ;;  %v5647_v61 = vadd.f32 %v5646_v52, %v5645_v7  ;;  %v5648_v8 = vpop.f32.mrb[86].mxu0 }
 0x1b6   : > { %v5649_v54 = vpop.f32.mrb[87].mxu0 }
 0x1b7   : > { %v6291_v30 = vadd.f32 %v5508_v21, %v7568_v9  ;;  %v7722_v49 = vadd.f32 %v6285_v44, %v5641_v32  ;;  %v5650_v11 = vadd.f32 %v5649_v54, %v5648_v8  ;;  %3852 = vmatmul.mubr.bf16.vlgmr.msra.gmra.mrb[116].mxu1 %v8587_v1  ;;  %v6587_v32 = vld [vmem:[%s8556_s6 + $0xf8] sm:$0xff]  }
 0x1b8   : > { %5720 = vmatpush3.bf16.msra.mxu0 %v6587_v32 }
 0x1b9   : > { %v5509_v17 = vpop.f32.mrb[92].mxu1  ;;  %v7724_v46 = vadd.f32 %v6291_v30, %v5644_v41 }
 0x1ba   : > { %v5510_v39 = vpop.f32.mrb[93].mxu1 }
 0x1bb   : > { %v5511_v14 = vadd.f32 %v5510_v39, %v5509_v17  ;;  %v5512_v45 = vpop.f32.mrb[94].mxu1  ;;  %v5651_v19 = vpop.f32.mrb[88].mxu0 }
 0x1bc   : > { %v5513_v10 = vpop.f32.mrb[95].mxu1  ;;  %v5652_v48 = vpop.f32.mrb[89].mxu0 }
 0x1bd   : > { %v6300_v9 = vadd.f32 %v5511_v14, %v7572_v60  ;;  %v5514_v3 = vadd.f32 %v5513_v10, %v5512_v45  ;;  %v5653_v62 = vadd.f32 %v5652_v48, %v5651_v19  ;;  %v5654_v40 = vpop.f32.mrb[90].mxu0 }
 0x1be   : > { %v5655_v13 = vpop.f32.mrb[91].mxu0 }
 0x1bf   : > { %v6306_v12 = vadd.f32 %v5514_v3, %v7574_v0  ;;  %v7735_v20 = vadd.f32 %v6300_v9, %v5647_v61  ;;  %v5656_v0 = vadd.f32 %v5655_v13, %v5654_v40 }
 0x1c1   : > { %v5515_v1 = vpop.f32.mrb[96].mxu1  ;;  %v7737_v60 = vadd.f32 %v6306_v12, %v5650_v11 }
 0x1c2   : > { %v5516_v56 = vpop.f32.mrb[97].mxu1 }
 0x1c3   : > { %v5517_v41 = vadd.f32 %v5516_v56, %v5515_v1  ;;  %v5518_v59 = vpop.f32.mrb[98].mxu1  ;;  %v5657_v30 = vpop.f32.mrb[92].mxu0 }
 0x1c4   : > { %v5519_v44 = vpop.f32.mrb[99].mxu1  ;;  %v5658_v52 = vpop.f32.mrb[93].mxu0 }
 0x1c5   : > { %v6297_v21 = vadd.f32 %v5517_v41, %v7451_v38  ;;  %v5520_v16 = vadd.f32 %v5519_v44, %v5518_v59  ;;  %v5659_v61 = vadd.f32 %v5658_v52, %v5657_v30  ;;  %v5660_v8 = vpop.f32.mrb[94].mxu0 }
 0x1c6   : > { %v5661_v14 = vpop.f32.mrb[95].mxu0 }
 0x1c7   : > { %v6303_v2 = vadd.f32 %v5520_v16, %v7454_v43  ;;  %v7741_v7 = vadd.f32 %v6297_v21, %v5653_v62  ;;  %v5662_v10 = vadd.f32 %v5661_v14, %v5660_v8 }
 0x1c9   : > { %v5521_v17 = vpop.f32.mrb[100].mxu1  ;;  %v7743_v39 = vadd.f32 %v6303_v2, %v5656_v0 }
 0x1ca   : > { %v5522_v54 = vpop.f32.mrb[101].mxu1 }
 0x1cb   : > { %v5523_v45 = vadd.f32 %v5522_v54, %v5521_v17  ;;  %v5524_v11 = vpop.f32.mrb[102].mxu1  ;;  %v5663_v37 = vpop.f32.mrb[96].mxu0 }
 0x1cc   : > { %v5525_v9 = vpop.f32.mrb[103].mxu1  ;;  %v5664_v19 = vpop.f32.mrb[97].mxu0 }
 0x1cd   : > { %v6312_v38 = vadd.f32 %v5523_v45, %v7459_v51  ;;  %v5526_v3 = vadd.f32 %v5525_v9, %v5524_v11  ;;  %v5665_v48 = vadd.f32 %v5664_v19, %v5663_v37  ;;  %v5666_v1 = vpop.f32.mrb[98].mxu0 }
 0x1ce   : > { %v5667_v56 = vpop.f32.mrb[99].mxu0 }
 0x1cf   : > { %v6318_v43 = vadd.f32 %v5526_v3, %v7462_v6  ;;  %v7747_v12 = vadd.f32 %v6312_v38, %v5659_v61  ;;  %v5668_v59 = vadd.f32 %v5667_v56, %v5666_v1  ;;  %v7755_v6 = vld [vmem:[%s8556_s6 + $0x140] sm:$0xff]  }
 0x1d0   : > { %6101 = vmatprep.subr.bf16.mxu0 %v7755_v6 }
 0x1d1   : > { %v5527_v32 = vpop.f32.mrb[104].mxu1  ;;  %v7749_v62 = vadd.f32 %v6318_v43, %v5662_v10 }
 0x1d2   : > { %v5528_v40 = vpop.f32.mrb[105].mxu1 }
 0x1d3   : > { %v5529_v13 = vadd.f32 %v5528_v40, %v5527_v32  ;;  %v5530_v41 = vpop.f32.mrb[106].mxu1  ;;  %v5669_v16 = vpop.f32.mrb[100].mxu0 }
 0x1d4   : > { %v5531_v0 = vpop.f32.mrb[107].mxu1  ;;  %v5670_v30 = vpop.f32.mrb[101].mxu0 }
 0x1d5   : > { %v6309_v51 = vadd.f32 %v5529_v13, %v7470_v25  ;;  %v5532_v44 = vadd.f32 %v5531_v0, %v5530_v41  ;;  %v5671_v17 = vadd.f32 %v5670_v30, %v5669_v16  ;;  %v5672_v61 = vpop.f32.mrb[102].mxu0  ;;  %v7778_v30 = vld [vmem:[%s8555_s5] ss:$0 sm:$0xff] }
 0x1d6   : > { %v5673_v54 = vpop.f32.mrb[103].mxu0 }
 0x1d7   : > { %v6315_v21 = vadd.f32 %v5532_v44, %v7475_v57  ;;  %v7759_v2 = vadd.f32 %v6309_v51, %v5665_v48  ;;  %v5674_v11 = vadd.f32 %v5673_v54, %v5672_v61 }
 0x1d9   : > { %v5533_v52 = vpop.f32.mrb[108].mxu1  ;;  %v7761_v8 = vadd.f32 %v6315_v21, %v5668_v59 }
 0x1da   : > { %v5534_v25 = vpop.f32.mrb[109].mxu1 }
 0x1db   : > { %v5535_v14 = vadd.f32 %v5534_v25, %v5533_v52  ;;  %v5536_v45 = vpop.f32.mrb[110].mxu1  ;;  %v5675_v3 = vpop.f32.mrb[104].mxu0 }
 0x1dc   : > { %v5537_v10 = vpop.f32.mrb[111].mxu1  ;;  %v5676_v37 = vpop.f32.mrb[105].mxu0 }
 0x1dd   : > { %v6324_v9 = vadd.f32 %v5535_v14, %v7485_v15  ;;  %v5538_v57 = vadd.f32 %v5537_v10, %v5536_v45  ;;  %v5677_v32 = vadd.f32 %v5676_v37, %v5675_v3  ;;  %v5678_v48 = vpop.f32.mrb[106].mxu0 }
 0x1de   : > { %v5679_v56 = vpop.f32.mrb[107].mxu0 }
 0x1df   : > { %v6330_v38 = vadd.f32 %v5538_v57, %v7492_v29  ;;  %v7765_v43 = vadd.f32 %v6324_v9, %v5671_v17  ;;  %v5680_v59 = vadd.f32 %v5679_v56, %v5678_v48 }
 0x1e1   : > { %v5539_v19 = vpop.f32.mrb[112].mxu1  ;;  %v7767_v1 = vadd.f32 %v6330_v38, %v5674_v11 }
 0x1e2   : > { %v5540_v40 = vpop.f32.mrb[113].mxu1 }
 0x1e3   : > { %v5541_v13 = vadd.f32 %v5540_v40, %v5539_v19  ;;  %v5542_v41 = vpop.f32.mrb[114].mxu1 }
 0x1e4   : > { %v5543_v0 = vpop.f32.mrb[115].mxu1 }
 0x1e5   : > { %v6321_v15 = vadd.f32 %v5541_v13, %v7501_v23  ;;  %v5544_v51 = vadd.f32 %v5543_v0, %v5542_v41 }
 0x1e7   : > { %v6327_v29 = vadd.f32 %v5544_v51, %v7508_v28  ;;  %v7771_v44 = vadd.f32 %v6321_v15, %v5677_v32 }
 0x1e9   : > { %v7773_v21 = vadd.f32 %v6327_v29, %v5680_v59 }
 0x229   : > { %v6071_v16 = vpop.f32.mrb[20].mxu1 }
 0x22a   : > { %v6239_v52 = vadd.f32 %v7644_v35, %v6071_v16  ;;  %v2482_v17 = vpop.f32.mrb[21].mxu1 }
 0x22b   : > { %v6242_v61 = vadd.f32 %v7618_v4, %v2482_v17  ;;  %v6072_v25 = vpop.f32.mrb[22].mxu1 }
 0x22c   : > { %v2682_v23 = vmul.f32 %v6239_v52, %v7778_v30  ;;  %v6245_v28 = vadd.f32 %v7646_v63, %v6072_v25  ;;  %v2485_v54 = vpop.f32.mrb[23].mxu1  ;;  %vm2643_vm5 = vcmp.gt.f32.partialorder %v6239_v52, 0.0 }
 0x22d   : > { %v2680_v14 = vmul.f32 %v6242_v61, %v7778_v30  ;;  %v6248_v45 = vadd.f32 %v7629_v47, %v2485_v54  ;;  %vm2641_vm6 = vcmp.gt.f32.partialorder %v6242_v61, 0.0 }
 0x22e   : > { %vm2644_vm7 = vcmp.gt.f32.partialorder %v6245_v28, 0.0  ;;  %v2683_v11 = vmul.f32 %v6245_v28, %v7778_v30  ;;  %v2714_v10 = vsel %vm2643_vm5, %v6239_v52, %v2682_v23 }
 0x22f   : > { %vm2642_vm8 = vcmp.gt.f32.partialorder %v6248_v45, 0.0  ;;  %v2681_v35 = vmul.f32 %v6248_v45, %v7778_v30  ;;  %v2712_v9 = vsel %vm2641_vm6, %v6242_v61, %v2680_v14 }
 0x230   : > { %v2715_v4 = vsel %vm2644_vm7, %v6245_v28, %v2683_v11 }
 0x231   : > { %v2745_v57 = vpack.c.bf16 %v2715_v4, %v2714_v10  ;;  %v2713_v38 = vsel %vm2642_vm8, %v6248_v45, %v2681_v35  ;;  %v6075_v3 = vpop.f32.mrb[24].mxu1 }
 0x232   : > { %v2744_v63 = vpack.c.bf16 %v2713_v38, %v2712_v9  ;;  %v6251_v37 = vadd.f32 %v7660_v27, %v6075_v3  ;;  %v2498_v19 = vpop.f32.mrb[25].mxu1 }
 0x233   : > { %v2768_v32 = vshrl.u32 %v2745_v57, 16  ;;  %v6254_v47 = vadd.f32 %v7652_v18, %v2498_v19  ;;  %v6076_v48 = vpop.f32.mrb[26].mxu1  ;;  %v2771_v40 = vshll.u32 %v2745_v57, 16 }
 0x234   : > { %v2761_v56 = vshrl.u32 %v2744_v63, 16  ;;  %v2501_v13 = vpop.f32.mrb[27].mxu1  ;;  %v2764_v59 = vshll.u32 %v2744_v63, 16  ;;  %v2686_v0 = vmul.f32 %v6251_v37, %v7778_v30  ;;  %v6257_v15 = vadd.f32 %v7662_v26, %v6076_v48 }
 0x235   : > { %v2770_v41 = vrot.slane %v2768_v32, 7  ;;  %vm2647_vm9 = vcmp.gt.f32.partialorder %v6251_v37, 0.0  ;;  %v2684_v29 = vmul.f32 %v6254_v47, %v7778_v30  ;;  %v6260_v27 = vadd.f32 %v7654_v5, %v2501_v13 }
 0x236   : > { %v2763_v51 = vrot.slane %v2761_v56, 7  ;;  %vm2645_vm10 = vcmp.gt.f32.partialorder %v6254_v47, 0.0  ;;  %vm2648_vm11 = vcmp.gt.f32.partialorder %v6257_v15, 0.0  ;;  %v2687_v18 = vmul.f32 %v6257_v15, %v7778_v30 }
 0x237   : > { %v2773_v16 = vor.u32 %v2771_v40, %v2770_v41  ;;  %vm2646_vm12 = vcmp.gt.f32.partialorder %v6260_v27, 0.0  ;;  %v2685_v17 = vmul.f32 %v6260_v27, %v7778_v30  ;;  %v2718_v26 = vsel %vm2647_vm9, %v6251_v37, %v2686_v0 }
 0x238   : > { %v2766_v52 = vor.u32 %v2764_v59, %v2763_v51  ;;  %v2719_v23 = vsel %vm2648_vm11, %v6257_v15, %v2687_v18  ;;  %v7802_v54 = vsel %vm6807_vm3, %v2770_v41, 0  ;;  %v2716_v5 = vsel %vm2645_vm10, %v6254_v47, %v2684_v29 }
 0x239   : > { %v7798_v25 = vsel %vm6807_vm3, 0, %v2773_v16  ;;  %v6079_v28 = vpop.f32.mrb[28].mxu1  ;;  %v2747_v14 = vpack.c.bf16 %v2719_v23, %v2718_v26  ;;  %v2717_v45 = vsel %vm2646_vm12, %v6260_v27, %v2685_v17  ;;  %v2956_v19 = vshll.u32 %v7802_v54, 16 }
 0x23a   : > { %v6263_v11 = vadd.f32 %v7674_v34, %v6079_v28  ;;  %v2514_v35 = vpop.f32.mrb[29].mxu1  ;;  %v2746_v10 = vpack.c.bf16 %v2717_v45, %v2716_v5  ;;  %v2951_v57 = vshll.u32 %v7798_v25, 16  ;;  %v7809_v38 = vsel %vm6807_vm3, 0, %v2766_v52 }
 0x23b   : > { %v6266_v4 = vadd.f32 %v7668_v31, %v2514_v35  ;;  %v6080_v9 = vpop.f32.mrb[30].mxu1  ;;  %v2782_v3 = vshrl.u32 %v2747_v14, 16  ;;  %v2949_v37 = vshrl.u32 %v7798_v25, 16  ;;  %v2785_v32 = vshll.u32 %v2747_v14, 16 }
 0x23c   : > { %v2517_v63 = vpop.f32.mrb[31].mxu1  ;;  %v2775_v47 = vshrl.u32 %v2746_v10, 16  ;;  %vm2651_vm13 = vcmp.gt.f32.partialorder %v6263_v11, 0.0  ;;  %v2690_v34 = vmul.f32 %v6263_v11, %v7778_v30  ;;  %v2778_v31 = vshll.u32 %v2746_v10, 16 }
 0x23d   : > { %v2784_v48 = vrot.slane %v2782_v3, 7  ;;  %v6269_v40 = vadd.f32 %v7676_v50, %v6080_v9  ;;  %v6272_v56 = vadd.f32 %v7670_v53, %v2517_v63  ;;  %vm2649_vm14 = vcmp.gt.f32.partialorder %v6266_v4, 0.0 }
 0x23e   : > { %v7816_v13 = vrot.slane %v2775_v47, 7  ;;  %v2688_v41 = vmul.f32 %v6266_v4, %v7778_v30  ;;  %v2953_v59 = vrot.slane %v2951_v57, 1  ;;  %v2722_v29 = vsel %vm2651_vm13, %v6263_v11, %v2690_v34 }
 0x23f   : > { %v2787_v0 = vor.u32 %v2785_v32, %v2784_v48  ;;  %vm2652_vm15 = vcmp.gt.f32.partialorder %v6269_v40, 0.0  ;;  %v2691_v15 = vmul.f32 %v6269_v40, %v7778_v30  ;;  %vm2650_vm1 = vcmp.gt.f32.partialorder %v6272_v56, 0.0 }
 0x240   : > { %v2689_v27 = vmul.f32 %v6272_v56, %v7778_v30  ;;  %v2954_v18 = vor.u32 %v2953_v59, %v2949_v37  ;;  %v2958_v52 = vrot.slane %v2956_v19, 1  ;;  %v2780_v50 = vor.u32 %v2778_v31, %v7816_v13 }
 0x241   : > { %v6083_v16 = vpop.f32.mrb[32].mxu1  ;;  %v2723_v53 = vsel %vm2652_vm15, %v6269_v40, %v2691_v15  ;;  %v7825_v23 = vsel %vm6807_vm3, %v2763_v51, 0  ;;  %v2720_v28 = vsel %vm2649_vm14, %v6266_v4, %v2688_v41  ;;  %v7833_v35 = vsel %vm6807_vm3, 0, %v2787_v0 }
 0x242   : > { %v6275_v17 = vadd.f32 %v7686_v24, %v6083_v16  ;;  %v2530_v26 = vpop.f32.mrb[33].mxu1  ;;  %v2749_v5 = vpack.c.bf16 %v2723_v53, %v2722_v29  ;;  %v2721_v14 = vsel %vm2650_vm1, %v6272_v56, %v2689_v27  ;;  %v7829_v45 = vsel %vm746_vm2, %v2954_v18, %v2958_v52 }
 0x243   : > { %v6084_v11 = vpop.f32.mrb[34].mxu1  ;;  %v2748_v10 = vpack.c.bf16 %v2721_v14, %v2720_v28  ;;  %3859 = vmatprep.mubr.bf16.mxu1 %v7829_v45  ;;  %v6278_v24 = vadd.f32 %v7680_v22, %v2530_v26  ;;  %v2937_v51 = vshrl.u32 %v7809_v38, 16  ;;  %v2939_v3 = vshll.u32 %v7809_v38, 16 }
 0x244   : > { %v2533_v9 = vpop.f32.mrb[35].mxu1  ;;  %v2796_v57 = vshrl.u32 %v2749_v5, 16  ;;  %v2694_v4 = vmul.f32 %v6275_v17, %v7778_v30  ;;  %v2944_v63 = vshll.u32 %v7825_v23, 16  ;;  %3860 = vmatmul.mubr.bf16.gmra.mrb[120].mxu1 %v7798_v25  ;;  %v7844_v37 = vsel %vm6807_vm3, 0, %v2780_v50 }
 0x245   : > { %v2799_v19 = vshll.u32 %v2749_v5, 16  ;;  %v2789_v32 = vshrl.u32 %v2748_v10, 16  ;;  %vm2655_vm5 = vcmp.gt.f32.partialorder %v6275_v17, 0.0  ;;  %v2792_v47 = vshll.u32 %v2748_v10, 16 }
 0x246   : > { %v7846_v22 = vrot.slane %v2796_v57, 7  ;;  %v2692_v34 = vmul.f32 %v6278_v24, %v7778_v30  ;;  %v2941_v31 = vrot.slane %v2939_v3, 1  ;;  %vm2653_vm6 = vcmp.gt.f32.partialorder %v6278_v24, 0.0 }
 0x247   : > { %v7849_v40 = vrot.slane %v2789_v32, 7  ;;  %v6281_v56 = vadd.f32 %v7694_v55, %v6084_v11  ;;  %v6284_v41 = vadd.f32 %v7682_v36, %v2533_v9  ;;  %v2726_v59 = vsel %vm2655_vm5, %v6275_v17, %v2694_v4  ;;  %v6592_v32 = vld [vmem:[%s8556_s6 + $0x150] sm:$0xff]  }
 0x248   : > { %v2942_v0 = vor.u32 %v2941_v31, %v2937_v51  ;;  %v2946_v15 = vrot.slane %v2944_v63, 1  ;;  %v7855_v27 = vsel %vm6807_vm3, %v2784_v48, 0  ;;  %v2801_v16 = vor.u32 %v2799_v19, %v7846_v22  ;;  %v6591_v48 = vld [vmem:[%s8556_s6 + $0x148] sm:$0xff]  }
 0x249   : > { %v6087_v29 = vpop.f32.mrb[36].mxu1  ;;  %vm2656_vm7 = vcmp.gt.f32.partialorder %v6281_v56, 0.0  ;;  %v2695_v18 = vmul.f32 %v6281_v56, %v7778_v30  ;;  %vm2654_vm8 = vcmp.gt.f32.partialorder %v6284_v41, 0.0  ;;  %v2724_v50 = vsel %vm2653_vm6, %v6278_v24, %v2692_v34 }
 0x24a   : > { %v2546_v52 = vpop.f32.mrb[37].mxu1  ;;  %v2947_v55 = vsel %vm746_vm2, %v2942_v0, %v2946_v15  ;;  %v2693_v36 = vmul.f32 %v6284_v41, %v7778_v30  ;;  %v6287_v53 = vadd.f32 %v7722_v49, %v6087_v29  ;;  %v2794_v26 = vor.u32 %v2792_v47, %v7849_v40 }
 0x24b   : > { %v6088_v17 = vpop.f32.mrb[38].mxu1  ;;  %3513 = vmatprep.mubr.bf16.mxu0 %v2947_v55  ;;  %v2727_v28 = vsel %vm2656_vm7, %v6281_v56, %v2695_v18  ;;  %v2975_v5 = vshll.u32 %v7833_v35, 16  ;;  %v2980_v14 = vshll.u32 %v7855_v27, 16  ;;  %v2973_v51 = vshrl.u32 %v7833_v35, 16 }
 0x24c   : > { %v2549_v11 = vpop.f32.mrb[39].mxu1  ;;  %v2751_v10 = vpack.c.bf16 %v2727_v28, %v2726_v59  ;;  %3514 = vmatmul.mubr.bf16.vlgmr.msra.gmra.mrb[108].mxu0 %v7809_v38  ;;  %v2725_v24 = vsel %vm2654_vm8, %v6284_v41, %v2693_v36  ;;  %v2698_v49 = vmul.f32 %v6287_v53, %v7778_v30  ;;  %vm2659_vm9 = vcmp.gt.f32.partialorder %v6287_v53, 0.0 }
 0x24d   : > { %v2750_v9 = vpack.c.bf16 %v2725_v24, %v2724_v50  ;;  %6102 = vmatpush3.bf16.msra.mxu0 %v7755_v6  ;;  %v2977_v57 = vrot.slane %v2975_v5, 1  ;;  %v6290_v4 = vadd.f32 %v7704_v58, %v2546_v52  ;;  %v7876_v3 = vsel %vm6807_vm3, 0, %v2801_v16 }
 0x24e   : > { %v2810_v63 = vshrl.u32 %v2751_v10, 16  ;;  %v7881_v19 = vsel %vm6807_vm3, %v7816_v13, 0  ;;  %6103 = vmatprep.subr.bf16.mxu0 %v6591_v48  ;;  %v7888_v6 = vsel %vm6807_vm3, 0, %v2794_v26  ;;  %v2982_v34 = vrot.slane %v2980_v14, 1 }
 0x24f   : > { %v2803_v58 = vshrl.u32 %v2750_v9, 16  ;;  %v2978_v47 = vor.u32 %v2977_v57, %v2973_v51  ;;  %v2813_v56 = vshll.u32 %v2751_v10, 16  ;;  %v2730_v41 = vsel %vm2659_vm9, %v6287_v53, %v2698_v49  ;;  %v6593_v53 = vld [vmem:[%s8556_s6 + $0x158] sm:$0xff]  }
 0x250   : > { %v7890_v31 = vrot.slane %v2810_v63, 7  ;;  %v2963_v59 = vshll.u32 %v7844_v37, 16  ;;  %v2696_v29 = vmul.f32 %v6290_v4, %v7778_v30  ;;  %v2968_v16 = vshll.u32 %v7881_v19, 16 }
 0x251   : > { %v6091_v13 = vpop.f32.mrb[40].mxu1  ;;  %v7893_v0 = vrot.slane %v2803_v58, 7  ;;  %v7896_v15 = vsel %vm746_vm2, %v2978_v47, %v2982_v34  ;;  %6104 = vmatpush3.bf16.msra.mxu0 %v6591_v48  ;;  %vm2657_vm10 = vcmp.gt.f32.partialorder %v6290_v4, 0.0  ;;  %v2961_v52 = vshrl.u32 %v7844_v37, 16 }
 0x252   : > { %v2562_v18 = vpop.f32.mrb[41].mxu1  ;;  %3867 = vmatprep.mubr.bf16.mxu1 %v7896_v15  ;;  %v2965_v50 = vrot.slane %v2963_v59, 1  ;;  %v6293_v55 = vadd.f32 %v7724_v46, %v6088_v17  ;;  %6105 = vmatprep.subr.bf16.mxu0 %v6592_v32  ;;  %v2815_v26 = vor.u32 %v2813_v56, %v7890_v31  ;;  %v2806_v28 = vshll.u32 %v2750_v9, 16 }
 0x253   : > { %v6092_v36 = vpop.f32.mrb[42].mxu1  ;;  %3868 = vmatmul.mubr.bf16.gmra.mrb[124].mxu1 %v7833_v35  ;;  %v6296_v48 = vadd.f32 %v7709_v33, %v2549_v11  ;;  %v6299_v5 = vadd.f32 %v7741_v7, %v6091_v13  ;;  %v2970_v24 = vrot.slane %v2968_v16, 1  ;;  %v2728_v49 = vsel %vm2657_vm10, %v6290_v4, %v2696_v29  ;;  %v6594_v11 = vld [vmem:[%s8556_s6 + $0x160] sm:$0xff]  }
 0x254   : > { %v2565_v14 = vpop.f32.mrb[43].mxu1  ;;  %v2966_v10 = vor.u32 %v2965_v50, %v2961_v52  ;;  %vm2660_vm11 = vcmp.gt.f32.partialorder %v6293_v55, 0.0  ;;  %v2699_v46 = vmul.f32 %v6293_v55, %v7778_v30  ;;  %v2808_v17 = vor.u32 %v2806_v28, %v7893_v0 }
 0x255   : > { %vm2658_vm12 = vcmp.gt.f32.partialorder %v6296_v48, 0.0  ;;  %v2697_v51 = vmul.f32 %v6296_v48, %v7778_v30  ;;  %6106 = vmatpush3.bf16.msra.mxu0 %v6592_v32  ;;  %v2702_v33 = vmul.f32 %v6299_v5, %v7778_v30  ;;  %v7919_v7 = vsel %vm6807_vm3, %v7846_v22, 0 }
 0x256   : > { %v2971_v9 = vsel %vm746_vm2, %v2966_v10, %v2970_v24  ;;  %v2731_v57 = vsel %vm2660_vm11, %v6293_v55, %v2699_v46  ;;  %6107 = vmatprep.subr.bf16.mxu0 %v6593_v53  ;;  %vm2663_vm13 = vcmp.gt.f32.partialorder %v6299_v5, 0.0  ;;  %v2999_v32 = vshll.u32 %v7876_v3, 16 }
 0x257   : > { %3521 = vmatprep.mubr.bf16.mxu0 %v2971_v9  ;;  %v2753_v4 = vpack.c.bf16 %v2731_v57, %v2730_v41  ;;  %v2729_v63 = vsel %vm2658_vm12, %v6296_v48, %v2697_v51  ;;  %v7927_v58 = vsel %vm6807_vm3, 0, %v2815_v26  ;;  %v3004_v22 = vshll.u32 %v7919_v7, 16  ;;  %v6595_v26 = vld [vmem:[%s8556_s6 + $0x168] sm:$0xff]  }
 0x258   : > { %3522 = vmatmul.mubr.bf16.gmra.mrb[112].mxu0 %v7844_v37  ;;  %v2752_v47 = vpack.c.bf16 %v2729_v63, %v2728_v49  ;;  %v6302_v34 = vadd.f32 %v7735_v20, %v2562_v18  ;;  %v2997_v13 = vshrl.u32 %v7876_v3, 16  ;;  %v3001_v41 = vrot.slane %v2999_v32, 1 }
 0x259   : > { %v6095_v56 = vpop.f32.mrb[44].mxu1  ;;  %v2824_v59 = vshrl.u32 %v2753_v4, 16  ;;  %v7936_v29 = vsel %vm6807_vm3, %v7849_v40, 0  ;;  %6108 = vmatpush3.bf16.msra.mxu0 %v6593_v53  ;;  %v7940_v52 = vsel %vm6807_vm3, 0, %v2808_v17  ;;  %v2827_v50 = vshll.u32 %v2753_v4, 16 }
 0x25a   : > { %v2578_v16 = vpop.f32.mrb[45].mxu1  ;;  %v2817_v55 = vshrl.u32 %v2752_v47, 16  ;;  %v2734_v20 = vsel %vm2663_vm13, %v6299_v5, %v2702_v33  ;;  %6109 = vmatprep.subr.bf16.mxu0 %v6594_v11  ;;  %v3002_v40 = vor.u32 %v3001_v41, %v2997_v13  ;;  %v3006_v48 = vrot.slane %v3004_v22, 1 }
 0x25b   : > { %v7943_v18 = vpop.f32.mrb[46].mxu1  ;;  %v7948_v28 = vrot.slane %v2824_v59, 7  ;;  %v2700_v53 = vmul.f32 %v6302_v34, %v7778_v30  ;;  %vm2661_vm14 = vcmp.gt.f32.partialorder %v6302_v34, 0.0  ;;  %v2987_v24 = vshll.u32 %v7888_v6, 16 }
 0x25c   : > { %v7951_v10 = vpop.f32.mrb[47].mxu1  ;;  %v2992_v5 = vshll.u32 %v7936_v29, 16  ;;  %v6305_v46 = vadd.f32 %v7743_v39, %v6092_v36  ;;  %v7956_v17 = vrot.slane %v2817_v55, 7  ;;  %v2820_v49 = vshll.u32 %v2752_v47, 16  ;;  %v6596_v39 = vld [vmem:[%s8556_s6 + $0x170] sm:$0xff]  }
 0x25d   : > { %v7959_v51 = vsel %vm746_vm2, %v3002_v40, %v3006_v48  ;;  %v6308_v9 = vadd.f32 %v7737_v60, %v2565_v14  ;;  %6110 = vmatpush3.bf16.msra.mxu0 %v6594_v11  ;;  %v2829_v57 = vor.u32 %v2827_v50, %v7948_v28  ;;  %v2985_v33 = vshrl.u32 %v7888_v6, 16  ;;  %v6597_v48 = vld [vmem:[%s8556_s6 + $0x178] sm:$0xff]  }
 0x25e   : > { %3875 = vmatprep.mubr.bf16.mxu1 %v7959_v51  ;;  %v2989_v4 = vrot.slane %v2987_v24, 1  ;;  %vm2664_vm15 = vcmp.gt.f32.partialorder %v6305_v46, 0.0  ;;  %6111 = vmatprep.subr.bf16.mxu0 %v6595_v26  ;;  %v2732_v36 = vsel %vm2661_vm14, %v6302_v34, %v2700_v53  ;;  %v2703_v60 = vmul.f32 %v6305_v46, %v7778_v30 }
 0x25f   : > { %3876 = vmatmul.mubr.bf16.gmra.mrb[128].mxu1 %v7876_v3  ;;  %vm2662_vm1 = vcmp.gt.f32.partialorder %v6308_v9, 0.0  ;;  %v2701_v14 = vmul.f32 %v6308_v9, %v7778_v30  ;;  %v2994_v63 = vrot.slane %v2992_v5, 1  ;;  %v6311_v32 = vadd.f32 %v7759_v2, %v6095_v56 }
 0x260   : > { %v2990_v11 = vor.u32 %v2989_v4, %v2985_v33  ;;  %v7976_v47 = vsel %vm6807_vm3, %v7890_v31, 0  ;;  %v2822_v59 = vor.u32 %v2820_v49, %v7956_v17  ;;  %v2735_v34 = vsel %vm2664_vm15, %v6305_v46, %v2703_v60 }
 0x261   : > { %v6099_v22 = vpop.f32.mrb[48].mxu1  ;;  %v2733_v13 = vsel %vm2662_vm1, %v6308_v9, %v2701_v14  ;;  %v3023_v41 = vshll.u32 %v7927_v58, 16  ;;  %6112 = vmatpush3.bf16.msra.mxu0 %v6595_v26  ;;  %v7984_v55 = vsel %vm6807_vm3, 0, %v2829_v57  ;;  %v2755_v56 = vpack.c.bf16 %v2735_v34, %v2734_v20 }
 0x262   : > { %v7980_v50 = vpop.f32.mrb[49].mxu1  ;;  %v2995_v2 = vsel %vm746_vm2, %v2990_v11, %v2994_v63  ;;  %v2754_v40 = vpack.c.bf16 %v2733_v13, %v2732_v36  ;;  %6113 = vmatprep.subr.bf16.mxu0 %v6596_v39  ;;  %v3021_v53 = vshrl.u32 %v7927_v58, 16  ;;  %v3028_v26 = vshll.u32 %v7976_v47, 16  ;;  %v8012_v11 = vld [vmem:[%s8556_s6 + $0x80] sm:$0xff]  }
 0x263   : > { %v7987_v31 = vpop.f32.mrb[50].mxu1  ;;  %3529 = vmatprep.mubr.bf16.mxu0 %v2995_v2  ;;  %v3025_v24 = vrot.slane %v3023_v41, 1  ;;  %v6314_v5 = vadd.f32 %v7747_v12, %v2578_v16  ;;  %v2838_v49 = vshrl.u32 %v2755_v56, 16  ;;  %vm2667_vm5 = vcmp.gt.f32.partialorder %v6311_v32, 0.0 }
 0x264   : > { %v7995_v46 = vpop.f32.mrb[51].mxu1  ;;  %3530 = vmatmul.mubr.bf16.gmra.mrb[116].mxu0 %v7888_v6  ;;  %v2831_v20 = vshrl.u32 %v2754_v40, 16  ;;  %v2706_v9 = vmul.f32 %v6311_v32, %v7778_v30  ;;  %v2841_v57 = vshll.u32 %v2755_v56, 16  ;;  %v2834_v33 = vshll.u32 %v2754_v40, 16 }
 0x265   : > { %v3026_v4 = vor.u32 %v3025_v24, %v3021_v53  ;;  %v3030_v36 = vrot.slane %v3028_v26, 1  ;;  %6114 = vmatpush3.bf16.msra.mxu0 %v6596_v39  ;;  %v7999_v60 = vrot.slane %v2838_v49, 7  ;;  %v2704_v12 = vmul.f32 %v6314_v5, %v7778_v30 }
 0x266   : > { %v8001_v14 = vrot.slane %v2831_v20, 7  ;;  %v8007_v16 = vsel %vm6807_vm3, %v7893_v0, 0  ;;  %6115 = vmatprep.subr.bf16.mxu0 %v6597_v48  ;;  %vm2665_vm6 = vcmp.gt.f32.partialorder %v6314_v5, 0.0  ;;  %v3011_v39 = vshll.u32 %v7940_v52, 16 }
 0x267   : > { %v8015_v63 = vsel %vm746_vm2, %v3026_v4, %v3030_v36  ;;  %v3016_v34 = vshll.u32 %v8007_v16, 16  ;;  %v8021_v13 = vsel %vm6807_vm3, 0, %v2822_v59  ;;  %v2843_v0 = vor.u32 %v2841_v57, %v7999_v60 }
 0x268   : > { %v2836_v41 = vor.u32 %v2834_v33, %v8001_v14  ;;  %3883 = vmatprep.mubr.bf16.mxu1 %v8015_v63  ;;  %v6317_v2 = vadd.f32 %v7761_v8, %v7943_v18  ;;  %v3009_v56 = vshrl.u32 %v7940_v52, 16  ;;  %v3013_v40 = vrot.slane %v3011_v39, 1 }
 0x269   : > { %3884 = vmatmul.mubr.bf16.gmra.mrb[132].mxu1 %v7927_v58  ;;  %v6320_v53 = vadd.f32 %v7749_v62, %v7951_v10  ;;  %v6323_v59 = vadd.f32 %v7771_v44, %v6099_v22  ;;  %6116 = vmatpush3.bf16.msra.mxu0 %v6597_v48  ;;  %v2738_v24 = vsel %vm2667_vm5, %v6311_v32, %v2706_v9  ;;  %v3018_v18 = vrot.slane %v3016_v34, 1  ;;  %v6625_v62 = vld [vmem:[%s8557_s7] sm:$0xff]  }
 0x26a   : > { %v2736_v26 = vsel %vm2665_vm6, %v6314_v5, %v2704_v12  ;;  %vm2668_vm7 = vcmp.gt.f32.partialorder %v6317_v2, 0.0  ;;  %v2707_v49 = vmul.f32 %v6317_v2, %v7778_v30  ;;  %6133 = vmatprep.subr.bf16.mxu0 %v8012_v11  ;;  %v3014_v8 = vor.u32 %v3013_v40, %v3009_v56  ;;  %6197 = vmatprep.subr.bf16.mxu1 %v6625_v62 }
 0x26b   : > { %vm2666_vm8 = vcmp.gt.f32.partialorder %v6320_v53, 0.0  ;;  %v2705_v20 = vmul.f32 %v6320_v53, %v7778_v30  ;;  %v8042_v44 = vsel %vm6807_vm3, 0, %v2843_v0  ;;  %v8046_v10 = vsel %vm6807_vm3, 0, %v2836_v41  ;;  %6198 = vmatpush3.bf16.msra.mxu1 %v6625_v62  ;;  %v6627_v62 = vld [vmem:[%s8557_s7 + $0x8] sm:$0xff]  }
 0x26c   : > { %v2739_v32 = vsel %vm2668_vm7, %v6317_v2, %v2707_v49  ;;  %v8051_v22 = vsel %vm6807_vm3, %v7948_v28, 0  ;;  %v3019_v48 = vsel %vm746_vm2, %v3014_v8, %v3018_v18  ;;  %v3047_v57 = vshll.u32 %v7984_v55, 16  ;;  %6199 = vmatprep.subr.bf16.mxu1 %v6627_v62 }
 0x26d   : > { %v2757_v5 = vpack.c.bf16 %v2739_v32, %v2738_v24  ;;  %v2737_v9 = vsel %vm2666_vm8, %v6320_v53, %v2705_v20  ;;  %3537 = vmatprep.mubr.bf16.mxu0 %v3019_v48  ;;  %v2710_v4 = vmul.f32 %v6323_v59, %v7778_v30  ;;  %v3052_v36 = vshll.u32 %v8051_v22, 16 }
 0x26e   : > { %v2756_v33 = vpack.c.bf16 %v2737_v9, %v2736_v26  ;;  %v6326_v12 = vadd.f32 %v7765_v43, %v7980_v50  ;;  %3538 = vmatmul.mubr.bf16.gmra.mrb[120].mxu0 %v7940_v52  ;;  %v3045_v28 = vshrl.u32 %v7984_v55, 16  ;;  %v3049_v34 = vrot.slane %v3047_v57, 1 }
 0x26f   : > { %v2852_v39 = vshrl.u32 %v2757_v5, 16  ;;  %v8064_v0 = vsel %vm6807_vm3, %v7956_v17, 0  ;;  %v2855_v41 = vshll.u32 %v2757_v5, 16  ;;  %vm2671_vm9 = vcmp.gt.f32.partialorder %v6323_v59, 0.0  ;;  %6200 = vmatpush3.bf16.msra.mxu1 %v6627_v62 }
 0x270   : > { %v2845_v2 = vshrl.u32 %v2756_v33, 16  ;;  %v3054_v56 = vrot.slane %v3052_v36, 1  ;;  %v3050_v53 = vor.u32 %v3049_v34, %v3045_v28  ;;  %vm2669_vm10 = vcmp.gt.f32.partialorder %v6326_v12, 0.0 }
 0x271   : > { %v2854_v40 = vrot.slane %v2852_v39, 7  ;;  %v2708_v43 = vmul.f32 %v6326_v12, %v7778_v30  ;;  %v3035_v24 = vshll.u32 %v8021_v13, 16  ;;  %v3040_v26 = vshll.u32 %v8064_v0, 16 }
 0x272   : > { %v2847_v50 = vrot.slane %v2845_v2, 7  ;;  %v6329_v49 = vadd.f32 %v7773_v21, %v7987_v31  ;;  %v2848_v8 = vshll.u32 %v2756_v33, 16  ;;  %v2742_v17 = vsel %vm2671_vm9, %v6323_v59, %v2710_v4 }
 0x273   : > { %v8072_v18 = vsel %vm746_vm2, %v3050_v53, %v3054_v56  ;;  %v6332_v20 = vadd.f32 %v7767_v1, %v7995_v46  ;;  %v2857_v32 = vor.u32 %v2855_v41, %v2854_v40  ;;  %v3033_v48 = vshrl.u32 %v8021_v13, 16 }
 0x274   : > { %3891 = vmatprep.mubr.bf16.mxu1 %v8072_v18  ;;  %v3037_v5 = vrot.slane %v3035_v24, 1  ;;  %vm2672_vm11 = vcmp.gt.f32.partialorder %v6329_v49, 0.0  ;;  %v2740_v21 = vsel %vm2669_vm10, %v6326_v12, %v2708_v43  ;;  %v2711_v31 = vmul.f32 %v6329_v49, %v7778_v30 }
 0x275   : > { %3892 = vmatmul.mubr.bf16.gmra.mrb[136].mxu1 %v7984_v55  ;;  %vm2670_vm12 = vcmp.gt.f32.partialorder %v6332_v20, 0.0  ;;  %v2709_v1 = vmul.f32 %v6332_v20, %v7778_v30  ;;  %v2850_v46 = vor.u32 %v2848_v8, %v2847_v50  ;;  %v3042_v9 = vrot.slane %v3040_v26, 1 }
 0x276   : > { %v3038_v59 = vor.u32 %v3037_v5, %v3033_v48  ;;  %v8088_v57 = vsel %vm6807_vm3, %v7999_v60, 0  ;;  %v2743_v33 = vsel %vm2672_vm11, %v6329_v49, %v2711_v31  ;;  %v3071_v36 = vshll.u32 %v8042_v44, 16 }
 0x277   : > { %v2741_v4 = vsel %vm2670_vm12, %v6332_v20, %v2709_v1  ;;  %v3076_v12 = vshll.u32 %v8088_v57, 16  ;;  %v8093_v28 = vpack.c.bf16 %v2743_v33, %v2742_v17  ;;  %v8098_v34 = vsel %vm6807_vm3, %v8001_v14, 0  ;;  %v6629_v17 = vld [vmem:[%s8557_s7 + $0x10] sm:$0xff]  }
 0x278   : > { %v3043_v39 = vsel %vm746_vm2, %v3038_v59, %v3042_v9  ;;  %v2758_v30 = vpack.c.bf16 %v2741_v4, %v2740_v21  ;;  %v8102_v60 = vsel %vm6807_vm3, 0, %v2857_v32  ;;  %v3069_v41 = vshrl.u32 %v8042_v44, 16  ;;  %6201 = vmatprep.subr.bf16.mxu1 %v6629_v17 }
 0x279   : > { %3545 = vmatprep.mubr.bf16.mxu0 %v3043_v39  ;;  %v3073_v2 = vrot.slane %v3071_v36, 1  ;;  %v3059_v56 = vshll.u32 %v8046_v10, 16  ;;  %v3078_v43 = vrot.slane %v3076_v12, 1  ;;  %v3057_v24 = vshrl.u32 %v8046_v10, 16  ;;  %6202 = vmatpush3.bf16.msra.mxu1 %v6629_v17 }
 0x27a   : > { %3546 = vmatmul.mubr.bf16.gmra.mrb[124].mxu0 %v8021_v13  ;;  %v2859_v53 = vshrl.u32 %v2758_v30, 16  ;;  %v3064_v14 = vshll.u32 %v8098_v34, 16  ;;  %v8111_v8 = vsel %vm6807_vm3, %v2854_v40, 0  ;;  %v8118_v20 = vsel %vm6807_vm3, 0, %v2850_v46 }
 0x27b   : > { %v3074_v26 = vor.u32 %v3073_v2, %v3069_v41  ;;  %v3061_v49 = vrot.slane %v3059_v56, 1  ;;  %v2862_v32 = vshll.u32 %v2758_v30, 16  ;;  %v3095_v48 = vshll.u32 %v8102_v60, 16 }
 0x27c   : > { %v2861_v62 = vrot.slane %v2859_v53, 7  ;;  %v3066_v31 = vrot.slane %v3064_v14, 1  ;;  %v3100_v40 = vshll.u32 %v8111_v8, 16  ;;  %v3093_v59 = vshrl.u32 %v8102_v60, 16 }
 0x27d   : > { %v8122_v5 = vsel %vm746_vm2, %v3074_v26, %v3078_v43  ;;  %v3062_v21 = vor.u32 %v3061_v49, %v3057_v24  ;;  %v3097_v9 = vrot.slane %v3095_v48, 1  ;;  %v8129_v46 = vsel %vm6807_vm3, %v2847_v50, 0 }
 0x27e   : > { %v2864_v1 = vor.u32 %v2862_v32, %v2861_v62  ;;  %3899 = vmatprep.mubr.bf16.mxu1 %v8122_v5  ;;  %v3083_v4 = vshll.u32 %v8118_v20, 16  ;;  %v3102_v39 = vrot.slane %v3100_v40, 1  ;;  %v3088_v30 = vshll.u32 %v8129_v46, 16 }
 0x27f   : > { %v3067_v33 = vsel %vm746_vm2, %v3062_v21, %v3066_v31  ;;  %3900 = vmatmul.mubr.bf16.gmra.mrb[140].mxu1 %v8042_v44  ;;  %v3098_v12 = vor.u32 %v3097_v9, %v3093_v59  ;;  %v3081_v41 = vshrl.u32 %v8118_v20, 16  ;;  %v8142_v2 = vsel %vm6807_vm3, %v2861_v62, 0 }
 0x280   : > { %v8136_v36 = vsel %vm6807_vm3, 0, %v2864_v1  ;;  %3553 = vmatprep.mubr.bf16.mxu0 %v3067_v33  ;;  %v3085_v50 = vrot.slane %v3083_v4, 1  ;;  %v3183_v53 = vrot.slane %v7881_v19, 1  ;;  %v3112_v26 = vshll.u32 %v8142_v2, 16  ;;  %v6631_v19 = vld [vmem:[%s8557_s7 + $0x18] sm:$0xff]   ;;  %v6635_v33 = vld [vmem:[%s8557_s7 + $0x28] sm:$0xff]  }
 0x281   : > { %v3107_v56 = vshll.u32 %v8136_v36, 16  ;;  %v8148_v43 = vsel %vm746_vm2, %v3098_v12, %v3102_v39  ;;  %v3105_v24 = vshrl.u32 %v8136_v36, 16  ;;  %v3090_v14 = vrot.slane %v3088_v30, 1  ;;  %6203 = vmatprep.subr.bf16.mxu1 %v6631_v19  ;;  %v6636_v4 = vld [vmem:[%s8557_s7 + $0x30] sm:$0xff]   ;;  %v6599_v12 = vld [vmem:[%s8556_s6 + $0x88] sm:$0xff]   ;;  %v6637_v30 = vld [vmem:[%s8557_s7 + $0x38] sm:$0xff]  }
 0x282   : > { %3554 = vmatmul.mubr.bf16.gmra.mrb[128].mxu0 %v8046_v10  ;;  %3907 = vmatprep.mubr.bf16.mxu1 %v8148_v43  ;;  %v3086_v49 = vor.u32 %v3085_v50, %v3081_v41  ;;  %v3182_v62 = vrot.slane %v7844_v37, 1  ;;  %v3114_v31 = vrot.slane %v3112_v26, 1  ;;  %v6633_v37 = vld [vmem:[%s8557_s7 + $0x20] sm:$0xff]   ;;  %v3176_v1 = vrot.slane %v7809_v38, 1  ;;  %v4548_v50 = vld [vmem:[%s421_s29 + $0x10] sm:$0xff] }
 0x283   : > { %v3109_v17 = vrot.slane %v3107_v56, 1  ;;  %6204 = vmatpush3.bf16.msra.mxu1 %v6631_v19  ;;  %v3177_v59 = vrot.slane %v7825_v23, 1  ;;  %v3188_v38 = vrot.slane %v7888_v6, 1  ;;  %v3189_v23 = vrot.slane %v7936_v29, 1  ;;  %v6600_v6 = vld [vmem:[%s8556_s6 + $0x90] sm:$0xff]   ;;  %v4546_v41 = vld [vmem:[%s421_s29] sm:$0xff] }
 0x284   : > { %v3091_v32 = vsel %vm746_vm2, %v3086_v49, %v3090_v14  ;;  %v3184_v21 = vsel %vm997_vm4, %v3182_v62, %v3183_v53  ;;  %6205 = vmatprep.subr.bf16.mxu1 %v6633_v37  ;;  %v3194_v29 = vrot.slane %v7940_v52, 1  ;;  %v3200_v56 = vrot.slane %v8021_v13, 1  ;;  %v6601_v52 = vld [vmem:[%s8556_s6 + $0x98] sm:$0xff]   ;;  %v4550_v62 = vld [vmem:[%s421_s29 + $0x20] sm:$0xff]  ;;  %v4551_v19 = vld [vmem:[%s421_s29 + $0x28] sm:$0xff] }
 0x285   : > { %v3110_v48 = vor.u32 %v3109_v17, %v3105_v24  ;;  %3561 = vmatprep.mubr.bf16.mxu0 %v3091_v32  ;;  %v3178_v9 = vsel %vm997_vm4, %v3176_v1, %v3177_v59  ;;  %v3190_v39 = vsel %vm997_vm4, %v3188_v38, %v3189_v23  ;;  %v4549_v24 = vld [vmem:[%s421_s29 + $0x18] sm:$0xff]  ;;  %v3195_v26 = vrot.slane %v8007_v16, 1  ;;  %v4552_v16 = vld [vmem:[%s421_s29 + $0x30] sm:$0xff]  ;;  %v6603_v38 = vld [vmem:[%s8556_s6 + $0xa8] sm:$0xff]  }
 0x286   : > { %v5294_v49 = vpack.c.bf16 %v4549_v24, %v4548_v50  ;;  %v3201_v14 = vrot.slane %v8064_v0, 1  ;;  %v6602_v0 = vld [vmem:[%s8556_s6 + $0xa0] sm:$0xff]   ;;  %v3186_v50 = vrot.slane %v7855_v27, 1  ;;  %v6610_v27 = vld [vmem:[%s8556_s6 + $0x1d0] sm:$0xff]   ;;  %v3191_v24 = vrot.slane %v7876_v3, 1 }
 0x287   : > { %3908 = vmatmul.mubr.bf16.gmra.mrb[144].mxu1 %v8102_v60  ;;  %v3115_v40 = vsel %vm746_vm2, %v3110_v48, %v3114_v31  ;;  %v3196_v17 = vsel %vm997_vm4, %v3194_v29, %v3195_v26  ;;  %v5295_v48 = vpack.c.bf16 %v4551_v19, %v4550_v62  ;;  %v6606_v29 = vld [vmem:[%s8556_s6 + $0x1c0] sm:$0xff]   ;;  %v3197_v26 = vrot.slane %v7927_v58, 1 }
 0x288   : > { %6206 = vmatpush3.bf16.msra.mxu1 %v6633_v37  ;;  %v3202_v13 = vsel %vm997_vm4, %v3200_v56, %v3201_v14  ;;  %v6611_v14 = vld [vmem:[%s8556_s6 + $0x190] sm:$0xff]   ;;  %v3203_v19 = vrot.slane %v7984_v55, 1 }
 0x289   : > { %6207 = vmatprep.subr.bf16.mxu1 %v6635_v33 }
 0x28a   : > { %3562 = vmatmul.mubr.bf16.gmra.mrb[132].mxu0 %v8118_v20  ;;  %v5801_v32 = vpop.f32.mrb[116].mxu1 }
 0x28b   : > { %3569 = vmatprep.mubr.bf16.mxu0 %v3115_v40  ;;  %v5802_v31 = vpop.f32.mrb[117].mxu1  ;;  %v3206_v40 = vrot.slane %v8046_v10, 1 }
 0x28c   : > { %6208 = vmatpush3.bf16.msra.mxu1 %v6635_v33  ;;  %v8207_v1 = vadd.f32 %v5802_v31, %v5801_v32  ;;  %v5804_v59 = vpop.f32.mrb[118].mxu1  ;;  %v3207_v33 = vrot.slane %v8098_v34, 1  ;;  %v6604_v34 = vld [vmem:[%s8556_s6 + $0xb0] sm:$0xff]   ;;  %v3204_v32 = vrot.slane %v8051_v22, 1  ;;  %v6617_v22 = vld [vmem:[%s8556_s6 + $0x1a8] sm:$0xff]  }
 0x28d   : > { %6209 = vmatprep.subr.bf16.mxu1 %v6636_v4 }
 0x28e   : > { %v3208_v23 = vsel %vm997_vm4, %v3206_v40, %v3207_v33  ;;  %v8291_v31 = vsel %vm997_vm4, %v3203_v19, %v3204_v32  ;;  %v6620_v33 = vld [vmem:[%s8556_s6 + $0x1f8] sm:$0xff]  }
 0x290   : > { %6210 = vmatpush3.bf16.msra.mxu1 %v6636_v4  ;;  %v3213_v4 = vrot.slane %v8129_v46, 1  ;;  %v3218_v46 = vrot.slane %v8136_v36, 1 }
 0x291   : > { %6211 = vmatprep.subr.bf16.mxu1 %v6637_v30 }
 0x292   : > { %3570 = vmatmul.mubr.bf16.gmra.mrb[136].mxu0 %v8136_v36  ;;  %v3179_v36 = vrot.slane %v7798_v25, 1 }
 0x293   : > { %6117 = vmatprep.mubr.bf16.mxu0 %v3178_v9  ;;  %v3212_v9 = vrot.slane %v8118_v20, 1 }
 0x294   : > { %6212 = vmatpush3.bf16.msra.mxu1 %v6637_v30  ;;  %v6605_v30 = vld [vmem:[%s8556_s6 + $0xb8] sm:$0xff]  }
 0x295   : > { %v3214_v10 = vsel %vm997_vm4, %v3212_v9, %v3213_v4  ;;  %v6619_v9 = vld [vmem:[%s8556_s6 + $0x1b0] sm:$0xff]  }
 0x29a   : > { %6118 = vmatmul.mubr.bf16.vlgmr.msra.gmra.mrb[140].mxu0 %v3184_v21  ;;  %v4553_v21 = vld [vmem:[%s421_s29 + $0x38] sm:$0xff] }
 0x29b   : > { %6121 = vmatprep.mubr.bf16.mxu0 %v3190_v39  ;;  %6134 = vmatpush3.bf16.msra.mxu0 %v8012_v11  ;;  %v4547_v11 = vld [vmem:[%s421_s29 + $0x8] sm:$0xff]  ;;  %v5296_v37 = vpack.c.bf16 %v4553_v21, %v4552_v16  ;;  %v3219_v39 = vrot.slane %v8142_v2, 1  ;;  %v3185_v2 = vrot.slane %v7833_v35, 1  ;;  %v3209_v16 = vrot.slane %v8042_v44, 1  ;;  %s439_s29 = scalar_lea.vmem %s8561_s11, %s4932_s24 }
 0x29c   : > { %6135 = vmatprep.subr.bf16.mxu0 %v6599_v12  ;;  %v5293_v53 = vpack.c.bf16 %v4547_v11, %v4546_v41  ;;  %v3180_v41 = vrot.slane %v7802_v54, 1  ;;  %v6607_v11 = vld [vmem:[%s8556_s6 + $0x180] sm:$0xff]   ;;  %v6609_v54 = vld [vmem:[%s8556_s6 + $0x188] sm:$0xff]  }
 0x29d   : > { %v6616_v21 = vld [vmem:[%s8556_s6 + $0x1e8] sm:$0xff]  }
 0x29e   : > { %6213 = vmatprep.mubr.bf16.mxu1 %v5293_v53  ;;  %v8243_v56 = vsel %vm997_vm4, %v3179_v36, %v3180_v41  ;;  %v8247_v53 = vsel %vm997_vm4, %v3185_v2, %v3186_v50 }
 0x29f   : > { %6136 = vmatpush3.bf16.msra.mxu0 %v6599_v12  ;;  %6214 = vmatmul.mubr.bf16.vlgmr.msra.gmra.mrb[148].mxu1 %v5294_v49  ;;  %v5805_v12 = vpop.f32.mrb[119].mxu1  ;;  %v3192_v49 = vrot.slane %v7919_v7, 1  ;;  %v6613_v7 = vld [vmem:[%s8556_s6 + $0x198] sm:$0xff]  }
 0x2a0   : > { %6137 = vmatprep.subr.bf16.mxu0 %v6600_v6  ;;  %6217 = vmatprep.mubr.bf16.mxu1 %v5295_v48  ;;  %v8217_v20 = vadd.f32 %v5805_v12, %v5804_v59  ;;  %v3210_v48 = vrot.slane %v8088_v57, 1  ;;  %v6618_v57 = vld [vmem:[%s8556_s6 + $0x1f0] sm:$0xff]   ;;  %v3216_v59 = vrot.slane %v8111_v8, 1  ;;  %v6621_v8 = vld [vmem:[%s8556_s6 + $0x1b8] sm:$0xff]  }
 0x2a1   : > { %v6634_v12 = vld [vmem:[%s8556_s6 + $0x238] sm:$0xff]  }
 0x2a2   : > { %6122 = vmatmul.mubr.bf16.gmra.mrb[144].mxu0 %v3196_v17  ;;  %v6612_v17 = vld [vmem:[%s8556_s6 + $0x1d8] sm:$0xff]   ;;  %v8295_v40 = vsel %vm997_vm4, %v3209_v16, %v3210_v48 }
 0x2a3   : > { %6125 = vmatprep.mubr.bf16.mxu0 %v3202_v13  ;;  %6138 = vmatpush3.bf16.msra.mxu0 %v6600_v6  ;;  %v3220_v6 = vsel %vm997_vm4, %v3218_v46, %v3219_v39  ;;  %v8267_v13 = vsel %vm997_vm4, %v3191_v24, %v3192_v49 }
 0x2a4   : > { %6139 = vmatprep.subr.bf16.mxu0 %v6601_v52 }
 0x2a7   : > { %6140 = vmatpush3.bf16.msra.mxu0 %v6601_v52  ;;  %6218 = vmatmul.mubr.bf16.gmra.mrb[152].mxu1 %v5296_v37  ;;  %v3198_v52 = vrot.slane %v7976_v47, 1  ;;  %v6614_v47 = vld [vmem:[%s8556_s6 + $0x1e0] sm:$0xff]   ;;  %v3215_v37 = vrot.slane %v8102_v60, 1 }
 0x2a8   : > { %6141 = vmatprep.subr.bf16.mxu0 %v6602_v0 }
 0x2a9   : > { %v8271_v62 = vsel %vm997_vm4, %v3197_v26, %v3198_v52  ;;  %v8313_v4 = vsel %vm997_vm4, %v3215_v37, %v3216_v59 }
 0x2aa   : > { %6126 = vmatmul.mubr.bf16.gmra.mrb[148].mxu0 %v3208_v23  ;;  %v6623_v23 = vld [vmem:[%s8556_s6 + $0x208] sm:$0xff]  }
 0x2ab   : > { %6129 = vmatprep.mubr.bf16.mxu0 %v3214_v10  ;;  %6142 = vmatpush3.bf16.msra.mxu0 %v6602_v0  ;;  %v6615_v0 = vld [vmem:[%s8556_s6 + $0x1a0] sm:$0xff]   ;;  %v6626_v10 = vld [vmem:[%s8556_s6 + $0x218] sm:$0xff]  }
 0x2ac   : > { %6143 = vmatprep.subr.bf16.mxu0 %v6603_v38 }
 0x2af   : > { %6144 = vmatpush3.bf16.msra.mxu0 %v6603_v38  ;;  %v6622_v38 = vld [vmem:[%s8556_s6 + $0x200] sm:$0xff]  }
 0x2b0   : > { %6145 = vmatprep.subr.bf16.mxu0 %v6604_v34 }
 0x2b2   : > { %6130 = vmatmul.mubr.bf16.gmra.mrb[152].mxu0 %v3220_v6 }
 0x2b3   : > { %6146 = vmatpush3.bf16.msra.mxu0 %v6604_v34  ;;  %6149 = vmatprep.mubr.bf16.mxu0 %v7269_v42  ;;  %v6608_v42 = vld [vmem:[%s8556_s6 + $0x1c8] sm:$0xff]  }
 0x2b4   : > { %6147 = vmatprep.subr.bf16.mxu0 %v6605_v30 }
 0x2b7   : > { %6148 = vmatpush3.bf16.msra.mxu0 %v6605_v30 }
 0x2b8   : > { %5865 = vmatprep.subr.bf16.mxu0 %v6606_v29 }
 0x2ba   : > { %6150 = vmatmul.mubr.bf16.vlgmr.msra.gmra.mrb[140].mxu0 %v8243_v56 }
 0x2bb   : > { %6153 = vmatprep.mubr.bf16.mxu0 %v8247_v53  ;;  %5866 = vmatpush3.bf16.msra.mxu0 %v6607_v11 }
 0x2bc   : > { %5867 = vmatprep.subr.bf16.mxu0 %v6608_v42 }
 0x2bf   : > { %5868 = vmatpush3.bf16.msra.mxu0 %v6609_v54 }
 0x2c0   : > { %5869 = vmatprep.subr.bf16.mxu0 %v6610_v27 }
 0x2c2   : > { %6154 = vmatmul.mubr.bf16.gmra.mrb[144].mxu0 %v8267_v13 }
 0x2c3   : > { %6157 = vmatprep.mubr.bf16.mxu0 %v8271_v62  ;;  %5870 = vmatpush3.bf16.msra.mxu0 %v6611_v14 }
 0x2c4   : > { %5871 = vmatprep.subr.bf16.mxu0 %v6612_v17 }
 0x2c7   : > { %5872 = vmatpush3.bf16.msra.mxu0 %v6613_v7 }
 0x2c8   : > { %5873 = vmatprep.subr.bf16.mxu0 %v6614_v47 }
 0x2ca   : > { %6158 = vmatmul.mubr.bf16.gmra.mrb[148].mxu0 %v8291_v31 }
 0x2cb   : > { %6161 = vmatprep.mubr.bf16.mxu0 %v8295_v40  ;;  %5874 = vmatpush3.bf16.msra.mxu0 %v6615_v0 }
 0x2cc   : > { %5875 = vmatprep.subr.bf16.mxu0 %v6616_v21 }
 0x2cf   : > { %5876 = vmatpush3.bf16.msra.mxu0 %v6617_v22 }
 0x2d0   : > { %5877 = vmatprep.subr.bf16.mxu0 %v6618_v57 }
 0x2d2   : > { %6162 = vmatmul.mubr.bf16.gmra.mrb[152].mxu0 %v8313_v4 }
 0x2d3   : > { %5878 = vmatpush3.bf16.msra.mxu0 %v6619_v9  ;;  %4238 = vmatprep.mubr.bf16.mxu0 %v7829_v45  ;;  %v6624_v45 = vld [vmem:[%s8556_s6 + $0x210] sm:$0xff]  }
 0x2d4   : > { %5879 = vmatprep.subr.bf16.mxu0 %v6620_v33 }
 0x2d7   : > { %5880 = vmatpush3.bf16.msra.mxu0 %v6621_v8 }
 0x2d8   : > { %6165 = vmatprep.subr.bf16.mxu0 %v6622_v38 }
 0x2da   : > { %4239 = vmatmul.mubr.bf16.vlgmr.msra.gmra.mrb[156].mxu0 %v7798_v25  ;;  %v6628_v25 = vld [vmem:[%s8556_s6 + $0x220] sm:$0xff]  }
 0x2db   : > { %4246 = vmatprep.mubr.bf16.mxu0 %v7896_v15  ;;  %6166 = vmatpush3.bf16.msra.mxu0 %v6622_v38  ;;  %v6630_v15 = vld [vmem:[%s8556_s6 + $0x228] sm:$0xff]  }
 0x2dc   : > { %6167 = vmatprep.subr.bf16.mxu0 %v6623_v23 }
 0x2df   : > { %6168 = vmatpush3.bf16.msra.mxu0 %v6623_v23 }
 0x2e0   : > { %6169 = vmatprep.subr.bf16.mxu0 %v6624_v45 }
 0x2e2   : > { %4247 = vmatmul.mubr.bf16.gmra.mrb[160].mxu0 %v7833_v35  ;;  %v6632_v35 = vld [vmem:[%s8556_s6 + $0x230] sm:$0xff]  }
 0x2e3   : > { %4254 = vmatprep.mubr.bf16.mxu0 %v7959_v51  ;;  %6170 = vmatpush3.bf16.msra.mxu0 %v6624_v45  ;;  %v2866_v51 = vshrl.u32 %v8093_v28, 16 }
 0x2e4   : > { %6171 = vmatprep.subr.bf16.mxu0 %v6626_v10 }
 0x2e5   : > { %v2868_v34 = vrot.slane %v2866_v51, 7 }
 0x2e7   : > { %6172 = vmatpush3.bf16.msra.mxu0 %v6626_v10 }
 0x2e8   : > { %6173 = vmatprep.subr.bf16.mxu0 %v6628_v25 }
 0x2ea   : > { %4255 = vmatmul.mubr.bf16.gmra.mrb[164].mxu0 %v7876_v3  ;;  %v2869_v3 = vshll.u32 %v8093_v28, 16 }
 0x2eb   : > { %4262 = vmatprep.mubr.bf16.mxu0 %v8015_v63  ;;  %6174 = vmatpush3.bf16.msra.mxu0 %v6628_v25 }
 0x2ec   : > { %6175 = vmatprep.subr.bf16.mxu0 %v6630_v15  ;;  %v2871_v63 = vor.u32 %v2869_v3, %v2868_v34 }
 0x2ee   : > { %v2919_v46 = vsel %vm6807_vm3, 0, %v2871_v63 }
 0x2ef   : > { %6176 = vmatpush3.bf16.msra.mxu0 %v6630_v15  ;;  %v3119_v39 = vshll.u32 %v2919_v46, 16  ;;  %v3117_v30 = vshrl.u32 %v2919_v46, 16 }
 0x2f0   : > { %6177 = vmatprep.subr.bf16.mxu0 %v6632_v35 }
 0x2f2   : > { %4263 = vmatmul.mubr.bf16.gmra.mrb[168].mxu0 %v7927_v58  ;;  %v2935_v58 = vsel %vm6807_vm3, %v2868_v34, 0 }
 0x2f3   : > { %4270 = vmatprep.mubr.bf16.mxu0 %v8072_v18  ;;  %6178 = vmatpush3.bf16.msra.mxu0 %v6632_v35  ;;  %v3121_v18 = vrot.slane %v3119_v39, 1  ;;  %v3124_v28 = vshll.u32 %v2935_v58, 16  ;;  %v3222_v19 = vrot.slane %v2935_v58, 1 }
 0x2f4   : > { %6179 = vmatprep.subr.bf16.mxu0 %v6634_v12 }
 0x2f5   : > { %v3122_v6 = vor.u32 %v3121_v18, %v3117_v30  ;;  %v3126_v29 = vrot.slane %v3124_v28, 1 }
 0x2f7   : > { %6180 = vmatpush3.bf16.msra.mxu0 %v6634_v12 }
 0x2fa   : > { %4271 = vmatmul.mubr.bf16.gmra.mrb[172].mxu0 %v7984_v55  ;;  %v3127_v55 = vsel %vm746_vm2, %v3122_v6, %v3126_v29 }
 0x2fb   : > { %4278 = vmatprep.mubr.bf16.mxu0 %v8122_v5 }
 0x302   : > { %4279 = vmatmul.mubr.bf16.gmra.mrb[176].mxu0 %v8042_v44 }
 0x303   : > { %4286 = vmatprep.mubr.bf16.mxu0 %v8148_v43 }
 0x30a   : > { %4287 = vmatmul.mubr.bf16.gmra.mrb[180].mxu0 %v8102_v60 }
 0x30b   : > { %4294 = vmatprep.mubr.bf16.mxu0 %v3127_v55 }
 0x312   : > { %4295 = vmatmul.mubr.bf16.gmra.mrb[184].mxu0 %v2919_v46 }
 0x313   : > { %6181 = vmatprep.mubr.bf16.mxu0 %v8243_v56 }
 0x317   : > { %v5807_v5 = vpop.f32.mrb[120].mxu1 }
 0x318   : > { %v5808_v61 = vpop.f32.mrb[121].mxu1 }
 0x319   : > { %v5809_v36 = vadd.f32 %v5808_v61, %v5807_v5  ;;  %v5810_v2 = vpop.f32.mrb[122].mxu1 }
 0x31a   : > { %6182 = vmatmul.mubr.bf16.vlgmr.msra.gmra.mrb[140].mxu0 %v8247_v53  ;;  %v5811_v44 = vpop.f32.mrb[123].mxu1 }
 0x31b   : > { %6185 = vmatprep.mubr.bf16.mxu0 %v8267_v13  ;;  %v5812_v43 = vadd.f32 %v5811_v44, %v5810_v2 }
 0x31f   : > { %v5721_v41 = vpop.f32.mrb[108].mxu0 }
 0x320   : > { %v5722_v11 = vpop.f32.mrb[109].mxu0 }
 0x321   : > { %v5723_v50 = vadd.f32 %v5722_v11, %v5721_v41  ;;  %v5724_v60 = vpop.f32.mrb[110].mxu0 }
 0x322   : > { %6186 = vmatmul.mubr.bf16.gmra.mrb[144].mxu0 %v8271_v62  ;;  %v5725_v42 = vpop.f32.mrb[111].mxu0  ;;  %v3221_v62 = vrot.slane %v2919_v46, 1 }
 0x323   : > { %6189 = vmatprep.mubr.bf16.mxu0 %v8291_v31  ;;  %v8370_v56 = vadd.f32 %v8207_v1, %v5723_v50  ;;  %v5726_v54 = vadd.f32 %v5725_v42, %v5724_v60 }
 0x324   : > { %v3223_v32 = vsel %vm997_vm4, %v3221_v62, %v3222_v19 }
 0x325   : > { %v8373_v27 = vadd.f32 %v8217_v20, %v5726_v54 }
 0x326   : > { %v5813_v53 = vpop.f32.mrb[124].mxu1 }
 0x327   : > { %v5814_v24 = vpop.f32.mrb[125].mxu1 }
 0x328   : > { %v5815_v26 = vadd.f32 %v5814_v24, %v5813_v53  ;;  %v5816_v49 = vpop.f32.mrb[126].mxu1 }
 0x329   : > { %v5817_v14 = vpop.f32.mrb[127].mxu1 }
 0x32a   : > { %6190 = vmatmul.mubr.bf16.gmra.mrb[148].mxu0 %v8295_v40  ;;  %v5818_v52 = vadd.f32 %v5817_v14, %v5816_v49 }
 0x32b   : > { %6193 = vmatprep.mubr.bf16.mxu0 %v8313_v4  ;;  %v5727_v17 = vpop.f32.mrb[112].mxu0 }
 0x32c   : > { %v5728_v13 = vpop.f32.mrb[113].mxu0 }
 0x32d   : > { %v5729_v7 = vadd.f32 %v5728_v13, %v5727_v17  ;;  %v5730_v1 = vpop.f32.mrb[114].mxu0 }
 0x32e   : > { %v5731_v47 = vpop.f32.mrb[115].mxu0 }
 0x32f   : > { %v8377_v16 = vadd.f32 %v5809_v36, %v5729_v7  ;;  %v5732_v20 = vadd.f32 %v5731_v47, %v5730_v1 }
 0x331   : > { %v8380_v0 = vadd.f32 %v5812_v43, %v5732_v20 }
 0x332   : > { %6194 = vmatmul.mubr.bf16.gmra.mrb[152].mxu0 %v3223_v32  ;;  %v5819_v48 = vpop.f32.mrb[128].mxu1 }
 0x333   : > { %v5820_v21 = vpop.f32.mrb[129].mxu1 }
 0x334   : > { %v5821_v31 = vadd.f32 %v5820_v21, %v5819_v48  ;;  %v5822_v40 = vpop.f32.mrb[130].mxu1 }
 0x335   : > { %v5823_v22 = vpop.f32.mrb[131].mxu1 }
 0x336   : > { %v5824_v57 = vadd.f32 %v5823_v22, %v5822_v40 }
 0x337   : > { %v5733_v37 = vpop.f32.mrb[116].mxu0 }
 0x338   : > { %v5734_v59 = vpop.f32.mrb[117].mxu0 }
 0x339   : > { %v5735_v9 = vadd.f32 %v5734_v59, %v5733_v37  ;;  %v5736_v33 = vpop.f32.mrb[118].mxu0 }
 0x33a   : > { %v5737_v4 = vpop.f32.mrb[119].mxu0 }
 0x33b   : > { %v8382_v8 = vadd.f32 %v5815_v26, %v5735_v9  ;;  %v5738_v38 = vadd.f32 %v5737_v4, %v5736_v33 }
 0x33c   : > { %v5825_v23 = vpop.f32.mrb[132].mxu1 }
 0x33d   : > { %v8384_v45 = vadd.f32 %v5818_v52, %v5738_v38  ;;  %v5826_v10 = vpop.f32.mrb[133].mxu1 }
 0x33e   : > { %v5827_v25 = vadd.f32 %v5826_v10, %v5825_v23  ;;  %v5828_v15 = vpop.f32.mrb[134].mxu1 }
 0x33f   : > { %v5829_v35 = vpop.f32.mrb[135].mxu1 }
 0x340   : > { %v5830_v51 = vadd.f32 %v5829_v35, %v5828_v15 }
 0x341   : > { %v5739_v12 = vpop.f32.mrb[120].mxu0 }
 0x342   : > { %v5740_v34 = vpop.f32.mrb[121].mxu0 }
 0x343   : > { %v5741_v3 = vadd.f32 %v5740_v34, %v5739_v12  ;;  %v5742_v63 = vpop.f32.mrb[122].mxu0 }
 0x344   : > { %v5743_v46 = vpop.f32.mrb[123].mxu0 }
 0x345   : > { %v8386_v39 = vadd.f32 %v5821_v31, %v5741_v3  ;;  %v5744_v58 = vadd.f32 %v5743_v46, %v5742_v63 }
 0x347   : > { %v8388_v18 = vadd.f32 %v5824_v57, %v5744_v58 }
 0x348   : > { %v5831_v30 = vpop.f32.mrb[136].mxu1 }
 0x349   : > { %v5832_v28 = vpop.f32.mrb[137].mxu1 }
 0x34a   : > { %v5833_v6 = vadd.f32 %v5832_v28, %v5831_v30  ;;  %v5834_v29 = vpop.f32.mrb[138].mxu1 }
 0x34b   : > { %v5835_v55 = vpop.f32.mrb[139].mxu1 }
 0x34c   : > { %v5836_v5 = vadd.f32 %v5835_v55, %v5834_v29 }
 0x34d   : > { %v5745_v61 = vpop.f32.mrb[124].mxu0 }
 0x34e   : > { %v5746_v36 = vpop.f32.mrb[125].mxu0 }
 0x34f   : > { %v5747_v2 = vadd.f32 %v5746_v36, %v5745_v61  ;;  %v5748_v44 = vpop.f32.mrb[126].mxu0 }
 0x350   : > { %v5749_v43 = vpop.f32.mrb[127].mxu0 }
 0x351   : > { %v8390_v41 = vadd.f32 %v5827_v25, %v5747_v2  ;;  %v5750_v11 = vadd.f32 %v5749_v43, %v5748_v44 }
 0x352   : > { %v5837_v50 = vpop.f32.mrb[140].mxu1 }
 0x353   : > { %v8392_v60 = vadd.f32 %v5830_v51, %v5750_v11  ;;  %v5838_v42 = vpop.f32.mrb[141].mxu1 }
 0x354   : > { %v5839_v54 = vadd.f32 %v5838_v42, %v5837_v50  ;;  %v5840_v53 = vpop.f32.mrb[142].mxu1 }
 0x355   : > { %v5751_v24 = vpop.f32.mrb[128].mxu0  ;;  %v5841_v26 = vpop.f32.mrb[143].mxu1 }
 0x356   : > { %v5752_v49 = vpop.f32.mrb[129].mxu0  ;;  %v5842_v14 = vadd.f32 %v5841_v26, %v5840_v53 }
 0x357   : > { %v5753_v52 = vadd.f32 %v5752_v49, %v5751_v24  ;;  %v5754_v17 = vpop.f32.mrb[130].mxu0 }
 0x358   : > { %v5755_v13 = vpop.f32.mrb[131].mxu0 }
 0x359   : > { %v8394_v62 = vadd.f32 %v5833_v6, %v5753_v52  ;;  %v5756_v7 = vadd.f32 %v5755_v13, %v5754_v17 }
 0x35a   : > { %v5843_v1 = vpop.f32.mrb[144].mxu1 }
 0x35b   : > { %v8396_v47 = vadd.f32 %v5836_v5, %v5756_v7  ;;  %v5844_v19 = vpop.f32.mrb[145].mxu1 }
 0x35c   : > { %v5845_v20 = vadd.f32 %v5844_v19, %v5843_v1  ;;  %v5846_v32 = vpop.f32.mrb[146].mxu1 }
 0x35d   : > { %v5757_v48 = vpop.f32.mrb[132].mxu0  ;;  %v5847_v21 = vpop.f32.mrb[147].mxu1 }
 0x35e   : > { %v5758_v31 = vpop.f32.mrb[133].mxu0  ;;  %v5848_v40 = vadd.f32 %v5847_v21, %v5846_v32 }
 0x35f   : > { %v5759_v22 = vadd.f32 %v5758_v31, %v5757_v48  ;;  %v5760_v57 = vpop.f32.mrb[134].mxu0 }
 0x360   : > { %v5761_v37 = vpop.f32.mrb[135].mxu0 }
 0x361   : > { %v8398_v59 = vadd.f32 %v5839_v54, %v5759_v22  ;;  %v5762_v9 = vadd.f32 %v5761_v37, %v5760_v57 }
 0x363   : > { %v8400_v33 = vadd.f32 %v5842_v14, %v5762_v9 }
 0x365   : > { %v5763_v4 = vpop.f32.mrb[136].mxu0 }
 0x366   : > { %v5764_v38 = vpop.f32.mrb[137].mxu0 }
 0x367   : > { %v5765_v23 = vadd.f32 %v5764_v38, %v5763_v4  ;;  %v5766_v10 = vpop.f32.mrb[138].mxu0 }
 0x368   : > { %v5767_v25 = vpop.f32.mrb[139].mxu0 }
 0x369   : > { %v8402_v15 = vadd.f32 %v5845_v20, %v5765_v23  ;;  %v5768_v35 = vadd.f32 %v5767_v25, %v5766_v10 }
 0x36b   : > { %v8404_v51 = vadd.f32 %v5848_v40, %v5768_v35 }
 0x372   : > { %v6215_v12 = vpop.f32.mrb[148].mxu1 }
 0x373   : > { %4717 = vst [vmem:[%s435_s26 + $0x10] sm:$0xff] %v6215_v12  ;;  %v4684_v34 = vpop.f32.mrb[149].mxu1  ;;  %v4738_v58 = vmul.f32 %v6215_v12, %v6215_v12 }
 0x374   : > { %4715 = vst [vmem:[%s435_s26] sm:$0xff] %v4684_v34  ;;  %v4736_v3 = vmul.f32 %v4684_v34, %v4684_v34  ;;  %v6216_v63 = vpop.f32.mrb[150].mxu1 }
 0x375   : > { %4718 = vst [vmem:[%s435_s26 + $0x18] sm:$0xff] %v6216_v63  ;;  %v4687_v46 = vpop.f32.mrb[151].mxu1  ;;  %v4739_v6 = vmul.f32 %v6216_v63, %v6216_v63 }
 0x376   : > { %4716 = vst [vmem:[%s435_s26 + $0x8] sm:$0xff] %v4687_v46  ;;  %v4723_v30 = vadd.f32 %v4687_v46, %v4684_v34  ;;  %v4737_v28 = vmul.f32 %v4687_v46, %v4687_v46 }
 0x378   : > { %v4724_v29 = vadd.f32 %v6215_v12, %v4723_v30  ;;  %v4744_v55 = vadd.f32 %v4737_v28, %v4736_v3 }
 0x37a   : > { %v4745_v5 = vadd.f32 %v4744_v55, %v4738_v58  ;;  %v6219_v61 = vpop.f32.mrb[152].mxu1  ;;  %v4725_v36 = vadd.f32 %v6216_v63, %v4724_v29 }
 0x37b   : > { %4721 = vst [vmem:[%s435_s26 + $0x30] sm:$0xff] %v6219_v61  ;;  %v4700_v2 = vpop.f32.mrb[153].mxu1  ;;  %v4742_v54 = vmul.f32 %v6219_v61, %v6219_v61 }
 0x37c   : > { %4719 = vst [vmem:[%s435_s26 + $0x20] sm:$0xff] %v4700_v2  ;;  %v4726_v44 = vadd.f32 %v4725_v36, %v4700_v2  ;;  %v4740_v43 = vmul.f32 %v4700_v2, %v4700_v2  ;;  %v4746_v11 = vadd.f32 %v4745_v5, %v4739_v6  ;;  %v6220_v50 = vpop.f32.mrb[154].mxu1 }
 0x37d   : > { %4722 = vst [vmem:[%s435_s26 + $0x38] sm:$0xff] %v6220_v50  ;;  %v4703_v42 = vpop.f32.mrb[155].mxu1  ;;  %v4743_v49 = vmul.f32 %v6220_v50, %v6220_v50 }
 0x37e   : > { %v4747_v53 = vadd.f32 %v4746_v11, %v4740_v43  ;;  %4720 = vst [vmem:[%s435_s26 + $0x28] sm:$0xff] %v4703_v42  ;;  %v4727_v24 = vadd.f32 %v4726_v44, %v4703_v42  ;;  %v4741_v26 = vmul.f32 %v4703_v42, %v4703_v42 }
 0x380   : > { %v4728_v14 = vadd.f32 %v6219_v61, %v4727_v24  ;;  %v4748_v52 = vadd.f32 %v4747_v53, %v4741_v26 }
 0x382   : > { %v4729_v17 = vadd.f32 %v6220_v50, %v4728_v14  ;;  %v4749_v13 = vadd.f32 %v4748_v52, %v4742_v54 }
 0x384   : > { %v4730_v7 = vrot.slane %v4729_v17, 4  ;;  %v4750_v1 = vadd.f32 %v4749_v13, %v4743_v49 }
 0x386   : > { %v4731_v19 = vadd.f32 %v4730_v7, %v4729_v17  ;;  %v4751_v20 = vrot.slane %v4750_v1, 4 }
 0x388   : > { %v4732_v32 = vrot.slane %v4731_v19, 2  ;;  %v4752_v48 = vadd.f32 %v4751_v20, %v4750_v1 }
 0x38a   : > { %v4733_v21 = vadd.f32 %v4732_v32, %v4731_v19  ;;  %v4753_v31 = vrot.slane %v4752_v48, 2 }
 0x38c   : > { %v4734_v40 = vrot.slane %v4733_v21, 1  ;;  %v4754_v22 = vadd.f32 %v4753_v31, %v4752_v48 }
 0x38e   : > { %v4735_v57 = vadd.f32 %v4734_v40, %v4733_v21  ;;  %v4755_v37 = vrot.slane %v4754_v22, 1 }
 0x390   : > { %v4756_v9 = vadd.f32 %v4755_v37, %v4754_v22 }
 0x392   : > { %v4757_v4 = vsel %vm711_vm0, %v4735_v57, %v4756_v9 }
 0x393   : > { %4758 = vst [vmem:[%s439_s29] sm:$0x3] %v4757_v4 }
 0x3ad   : > { %v5881_v38 = vpop.f32.mrb[156].mxu0 }
 0x3ae   : > { %v5882_v23 = vpop.f32.mrb[157].mxu0 }
 0x3af   : > { %v5883_v10 = vadd.f32 %v5882_v23, %v5881_v38  ;;  %v5884_v25 = vpop.f32.mrb[158].mxu0 }
 0x3b0   : > { %v5885_v35 = vpop.f32.mrb[159].mxu0 }
 0x3b1   : > { %v5886_v12 = vadd.f32 %v5885_v35, %v5884_v25  ;;  %v8419_v34 = vadd.f32 %v8370_v56, %v5883_v10 }
 0x3b3   : > { %v8422_v3 = vadd.f32 %v8373_v27, %v5886_v12 }
 0x3b5   : > { %v5887_v63 = vpop.f32.mrb[160].mxu0 }
 0x3b6   : > { %v5888_v46 = vpop.f32.mrb[161].mxu0 }
 0x3b7   : > { %v5889_v58 = vadd.f32 %v5888_v46, %v5887_v63  ;;  %v5890_v30 = vpop.f32.mrb[162].mxu0 }
 0x3b8   : > { %v5891_v28 = vpop.f32.mrb[163].mxu0 }
 0x3b9   : > { %v5892_v6 = vadd.f32 %v5891_v28, %v5890_v30  ;;  %v6334_v29 = vadd.f32 %v8377_v16, %v5889_v58 }
 0x3bb   : > { %v8426_v55 = vadd.f32 %v8380_v0, %v5892_v6 }
 0x3bd   : > { %v5893_v5 = vpop.f32.mrb[164].mxu0 }
 0x3be   : > { %v5894_v61 = vpop.f32.mrb[165].mxu0 }
 0x3bf   : > { %v5895_v36 = vadd.f32 %v5894_v61, %v5893_v5  ;;  %v5896_v2 = vpop.f32.mrb[166].mxu0 }
 0x3c0   : > { %v5897_v56 = vpop.f32.mrb[167].mxu0 }
 0x3c1   : > { %v5898_v44 = vadd.f32 %v5897_v56, %v5896_v2  ;;  %v8429_v27 = vadd.f32 %v8382_v8, %v5895_v36 }
 0x3c3   : > { %v8432_v43 = vadd.f32 %v8384_v45, %v5898_v44 }
 0x3c5   : > { %v5899_v11 = vpop.f32.mrb[168].mxu0 }
 0x3c6   : > { %v5900_v50 = vpop.f32.mrb[169].mxu0 }
 0x3c7   : > { %v5901_v42 = vadd.f32 %v5900_v50, %v5899_v11  ;;  %v5902_v54 = vpop.f32.mrb[170].mxu0 }
 0x3c8   : > { %v5903_v16 = vpop.f32.mrb[171].mxu0 }
 0x3c9   : > { %v5904_v53 = vadd.f32 %v5903_v16, %v5902_v54  ;;  %v8435_v0 = vadd.f32 %v8386_v39, %v5901_v42 }
 0x3cb   : > { %v8438_v24 = vadd.f32 %v8388_v18, %v5904_v53 }
 0x3cd   : > { %v5905_v26 = vpop.f32.mrb[172].mxu0 }
 0x3ce   : > { %v5906_v49 = vpop.f32.mrb[173].mxu0 }
 0x3cf   : > { %v5907_v14 = vadd.f32 %v5906_v49, %v5905_v26  ;;  %v5908_v8 = vpop.f32.mrb[174].mxu0 }
 0x3d0   : > { %v5909_v52 = vpop.f32.mrb[175].mxu0 }
 0x3d1   : > { %v5910_v17 = vadd.f32 %v5909_v52, %v5908_v8  ;;  %v8441_v45 = vadd.f32 %v8390_v41, %v5907_v14 }
 0x3d3   : > { %v8444_v13 = vadd.f32 %v8392_v60, %v5910_v17  ;;  %v4432_v60 = vlaneseq }
 0x3d5   : > { %v5911_v7 = vpop.f32.mrb[176].mxu0  ;;  %v4433_v4 = vshrl.u32 %v4432_v60, 7 }
 0x3d6   : > { %v5912_v1 = vpop.f32.mrb[177].mxu0 }
 0x3d7   : > { %v5913_v19 = vadd.f32 %v5912_v1, %v5911_v7  ;;  %v5914_v39 = vpop.f32.mrb[178].mxu0  ;;  %v4434_v25 = vadd.s32 8, %v4433_v4  ;;  %v4439_v63 = vand.u32 1, %v4433_v4 }
 0x3d8   : > { %v5915_v20 = vpop.f32.mrb[179].mxu0 }
 0x3d9   : > { %v5916_v32 = vadd.f32 %v5915_v20, %v5914_v39  ;;  %v8447_v18 = vadd.f32 %v8394_v62, %v5913_v19  ;;  %vm8470_vm2 = vcmp.eq.s32.totalorder %v4439_v63, 0 }
 0x3db   : > { %v8450_v48 = vadd.f32 %v8396_v47, %v5916_v32 }
 0x3dd   : > { %v5917_v21 = vpop.f32.mrb[180].mxu0 }
 0x3de   : > { %v5918_v31 = vpop.f32.mrb[181].mxu0 }
 0x3df   : > { %v5919_v40 = vadd.f32 %v5918_v31, %v5917_v21  ;;  %v5920_v41 = vpop.f32.mrb[182].mxu0 }
 0x3e0   : > { %v5921_v22 = vpop.f32.mrb[183].mxu0 }
 0x3e1   : > { %v5922_v57 = vadd.f32 %v5921_v22, %v5920_v41  ;;  %v8453_v37 = vadd.f32 %v8398_v59, %v5919_v40  ;;  %v4446_v59 = vand.u32 1, %v4434_v25 }
 0x3e3   : > { %v8456_v9 = vadd.f32 %v8400_v33, %v5922_v57  ;;  %vm8477_vm3 = vcmp.eq.s32.totalorder %v4446_v59, 0 }
 0x3e5   : > { %v5923_v62 = vpop.f32.mrb[184].mxu0 }
 0x3e6   : > { %v5924_v38 = vpop.f32.mrb[185].mxu0 }
 0x3e7   : > { %v5925_v23 = vadd.f32 %v5924_v38, %v5923_v62  ;;  %v5926_v47 = vpop.f32.mrb[186].mxu0 }
 0x3e8   : > { %v5927_v10 = vpop.f32.mrb[187].mxu0 }
 0x3e9   : > { %v5928_v35 = vadd.f32 %v5927_v10, %v5926_v47  ;;  %v8459_v12 = vadd.f32 %v8402_v15, %v5925_v23 }
 0x3eb   : > { %v8463_v46 = vadd.f32 %v8404_v51, %v5928_v35 }
 0x3ed   : > { %v6183_v33 = vpop.f32.mrb[140].mxu0 }
 0x3ee   : > { %v6335_v58 = vadd.f32 %v6334_v29, %v6183_v33  ;;  %v4337_v30 = vpop.f32.mrb[141].mxu0 }
 0x3ef   : > { %v6338_v51 = vadd.f32 %v8419_v34, %v4337_v30  ;;  %v6184_v28 = vpop.f32.mrb[142].mxu0 }
 0x3f0   : > { %4418 = vst [vmem:[%s8468_s14 + $0x10] sm:$0xff] %v6335_v58  ;;  %v6341_v6 = vadd.f32 %v8426_v55, %v6184_v28  ;;  %v4340_v61 = vpop.f32.mrb[143].mxu0  ;;  %v4471_v2 = vsel %vm8470_vm2, %v6335_v58, 0.0 }
 0x3f1   : > { %4416 = vst [vmem:[%s8468_s14] sm:$0xff] %v6338_v51  ;;  %v4469_v29 = vsel %vm8470_vm2, %v6338_v51, 0.0  ;;  %v6344_v36 = vadd.f32 %v8422_v3, %v4340_v61  ;;  %v4508_v42 = vmul.f32 %v4471_v2, %v4471_v2 }
 0x3f2   : > { %4419 = vst [vmem:[%s8468_s14 + $0x18] sm:$0xff] %v6341_v6  ;;  %v4506_v55 = vmul.f32 %v4469_v29, %v4469_v29  ;;  %v4472_v11 = vsel %vm8477_vm3, %v6341_v6, 0.0 }
 0x3f3   : > { %4417 = vst [vmem:[%s8468_s14 + $0x8] sm:$0xff] %v6344_v36  ;;  %v4470_v34 = vsel %vm8477_vm3, %v6344_v36, 0.0  ;;  %v4509_v14 = vmul.f32 %v4472_v11, %v4472_v11 }
 0x3f4   : > { %v4485_v56 = vadd.f32 %v4470_v34, %v4469_v29  ;;  %v4507_v44 = vmul.f32 %v4470_v34, %v4470_v34 }
 0x3f5   : > { %v6187_v50 = vpop.f32.mrb[144].mxu0 }
 0x3f6   : > { %v4486_v54 = vadd.f32 %v4485_v56, %v4471_v2  ;;  %v4522_v3 = vadd.f32 %v4507_v44, %v4506_v55  ;;  %v6347_v16 = vadd.f32 %v8435_v0, %v6187_v50  ;;  %v4353_v53 = vpop.f32.mrb[145].mxu0 }
 0x3f7   : > { %v6350_v26 = vadd.f32 %v8429_v27, %v4353_v53  ;;  %v6188_v49 = vpop.f32.mrb[146].mxu0 }
 0x3f8   : > { %v4523_v8 = vadd.f32 %v4522_v3, %v4508_v42  ;;  %4422 = vst [vmem:[%s8468_s14 + $0x30] sm:$0xff] %v6347_v16  ;;  %v4487_v52 = vadd.f32 %v4486_v54, %v4472_v11  ;;  %v6353_v17 = vadd.f32 %v8438_v24, %v6188_v49  ;;  %v4356_v7 = vpop.f32.mrb[147].mxu0  ;;  %v4475_v27 = vsel %vm8470_vm2, %v6347_v16, 0.0 }
 0x3f9   : > { %4420 = vst [vmem:[%s8468_s14 + $0x20] sm:$0xff] %v6350_v26  ;;  %v4473_v1 = vsel %vm8470_vm2, %v6350_v26, 0.0  ;;  %v6356_v19 = vadd.f32 %v8432_v43, %v4356_v7  ;;  %v4512_v41 = vmul.f32 %v4475_v27, %v4475_v27 }
 0x3fa   : > { %v4488_v0 = vadd.f32 %v4487_v52, %v4473_v1  ;;  %v4510_v39 = vmul.f32 %v4473_v1, %v4473_v1  ;;  %v4524_v20 = vadd.f32 %v4523_v8, %v4509_v14  ;;  %4423 = vst [vmem:[%s8468_s14 + $0x38] sm:$0xff] %v6353_v17  ;;  %v4476_v40 = vsel %vm8477_vm3, %v6353_v17, 0.0 }
 0x3fb   : > { %4421 = vst [vmem:[%s8468_s14 + $0x28] sm:$0xff] %v6356_v19  ;;  %v4474_v32 = vsel %vm8477_vm3, %v6356_v19, 0.0  ;;  %v4513_v23 = vmul.f32 %v4476_v40, %v4476_v40 }
 0x3fc   : > { %v4525_v24 = vadd.f32 %v4524_v20, %v4510_v39  ;;  %v4489_v21 = vadd.f32 %v4488_v0, %v4474_v32  ;;  %v4511_v31 = vmul.f32 %v4474_v32, %v4474_v32 }
 0x3fd   : > { %v6191_v43 = vpop.f32.mrb[148].mxu0 }
 0x3fe   : > { %v4490_v22 = vadd.f32 %v4489_v21, %v4475_v27  ;;  %v4526_v60 = vadd.f32 %v4525_v24, %v4511_v31  ;;  %v6359_v57 = vadd.f32 %v8447_v18, %v6191_v43  ;;  %v4369_v4 = vpop.f32.mrb[149].mxu0 }
 0x3ff   : > { %v6362_v62 = vadd.f32 %v8441_v45, %v4369_v4  ;;  %v6192_v38 = vpop.f32.mrb[150].mxu0 }
 0x400   : > { %v4527_v47 = vadd.f32 %v4526_v60, %v4512_v41  ;;  %4426 = vst [vmem:[%s8468_s14 + $0x50] sm:$0xff] %v6359_v57  ;;  %v4491_v10 = vadd.f32 %v4490_v22, %v4476_v40  ;;  %v6365_v25 = vadd.f32 %v8450_v48, %v6192_v38  ;;  %v4372_v35 = vpop.f32.mrb[151].mxu0  ;;  %v4479_v45 = vsel %vm8470_vm2, %v6359_v57, 0.0 }
 0x401   : > { %4424 = vst [vmem:[%s8468_s14 + $0x40] sm:$0xff] %v6362_v62  ;;  %v4477_v63 = vsel %vm8470_vm2, %v6362_v62, 0.0  ;;  %v6368_v59 = vadd.f32 %v8444_v13, %v4372_v35  ;;  %v4516_v61 = vmul.f32 %v4479_v45, %v4479_v45 }
 0x402   : > { %v4492_v18 = vadd.f32 %v4491_v10, %v4477_v63  ;;  %v4514_v33 = vmul.f32 %v4477_v63, %v4477_v63  ;;  %v4528_v58 = vadd.f32 %v4527_v47, %v4513_v23  ;;  %4427 = vst [vmem:[%s8468_s14 + $0x58] sm:$0xff] %v6365_v25  ;;  %v4480_v6 = vsel %vm8477_vm3, %v6365_v25, 0.0 }
 0x403   : > { %4425 = vst [vmem:[%s8468_s14 + $0x48] sm:$0xff] %v6368_v59  ;;  %v4478_v30 = vsel %vm8477_vm3, %v6368_v59, 0.0  ;;  %v4517_v44 = vmul.f32 %v4480_v6, %v4480_v6 }
 0x404   : > { %v4529_v48 = vadd.f32 %v4528_v58, %v4514_v33  ;;  %v4493_v51 = vadd.f32 %v4492_v18, %v4478_v30  ;;  %v4515_v28 = vmul.f32 %v4478_v30, %v4478_v30 }
 0x405   : > { %v6195_v13 = vpop.f32.mrb[152].mxu0 }
 0x406   : > { %v4494_v29 = vadd.f32 %v4493_v51, %v4479_v45  ;;  %v4530_v36 = vadd.f32 %v4529_v48, %v4515_v28  ;;  %v6371_v2 = vadd.f32 %v8459_v12, %v6195_v13  ;;  %v4385_v34 = vpop.f32.mrb[153].mxu0 }
 0x407   : > { %v6374_v55 = vadd.f32 %v8453_v37, %v4385_v34  ;;  %v6196_v56 = vpop.f32.mrb[154].mxu0 }
 0x408   : > { %v4531_v11 = vadd.f32 %v4530_v36, %v4516_v61  ;;  %4430 = vst [vmem:[%s8468_s14 + $0x70] sm:$0xff] %v6371_v2  ;;  %v4495_v50 = vadd.f32 %v4494_v29, %v4480_v6  ;;  %v6377_v42 = vadd.f32 %v8463_v46, %v6196_v56  ;;  %v4388_v54 = vpop.f32.mrb[155].mxu0  ;;  %v4483_v37 = vsel %vm8470_vm2, %v6371_v2, 0.0 }
 0x409   : > { %4428 = vst [vmem:[%s8468_s14 + $0x60] sm:$0xff] %v6374_v55  ;;  %v4481_v3 = vsel %vm8470_vm2, %v6374_v55, 0.0  ;;  %v6380_v16 = vadd.f32 %v8456_v9, %v4388_v54  ;;  %v4520_v17 = vmul.f32 %v4483_v37, %v4483_v37 }
 0x40a   : > { %v4496_v12 = vadd.f32 %v4495_v50, %v4481_v3  ;;  %v4518_v53 = vmul.f32 %v4481_v3, %v4481_v3  ;;  %v4532_v26 = vadd.f32 %v4531_v11, %v4517_v44  ;;  %4431 = vst [vmem:[%s8468_s14 + $0x78] sm:$0xff] %v6377_v42  ;;  %v4484_v52 = vsel %vm8477_vm3, %v6377_v42, 0.0 }
 0x40b   : > { %4429 = vst [vmem:[%s8468_s14 + $0x68] sm:$0xff] %v6380_v16  ;;  %v4482_v49 = vsel %vm8477_vm3, %v6380_v16, 0.0  ;;  %v4521_v1 = vmul.f32 %v4484_v52, %v4484_v52 }
 0x40c   : > { %v4533_v14 = vadd.f32 %v4532_v26, %v4518_v53  ;;  %v4497_v46 = vadd.f32 %v4496_v12, %v4482_v49  ;;  %v4519_v8 = vmul.f32 %v4482_v49, %v4482_v49 }
 0x40e   : > { %v4498_v7 = vadd.f32 %v4497_v46, %v4483_v37  ;;  %v4534_v9 = vadd.f32 %v4533_v14, %v4519_v8 }
 0x410   : > { %v4499_v19 = vadd.f32 %v4498_v7, %v4484_v52  ;;  %v4535_v0 = vadd.f32 %v4534_v9, %v4520_v17 }
 0x412   : > { %v4500_v39 = vrot.slane %v4499_v19, 4  ;;  %v4536_v15 = vadd.f32 %v4535_v0, %v4521_v1 }
 0x414   : > { %v4501_v20 = vadd.f32 %v4500_v39, %v4499_v19  ;;  %v4537_v27 = vrot.slane %v4536_v15, 4 }
 0x416   : > { %v4502_v32 = vrot.slane %v4501_v20, 2  ;;  %v4538_v24 = vadd.f32 %v4537_v27, %v4536_v15 }
 0x418   : > { %v4503_v21 = vadd.f32 %v4502_v32, %v4501_v20  ;;  %v4539_v31 = vrot.slane %v4538_v24, 2 }
 0x41a   : > { %v4504_v40 = vrot.slane %v4503_v21, 1  ;;  %v4540_v43 = vadd.f32 %v4539_v31, %v4538_v24 }
 0x41c   : > { %v4541_v41 = vrot.slane %v4540_v43, 1  ;;  %v4505_v5 = vadd.f32 %v4504_v40, %v4503_v21 }
 0x41e   : > { %v4542_v22 = vadd.f32 %v4541_v41, %v4540_v43 }
 0x420   : > { %v4544_v60 = vsel %vm711_vm0, %v4505_v5, %v4542_v22 }
 0x421   : > { %4545 = vst [vmem:[%s430_s19] sm:$0x3] %v4544_v60 }
 0x422 PF: > { %s22_s17 = sadd.s32 1, %s6645_s17  }
 0x423   : > { %p19_p4 = scmp.ge.s32.totalorder %s22_s17, 4  }
 0x425   :  { %21 = sbr.rel (!%p19_p4) target bundleno = 1 (0x1), region = 125 }

</bundles_post_ra>
